<compile_context>
chip_gen: v7x
topology: tpu7x:2x2x1
jax: 0.10.0
libtpu: 0.0.40
codegen_flags: <defaults>
</compile_context>

<pallas_src>
import jax
import jax.numpy as jnp
from jax.experimental import pallas as pl
from jax.experimental.pallas import tpu as pltpu

S_LEN = 8      # src length; trg is None -> max_len = src.size(0)
BATCH = 8
HIDDEN = 32
VOCAB = 32
GAMMA = 0.95
EPS = float(jnp.finfo(jnp.float32).eps)


# --------------------------- fused seq2seq kernel ---------------------------
def _seq2seq_kernel(emb_ref,      # (S*B, H)   embedded src, time-major rows
                    wpack_ref,    # (5H+8,128) packed weights/biases (see wrapper)
                    whf_ref,      # (H, S*H+3H) fused [tile(Wah,S) | dec_Wh]
                    out_ref):     # (B, max_len*V) log-prob slab (cols 0:V zero)
    f32 = jnp.float32
    SB, H = emb_ref.shape
    S = S_LEN
    B = SB // S
    SH = S * H
    V = VOCAB
    H3 = 3 * H
    max_len = out_ref.shape[1] // V
    assert H & (H - 1) == 0
    log2h = H.bit_length() - 1

    # ---------------- unpack parameters (one-time static slices) ----------------
    enc_wi = wpack_ref[0:H, :][:, :H3]                   # (H, 3H)
    enc_wh = wpack_ref[H:2 * H, :][:, :H3]               # (H, 3H)
    m_emb = wpack_ref[2 * H:3 * H, :][:, :H3]            # (V, 3H)  E_dec @ Wi[:H]
    w_cf = wpack_ref[3 * H:4 * H, :][:, :H3 + V]         # (H, 3H+V) [Wi[H:] | Wo[H:]]
    blk = wpack_ref[4 * H:5 * H, :]
    wae = blk[:, :H]                                     # (H, H)
    wo_h = blk[:, H:H + V]                               # (H, V)   Wo[:H]
    bias = wpack_ref[5 * H:5 * H + 8, :]                 # (8, 128)
    enc_bi = bias[0:1, :H3]
    enc_bh = bias[1:2, :H3]
    dec_bi = bias[2:3, :H3]
    dec_bh = bias[3:4, :H3]
    ba = bias[4:5, :H]
    bo = bias[4:5, H:H + V]
    va = bias[4:5, H + V:H + V + H]
    w_h = whf_ref[...]                                   # (H, SH+3H)

    # ------------------------------ encoder ------------------------------------
    # input-side gates for all time steps in one MXU dot (hoisted off recurrence)
    gi_all = jnp.dot(emb_ref[...], enc_wi, preferred_element_type=f32) + enc_bi
    enc_bh_b = jnp.broadcast_to(enc_bh, (B, H3))         # hoisted bias broadcast

    h = jnp.zeros((B, H), f32)
    enc_states = []
    for t in range(S):                                   # fully unrolled (S=8)
        gi = gi_all[t * B:(t + 1) * B]                   # (B, 3H)
        gh = jnp.dot(h, enc_wh, preferred_element_type=f32) + enc_bh_b
        rz = jax.nn.sigmoid(gi[:, :2 * H] + gh[:, :2 * H])
        r = rz[:, :H]
        z = rz[:, H:]
        n = jnp.tanh(gi[:, 2 * H:] + r * gh[:, 2 * H:])
        h = (1.0 - z) * n + z * h
        enc_states.append(h)
    # h now holds the encoder final hidden -> initial decoder hidden.

    # lane-dense encoder slabs (B, S*H): segment s = encoder state at time s
    enc_lanes = jnp.concatenate(enc_states, axis=1)                      # (B, SH)
    ee_lanes = jnp.concatenate(
        [jnp.dot(es, wae, preferred_element_type=f32) for es in enc_states],
        axis=1) + jnp.tile(ba, (1, S))                                   # (B, SH)

    # -------------------- hoisted decoder-loop invariants ----------------------
    dec_bi_b = jnp.broadcast_to(dec_bi, (B, H3))
    dec_bh_b = jnp.broadcast_to(dec_bh, (B, H3))
    bo_b = jnp.broadcast_to(bo, (B, V))
    va_b = jnp.broadcast_to(jnp.tile(va, (1, S)), (B, SH))
    col = jax.lax.broadcasted_iota(jnp.int32, (B, V), 1)

    # 0/1 pattern matrices for lane-dense attention (built once from iotas)
    lane_sh = jax.lax.broadcasted_iota(jnp.int32, (S, SH), 1)
    row_s = jax.lax.broadcasted_iota(jnp.int32, (S, SH), 0)
    expand = ((lane_sh >> log2h) == row_s).astype(f32)          # (S, SH)
    r_sh = jax.lax.broadcasted_iota(jnp.int32, (SH, H), 0)
    c_h = jax.lax.broadcasted_iota(jnp.int32, (SH, H), 1)
    collapse = ((r_sh & (H - 1)) == c_h).astype(f32)            # (SH, H)
    r2 = jax.lax.broadcasted_iota(jnp.int32, (SH, S), 0)
    c2 = jax.lax.broadcasted_iota(jnp.int32, (SH, S), 1)
    seg_sum = ((r2 >> log2h) == c2).astype(f32)                 # (SH, S)

    # -------------------- decoder (unrolled, greedy; trg=None) -----------------
    one_hot = (col == 0).astype(f32)            # initial token = 0 (as in ref)
    outs = [jnp.zeros((B, V), f32)]             # outputs[0] stays zero
    for _ in range(max_len - 1):
        # token-side gate contribution (embedding folded into GRU input weight)
        gemb = jnp.dot(one_hot, m_emb, preferred_element_type=f32)       # (B, 3H)

        # single h-side dot: [replicated attention proj | GRU hidden gates]
        hw = jnp.dot(h, w_h, preferred_element_type=f32)                 # (B, SH+3H)
        e_h_rep = hw[:, :SH]
        gh = hw[:, SH:] + dec_bh_b

        # lane-dense additive attention over the S encoder positions
        energy = jnp.tanh(e_h_rep + ee_lanes)                            # (B, SH)
        score = jnp.dot(energy * va_b, seg_sum,
                        preferred_element_type=f32)                      # (B, S)
        m = jnp.max(score, axis=-1, keepdims=True)
        ex = jnp.exp(score - m)
        attn = ex * pl.reciprocal(jnp.sum(ex, axis=-1, keepdims=True),
                                  approx=True)                           # (B, S)
        attn_rep = jnp.dot(attn, expand, preferred_element_type=f32)     # (B, SH)
        context = jnp.dot(attn_rep * enc_lanes, collapse,
                          preferred_element_type=f32)                    # (B, H)

        # context-side fused dot: [GRU input gates | output projection]
        cw = jnp.dot(context, w_cf, preferred_element_type=f32)          # (B, 3H+V)

        # GRU cell
        gi = gemb + cw[:, :H3] + dec_bi_b
        rz = jax.nn.sigmoid(gi[:, :2 * H] + gh[:, :2 * H])
        r = rz[:, :H]
        z = rz[:, H:]
        n = jnp.tanh(gi[:, 2 * H:] + r * gh[:, 2 * H:])
        h_new = (1.0 - z) * n + z * h

        # output projection (split; no concat) -> logits
        logits = (jnp.dot(h_new, wo_h, preferred_element_type=f32)
                  + cw[:, H3:] + bo_b)                                   # (B, V)

        # greedy top1 from logits (same argmax as log-probs) -> next token
        mx = jnp.max(logits, axis=-1, keepdims=True)
        idx = jnp.min(jnp.where(logits >= mx, col, V), axis=-1, keepdims=True)
        one_hot = (col == idx).astype(f32)
        h = h_new

        # log-softmax for the output slab (off the recurrent critical path)
        lse = mx + jnp.log(jnp.sum(jnp.exp(logits - mx), axis=-1, keepdims=True))
        outs.append(logits - lse)

    # single lane-dense (8, 256) store: 2 unmasked vregs
    out_ref[...] = jnp.concatenate(outs, axis=1)


# ------------------------------ param packing --------------------------------
def _pack_params(params):
    """Pack all weights into (5H+8,128) + (H, S*H+3H) lane-aligned buffers."""
    H, V, S = HIDDEN, VOCAB, S_LEN
    f32 = jnp.float32

    def pad128(w):
        return jnp.pad(w, ((0, 0), (0, 128 - w.shape[1])))

    m_emb = params["E_dec"] @ params["dec_Wi"][:H, :]                      # (V, 3H)
    w_cf = jnp.concatenate([params["dec_Wi"][H:, :],
                            params["dec_Wo"][H:, :]], axis=1)              # (H, 3H+V)
    wae_woh = jnp.concatenate([params["dec_Wae"],
                               params["dec_Wo"][:H, :]], axis=1)           # (H, H+V)

    bias_blk = jnp.zeros((8, 128), f32)
    bias_blk = bias_blk.at[0, :3 * H].set(params["enc_bi"][0])
    bias_blk = bias_blk.at[1, :3 * H].set(params["enc_bh"][0])
    bias_blk = bias_blk.at[2, :3 * H].set(params["dec_bi"][0])
    bias_blk = bias_blk.at[3, :3 * H].set(params["dec_bh"][0])
    bias_blk = bias_blk.at[4, :H].set(params["dec_ba"][0])
    bias_blk = bias_blk.at[4, H:H + V].set(params["dec_bo"][0])
    bias_blk = bias_blk.at[4, H + V:H + V + H].set(params["dec_va"][0])

    wpack = jnp.concatenate([
        pad128(params["enc_Wi"]),      # rows       0 :   H
        pad128(params["enc_Wh"]),      # rows       H : 2*H
        pad128(m_emb),                 # rows     2*H : 3*H
        pad128(w_cf),                  # rows     3*H : 4*H
        pad128(wae_woh),               # rows     4*H : 5*H
        bias_blk,                      # rows     5*H : 5*H+8
    ], axis=0).astype(f32)

    # fused h-side weight: [tile(Wah, S) | dec_Wh]  -> (H, S*H + 3H)
    w_hf = jnp.concatenate([jnp.tile(params["dec_Wah"], (1, S)),
                            params["dec_Wh"]], axis=1).astype(f32)
    return wpack, w_hf


# --------------------------------- wrapper -----------------------------------
def seq2seq_forward(src, params):
    S, B = src.shape
    max_len = S                                   # trg is None
    emb_flat = params["E_enc"][src].reshape(S * B, HIDDEN)   # embedding gather (glue)
    wpack, w_hf = _pack_params(params)

    vmem = pl.BlockSpec(memory_space=pltpu.MemorySpace.VMEM)
    out_flat = pl.pallas_call(
        _seq2seq_kernel,
        out_shape=jax.ShapeDtypeStruct((B, max_len * VOCAB), jnp.float32),
        in_specs=[vmem, vmem, vmem],
        out_specs=vmem,
    )(emb_flat, wpack, w_hf)

    outputs = out_flat.reshape(B, max_len, VOCAB).transpose(1, 0, 2)  # (T, B, V)

    # Categorical(exp(logp)).log_prob(argmax) == max(logp); row 0 is all-zero,
    # so this also reproduces RL_logprobs[0] == 0.
    rl_logprobs = jnp.max(outputs, axis=-1)       # (max_len, B)

    # ---- RL reward bookkeeping (glue; trg is None so rewards are all zero) ----
    # TODO(synk): MyDataset.arr2txt / tensor2text / edit-distance rewards have no
    # Pallas equivalent; with trg=None the reference leaves tru_length == 0 (0/0
    # -> NaN). We use tru_length = 1 so the (all-zero) rewards stay finite.
    tru_length = jnp.ones((B,), jnp.float32)
    reward_rl = jnp.zeros((max_len, B), jnp.float32)
    expected = [None] * max_len
    R1 = jnp.zeros((B,), jnp.float32)
    for t in reversed(range(max_len)):
        if t == 0:
            expected[t] = jnp.zeros((B,), jnp.float32)
        else:
            R1 = reward_rl[t] + GAMMA * R1
            expected[t] = R1
    reward_exp = jnp.stack(expected, axis=0) / tru_length          # (max_len, B)
    r_bt = reward_exp.T                                            # (B, max_len)
    reward_mean = jnp.mean(r_bt[:, 1:], axis=1)
    reward_std = jnp.std(r_bt[:, 1:], axis=1, ddof=1)
    norm = reward_exp.at[1:].set(
        (reward_exp[1:] - reward_mean) / (reward_std + EPS))
    rl_loss = jnp.sum(-rl_logprobs * norm)
    return outputs, rl_loss


# ------------------------------ parameter init --------------------------------
def init_params(key):
    ks = jax.random.split(key, 12)

    def w(k, shape, scale=0.1):
        return (scale * jax.random.normal(k, shape)).astype(jnp.float32)

    H, V = HIDDEN, VOCAB
    p = {}
    p["E_enc"] = w(ks[0], (V, H))
    # GRU gate weights fused along the output dim: columns = [r | z | n]
    p["enc_Wi"] = w(ks[1], (H, 3 * H))
    p["enc_Wh"] = w(ks[2], (H, 3 * H))
    p["enc_bi"] = jnp.zeros((1, 3 * H), jnp.float32)
    p["enc_bh"] = jnp.zeros((1, 3 * H), jnp.float32)
    p["E_dec"] = w(ks[3], (V, H))
    p["dec_Wah"] = w(ks[4], (H, H))
    p["dec_Wae"] = w(ks[5], (H, H))
    p["dec_ba"] = jnp.zeros((1, H), jnp.float32)
    p["dec_va"] = w(ks[6], (1, H))
    # decoder GRU input weights stacked over rows = [embedded ; context]
    p["dec_Wi"] = w(ks[7], (2 * H, 3 * H))
    p["dec_Wh"] = w(ks[8], (H, 3 * H))
    p["dec_bi"] = jnp.zeros((1, 3 * H), jnp.float32)
    p["dec_bh"] = jnp.zeros((1, 3 * H), jnp.float32)
    # output projection stacked over rows = [h_new ; context]
    p["dec_Wo"] = w(ks[9], (2 * H, V))
    p["dec_bo"] = jnp.zeros((1, V), jnp.float32)
    return p


if __name__ == "__main__":
    key = jax.random.PRNGKey(0)
    pkey, skey = jax.random.split(key)
    params = init_params(pkey)
    src = jax.random.randint(skey, (S_LEN, BATCH), 0, VOCAB, dtype=jnp.int32)

    outputs, rl_loss = jax.jit(seq2seq_forward)(src, params)
    jax.block_until_ready((outputs, rl_loss))

    assert outputs.shape == (S_LEN, BATCH, VOCAB)
    assert outputs.dtype == jnp.float32
    assert rl_loss.shape == ()
    assert bool(jnp.all(jnp.isfinite(outputs)))
    # row 0 must be zero (reference starts writing outputs at t=1)
    assert bool(jnp.all(outputs[0] == 0.0))
    assert bool(jnp.isfinite(rl_loss))
    print("KERNEL_OK")
</pallas_src>

<mosaic_0001>
module attributes {stable_mosaic.version = 11 : i64} {
  func.func @_seq2seq_kernel(%arg0: memref<64x32xf32, #tpu.memory_space<vmem>>, %arg1: memref<168x128xf32, #tpu.memory_space<vmem>>, %arg2: memref<32x352xf32, #tpu.memory_space<vmem>>, %arg3: memref<8x256xf32, #tpu.memory_space<vmem>>) attributes {dimension_semantics = [], scalar_prefetch = 0 : i64, scratch_operands = 0 : i64, tpu.core_type = #tpu.core_type<tc>} {
    %c0 = arith.constant 0 : index
    %c0_0 = arith.constant 0 : index
    %0 = vector.load %arg1[%c0, %c0_0] : memref<168x128xf32, #tpu.memory_space<vmem>>, vector<32x128xf32>
    %1 = vector.extract_strided_slice %0 {offsets = [0, 0], sizes = [32, 96], strides = [1, 1]} : vector<32x128xf32> to vector<32x96xf32>
    %c32 = arith.constant 32 : index
    %c0_1 = arith.constant 0 : index
    %2 = vector.load %arg1[%c32, %c0_1] : memref<168x128xf32, #tpu.memory_space<vmem>>, vector<32x128xf32>
    %3 = vector.extract_strided_slice %2 {offsets = [0, 0], sizes = [32, 96], strides = [1, 1]} : vector<32x128xf32> to vector<32x96xf32>
    %c64 = arith.constant 64 : index
    %c0_2 = arith.constant 0 : index
    %4 = vector.load %arg1[%c64, %c0_2] : memref<168x128xf32, #tpu.memory_space<vmem>>, vector<32x128xf32>
    %5 = vector.extract_strided_slice %4 {offsets = [0, 0], sizes = [32, 96], strides = [1, 1]} : vector<32x128xf32> to vector<32x96xf32>
    %c96 = arith.constant 96 : index
    %c0_3 = arith.constant 0 : index
    %6 = vector.load %arg1[%c96, %c0_3] : memref<168x128xf32, #tpu.memory_space<vmem>>, vector<32x128xf32>
    %c128 = arith.constant 128 : index
    %c0_4 = arith.constant 0 : index
    %7 = vector.load %arg1[%c128, %c0_4] : memref<168x128xf32, #tpu.memory_space<vmem>>, vector<32x128xf32>
    %8 = vector.extract_strided_slice %7 {offsets = [0, 0], sizes = [32, 32], strides = [1, 1]} : vector<32x128xf32> to vector<32x32xf32>
    %9 = vector.extract_strided_slice %7 {offsets = [0, 32], sizes = [32, 32], strides = [1, 1]} : vector<32x128xf32> to vector<32x32xf32>
    %c160 = arith.constant 160 : index
    %c0_5 = arith.constant 0 : index
    %10 = vector.load %arg1[%c160, %c0_5] : memref<168x128xf32, #tpu.memory_space<vmem>>, vector<8x128xf32>
    %11 = vector.extract_strided_slice %10 {offsets = [0, 0], sizes = [1, 96], strides = [1, 1]} : vector<8x128xf32> to vector<1x96xf32>
    %12 = vector.extract_strided_slice %10 {offsets = [1, 0], sizes = [1, 96], strides = [1, 1]} : vector<8x128xf32> to vector<1x96xf32>
    %13 = vector.extract_strided_slice %10 {offsets = [2, 0], sizes = [1, 96], strides = [1, 1]} : vector<8x128xf32> to vector<1x96xf32>
    %14 = vector.extract_strided_slice %10 {offsets = [3, 0], sizes = [1, 96], strides = [1, 1]} : vector<8x128xf32> to vector<1x96xf32>
    %15 = vector.extract_strided_slice %10 {offsets = [4, 0], sizes = [1, 32], strides = [1, 1]} : vector<8x128xf32> to vector<1x32xf32>
    %16 = vector.extract_strided_slice %10 {offsets = [4, 32], sizes = [1, 32], strides = [1, 1]} : vector<8x128xf32> to vector<1x32xf32>
    %17 = vector.extract_strided_slice %10 {offsets = [4, 64], sizes = [1, 32], strides = [1, 1]} : vector<8x128xf32> to vector<1x32xf32>
    %c0_6 = arith.constant 0 : index
    %c0_7 = arith.constant 0 : index
    %18 = vector.load %arg2[%c0_6, %c0_7] : memref<32x352xf32, #tpu.memory_space<vmem>>, vector<32x352xf32>
    %c0_8 = arith.constant 0 : index
    %c0_9 = arith.constant 0 : index
    %19 = vector.load %arg0[%c0_8, %c0_9] : memref<64x32xf32, #tpu.memory_space<vmem>>, vector<64x32xf32>
    %cst = arith.constant dense<0.000000e+00> : vector<64x96xf32>
    %20 = tpu.matmul %19, %1, %cst {dimension_numbers = #tpu.dot_dimension_numbers<[1], [0], [0], [1], [0, 0, 1, 1], [], []>} : vector<64x32xf32>, vector<32x96xf32>, vector<64x96xf32> -> vector<64x96xf32>
    %21 = vector.broadcast %11 : vector<1x96xf32> to vector<64x96xf32>
    %22 = arith.addf %20, %21 : vector<64x96xf32>
    %23 = vector.shape_cast %12 : vector<1x96xf32> to vector<1x96xf32>
    %24 = vector.broadcast %23 : vector<1x96xf32> to vector<8x96xf32>
    %cst_10 = arith.constant 0.000000e+00 : f32
    %25 = vector.broadcast %cst_10 : f32 to vector<8x32xf32>
    %26 = vector.extract_strided_slice %22 {offsets = [0, 0], sizes = [8, 96], strides = [1, 1]} : vector<64x96xf32> to vector<8x96xf32>
    %cst_11 = arith.constant dense<0.000000e+00> : vector<8x96xf32>
    %27 = tpu.matmul %25, %3, %cst_11 {dimension_numbers = #tpu.dot_dimension_numbers<[1], [0], [0], [1], [0, 0, 1, 1], [], []>} : vector<8x32xf32>, vector<32x96xf32>, vector<8x96xf32> -> vector<8x96xf32>
    %28 = arith.addf %27, %24 : vector<8x96xf32>
    %29 = vector.extract_strided_slice %26 {offsets = [0, 0], sizes = [8, 64], strides = [1, 1]} : vector<8x96xf32> to vector<8x64xf32>
    %30 = vector.extract_strided_slice %28 {offsets = [0, 0], sizes = [8, 64], strides = [1, 1]} : vector<8x96xf32> to vector<8x64xf32>
    %31 = arith.addf %29, %30 : vector<8x64xf32>
    %32 = arith.negf %31 : vector<8x64xf32>
    %33 = math.exp %32 : vector<8x64xf32>
    %cst_12 = arith.constant 1.000000e+00 : f32
    %34 = vector.broadcast %cst_12 : f32 to vector<8x64xf32>
    %35 = arith.addf %34, %33 : vector<8x64xf32>
    %36 = arith.divf %34, %35 : vector<8x64xf32>
    %37 = vector.extract_strided_slice %36 {offsets = [0, 0], sizes = [8, 32], strides = [1, 1]} : vector<8x64xf32> to vector<8x32xf32>
    %38 = vector.extract_strided_slice %36 {offsets = [0, 32], sizes = [8, 32], strides = [1, 1]} : vector<8x64xf32> to vector<8x32xf32>
    %39 = vector.extract_strided_slice %26 {offsets = [0, 64], sizes = [8, 32], strides = [1, 1]} : vector<8x96xf32> to vector<8x32xf32>
    %40 = vector.extract_strided_slice %28 {offsets = [0, 64], sizes = [8, 32], strides = [1, 1]} : vector<8x96xf32> to vector<8x32xf32>
    %41 = arith.mulf %37, %40 : vector<8x32xf32>
    %42 = arith.addf %39, %41 : vector<8x32xf32>
    %43 = math.tanh %42 : vector<8x32xf32>
    %cst_13 = arith.constant 1.000000e+00 : f32
    %44 = vector.broadcast %cst_13 : f32 to vector<8x32xf32>
    %45 = arith.subf %44, %38 : vector<8x32xf32>
    %46 = arith.mulf %45, %43 : vector<8x32xf32>
    %47 = arith.mulf %38, %25 : vector<8x32xf32>
    %48 = arith.addf %46, %47 : vector<8x32xf32>
    %49 = vector.extract_strided_slice %22 {offsets = [8, 0], sizes = [8, 96], strides = [1, 1]} : vector<64x96xf32> to vector<8x96xf32>
    %cst_14 = arith.constant dense<0.000000e+00> : vector<8x96xf32>
    %50 = tpu.matmul %48, %3, %cst_14 {dimension_numbers = #tpu.dot_dimension_numbers<[1], [0], [0], [1], [0, 0, 1, 1], [], []>} : vector<8x32xf32>, vector<32x96xf32>, vector<8x96xf32> -> vector<8x96xf32>
    %51 = arith.addf %50, %24 : vector<8x96xf32>
    %52 = vector.extract_strided_slice %49 {offsets = [0, 0], sizes = [8, 64], strides = [1, 1]} : vector<8x96xf32> to vector<8x64xf32>
    %53 = vector.extract_strided_slice %51 {offsets = [0, 0], sizes = [8, 64], strides = [1, 1]} : vector<8x96xf32> to vector<8x64xf32>
    %54 = arith.addf %52, %53 : vector<8x64xf32>
    %55 = arith.negf %54 : vector<8x64xf32>
    %56 = math.exp %55 : vector<8x64xf32>
    %cst_15 = arith.constant 1.000000e+00 : f32
    %57 = vector.broadcast %cst_15 : f32 to vector<8x64xf32>
    %58 = arith.addf %57, %56 : vector<8x64xf32>
    %59 = arith.divf %57, %58 : vector<8x64xf32>
    %60 = vector.extract_strided_slice %59 {offsets = [0, 0], sizes = [8, 32], strides = [1, 1]} : vector<8x64xf32> to vector<8x32xf32>
    %61 = vector.extract_strided_slice %59 {offsets = [0, 32], sizes = [8, 32], strides = [1, 1]} : vector<8x64xf32> to vector<8x32xf32>
    %62 = vector.extract_strided_slice %49 {offsets = [0, 64], sizes = [8, 32], strides = [1, 1]} : vector<8x96xf32> to vector<8x32xf32>
    %63 = vector.extract_strided_slice %51 {offsets = [0, 64], sizes = [8, 32], strides = [1, 1]} : vector<8x96xf32> to vector<8x32xf32>
    %64 = arith.mulf %60, %63 : vector<8x32xf32>
    %65 = arith.addf %62, %64 : vector<8x32xf32>
    %66 = math.tanh %65 : vector<8x32xf32>
    %cst_16 = arith.constant 1.000000e+00 : f32
    %67 = vector.broadcast %cst_16 : f32 to vector<8x32xf32>
    %68 = arith.subf %67, %61 : vector<8x32xf32>
    %69 = arith.mulf %68, %66 : vector<8x32xf32>
    %70 = arith.mulf %61, %48 : vector<8x32xf32>
    %71 = arith.addf %69, %70 : vector<8x32xf32>
    %72 = vector.extract_strided_slice %22 {offsets = [16, 0], sizes = [8, 96], strides = [1, 1]} : vector<64x96xf32> to vector<8x96xf32>
    %cst_17 = arith.constant dense<0.000000e+00> : vector<8x96xf32>
    %73 = tpu.matmul %71, %3, %cst_17 {dimension_numbers = #tpu.dot_dimension_numbers<[1], [0], [0], [1], [0, 0, 1, 1], [], []>} : vector<8x32xf32>, vector<32x96xf32>, vector<8x96xf32> -> vector<8x96xf32>
    %74 = arith.addf %73, %24 : vector<8x96xf32>
    %75 = vector.extract_strided_slice %72 {offsets = [0, 0], sizes = [8, 64], strides = [1, 1]} : vector<8x96xf32> to vector<8x64xf32>
    %76 = vector.extract_strided_slice %74 {offsets = [0, 0], sizes = [8, 64], strides = [1, 1]} : vector<8x96xf32> to vector<8x64xf32>
    %77 = arith.addf %75, %76 : vector<8x64xf32>
    %78 = arith.negf %77 : vector<8x64xf32>
    %79 = math.exp %78 : vector<8x64xf32>
    %cst_18 = arith.constant 1.000000e+00 : f32
    %80 = vector.broadcast %cst_18 : f32 to vector<8x64xf32>
    %81 = arith.addf %80, %79 : vector<8x64xf32>
    %82 = arith.divf %80, %81 : vector<8x64xf32>
    %83 = vector.extract_strided_slice %82 {offsets = [0, 0], sizes = [8, 32], strides = [1, 1]} : vector<8x64xf32> to vector<8x32xf32>
    %84 = vector.extract_strided_slice %82 {offsets = [0, 32], sizes = [8, 32], strides = [1, 1]} : vector<8x64xf32> to vector<8x32xf32>
    %85 = vector.extract_strided_slice %72 {offsets = [0, 64], sizes = [8, 32], strides = [1, 1]} : vector<8x96xf32> to vector<8x32xf32>
    %86 = vector.extract_strided_slice %74 {offsets = [0, 64], sizes = [8, 32], strides = [1, 1]} : vector<8x96xf32> to vector<8x32xf32>
    %87 = arith.mulf %83, %86 : vector<8x32xf32>
    %88 = arith.addf %85, %87 : vector<8x32xf32>
    %89 = math.tanh %88 : vector<8x32xf32>
    %cst_19 = arith.constant 1.000000e+00 : f32
    %90 = vector.broadcast %cst_19 : f32 to vector<8x32xf32>
    %91 = arith.subf %90, %84 : vector<8x32xf32>
    %92 = arith.mulf %91, %89 : vector<8x32xf32>
    %93 = arith.mulf %84, %71 : vector<8x32xf32>
    %94 = arith.addf %92, %93 : vector<8x32xf32>
    %95 = vector.extract_strided_slice %22 {offsets = [24, 0], sizes = [8, 96], strides = [1, 1]} : vector<64x96xf32> to vector<8x96xf32>
    %cst_20 = arith.constant dense<0.000000e+00> : vector<8x96xf32>
    %96 = tpu.matmul %94, %3, %cst_20 {dimension_numbers = #tpu.dot_dimension_numbers<[1], [0], [0], [1], [0, 0, 1, 1], [], []>} : vector<8x32xf32>, vector<32x96xf32>, vector<8x96xf32> -> vector<8x96xf32>
    %97 = arith.addf %96, %24 : vector<8x96xf32>
    %98 = vector.extract_strided_slice %95 {offsets = [0, 0], sizes = [8, 64], strides = [1, 1]} : vector<8x96xf32> to vector<8x64xf32>
    %99 = vector.extract_strided_slice %97 {offsets = [0, 0], sizes = [8, 64], strides = [1, 1]} : vector<8x96xf32> to vector<8x64xf32>
    %100 = arith.addf %98, %99 : vector<8x64xf32>
    %101 = arith.negf %100 : vector<8x64xf32>
    %102 = math.exp %101 : vector<8x64xf32>
    %cst_21 = arith.constant 1.000000e+00 : f32
    %103 = vector.broadcast %cst_21 : f32 to vector<8x64xf32>
    %104 = arith.addf %103, %102 : vector<8x64xf32>
    %105 = arith.divf %103, %104 : vector<8x64xf32>
    %106 = vector.extract_strided_slice %105 {offsets = [0, 0], sizes = [8, 32], strides = [1, 1]} : vector<8x64xf32> to vector<8x32xf32>
    %107 = vector.extract_strided_slice %105 {offsets = [0, 32], sizes = [8, 32], strides = [1, 1]} : vector<8x64xf32> to vector<8x32xf32>
    %108 = vector.extract_strided_slice %95 {offsets = [0, 64], sizes = [8, 32], strides = [1, 1]} : vector<8x96xf32> to vector<8x32xf32>
    %109 = vector.extract_strided_slice %97 {offsets = [0, 64], sizes = [8, 32], strides = [1, 1]} : vector<8x96xf32> to vector<8x32xf32>
    %110 = arith.mulf %106, %109 : vector<8x32xf32>
    %111 = arith.addf %108, %110 : vector<8x32xf32>
    %112 = math.tanh %111 : vector<8x32xf32>
    %cst_22 = arith.constant 1.000000e+00 : f32
    %113 = vector.broadcast %cst_22 : f32 to vector<8x32xf32>
    %114 = arith.subf %113, %107 : vector<8x32xf32>
    %115 = arith.mulf %114, %112 : vector<8x32xf32>
    %116 = arith.mulf %107, %94 : vector<8x32xf32>
    %117 = arith.addf %115, %116 : vector<8x32xf32>
    %118 = vector.extract_strided_slice %22 {offsets = [32, 0], sizes = [8, 96], strides = [1, 1]} : vector<64x96xf32> to vector<8x96xf32>
    %cst_23 = arith.constant dense<0.000000e+00> : vector<8x96xf32>
    %119 = tpu.matmul %117, %3, %cst_23 {dimension_numbers = #tpu.dot_dimension_numbers<[1], [0], [0], [1], [0, 0, 1, 1], [], []>} : vector<8x32xf32>, vector<32x96xf32>, vector<8x96xf32> -> vector<8x96xf32>
    %120 = arith.addf %119, %24 : vector<8x96xf32>
    %121 = vector.extract_strided_slice %118 {offsets = [0, 0], sizes = [8, 64], strides = [1, 1]} : vector<8x96xf32> to vector<8x64xf32>
    %122 = vector.extract_strided_slice %120 {offsets = [0, 0], sizes = [8, 64], strides = [1, 1]} : vector<8x96xf32> to vector<8x64xf32>
    %123 = arith.addf %121, %122 : vector<8x64xf32>
    %124 = arith.negf %123 : vector<8x64xf32>
    %125 = math.exp %124 : vector<8x64xf32>
    %cst_24 = arith.constant 1.000000e+00 : f32
    %126 = vector.broadcast %cst_24 : f32 to vector<8x64xf32>
    %127 = arith.addf %126, %125 : vector<8x64xf32>
    %128 = arith.divf %126, %127 : vector<8x64xf32>
    %129 = vector.extract_strided_slice %128 {offsets = [0, 0], sizes = [8, 32], strides = [1, 1]} : vector<8x64xf32> to vector<8x32xf32>
    %130 = vector.extract_strided_slice %128 {offsets = [0, 32], sizes = [8, 32], strides = [1, 1]} : vector<8x64xf32> to vector<8x32xf32>
    %131 = vector.extract_strided_slice %118 {offsets = [0, 64], sizes = [8, 32], strides = [1, 1]} : vector<8x96xf32> to vector<8x32xf32>
    %132 = vector.extract_strided_slice %120 {offsets = [0, 64], sizes = [8, 32], strides = [1, 1]} : vector<8x96xf32> to vector<8x32xf32>
    %133 = arith.mulf %129, %132 : vector<8x32xf32>
    %134 = arith.addf %131, %133 : vector<8x32xf32>
    %135 = math.tanh %134 : vector<8x32xf32>
    %cst_25 = arith.constant 1.000000e+00 : f32
    %136 = vector.broadcast %cst_25 : f32 to vector<8x32xf32>
    %137 = arith.subf %136, %130 : vector<8x32xf32>
    %138 = arith.mulf %137, %135 : vector<8x32xf32>
    %139 = arith.mulf %130, %117 : vector<8x32xf32>
    %140 = arith.addf %138, %139 : vector<8x32xf32>
    %141 = vector.extract_strided_slice %22 {offsets = [40, 0], sizes = [8, 96], strides = [1, 1]} : vector<64x96xf32> to vector<8x96xf32>
    %cst_26 = arith.constant dense<0.000000e+00> : vector<8x96xf32>
    %142 = tpu.matmul %140, %3, %cst_26 {dimension_numbers = #tpu.dot_dimension_numbers<[1], [0], [0], [1], [0, 0, 1, 1], [], []>} : vector<8x32xf32>, vector<32x96xf32>, vector<8x96xf32> -> vector<8x96xf32>
    %143 = arith.addf %142, %24 : vector<8x96xf32>
    %144 = vector.extract_strided_slice %141 {offsets = [0, 0], sizes = [8, 64], strides = [1, 1]} : vector<8x96xf32> to vector<8x64xf32>
    %145 = vector.extract_strided_slice %143 {offsets = [0, 0], sizes = [8, 64], strides = [1, 1]} : vector<8x96xf32> to vector<8x64xf32>
    %146 = arith.addf %144, %145 : vector<8x64xf32>
    %147 = arith.negf %146 : vector<8x64xf32>
    %148 = math.exp %147 : vector<8x64xf32>
    %cst_27 = arith.constant 1.000000e+00 : f32
    %149 = vector.broadcast %cst_27 : f32 to vector<8x64xf32>
    %150 = arith.addf %149, %148 : vector<8x64xf32>
    %151 = arith.divf %149, %150 : vector<8x64xf32>
    %152 = vector.extract_strided_slice %151 {offsets = [0, 0], sizes = [8, 32], strides = [1, 1]} : vector<8x64xf32> to vector<8x32xf32>
    %153 = vector.extract_strided_slice %151 {offsets = [0, 32], sizes = [8, 32], strides = [1, 1]} : vector<8x64xf32> to vector<8x32xf32>
    %154 = vector.extract_strided_slice %141 {offsets = [0, 64], sizes = [8, 32], strides = [1, 1]} : vector<8x96xf32> to vector<8x32xf32>
    %155 = vector.extract_strided_slice %143 {offsets = [0, 64], sizes = [8, 32], strides = [1, 1]} : vector<8x96xf32> to vector<8x32xf32>
    %156 = arith.mulf %152, %155 : vector<8x32xf32>
    %157 = arith.addf %154, %156 : vector<8x32xf32>
    %158 = math.tanh %157 : vector<8x32xf32>
    %cst_28 = arith.constant 1.000000e+00 : f32
    %159 = vector.broadcast %cst_28 : f32 to vector<8x32xf32>
    %160 = arith.subf %159, %153 : vector<8x32xf32>
    %161 = arith.mulf %160, %158 : vector<8x32xf32>
    %162 = arith.mulf %153, %140 : vector<8x32xf32>
    %163 = arith.addf %161, %162 : vector<8x32xf32>
    %164 = vector.extract_strided_slice %22 {offsets = [48, 0], sizes = [8, 96], strides = [1, 1]} : vector<64x96xf32> to vector<8x96xf32>
    %cst_29 = arith.constant dense<0.000000e+00> : vector<8x96xf32>
    %165 = tpu.matmul %163, %3, %cst_29 {dimension_numbers = #tpu.dot_dimension_numbers<[1], [0], [0], [1], [0, 0, 1, 1], [], []>} : vector<8x32xf32>, vector<32x96xf32>, vector<8x96xf32> -> vector<8x96xf32>
    %166 = arith.addf %165, %24 : vector<8x96xf32>
    %167 = vector.extract_strided_slice %164 {offsets = [0, 0], sizes = [8, 64], strides = [1, 1]} : vector<8x96xf32> to vector<8x64xf32>
    %168 = vector.extract_strided_slice %166 {offsets = [0, 0], sizes = [8, 64], strides = [1, 1]} : vector<8x96xf32> to vector<8x64xf32>
    %169 = arith.addf %167, %168 : vector<8x64xf32>
    %170 = arith.negf %169 : vector<8x64xf32>
    %171 = math.exp %170 : vector<8x64xf32>
    %cst_30 = arith.constant 1.000000e+00 : f32
    %172 = vector.broadcast %cst_30 : f32 to vector<8x64xf32>
    %173 = arith.addf %172, %171 : vector<8x64xf32>
    %174 = arith.divf %172, %173 : vector<8x64xf32>
    %175 = vector.extract_strided_slice %174 {offsets = [0, 0], sizes = [8, 32], strides = [1, 1]} : vector<8x64xf32> to vector<8x32xf32>
    %176 = vector.extract_strided_slice %174 {offsets = [0, 32], sizes = [8, 32], strides = [1, 1]} : vector<8x64xf32> to vector<8x32xf32>
    %177 = vector.extract_strided_slice %164 {offsets = [0, 64], sizes = [8, 32], strides = [1, 1]} : vector<8x96xf32> to vector<8x32xf32>
    %178 = vector.extract_strided_slice %166 {offsets = [0, 64], sizes = [8, 32], strides = [1, 1]} : vector<8x96xf32> to vector<8x32xf32>
    %179 = arith.mulf %175, %178 : vector<8x32xf32>
    %180 = arith.addf %177, %179 : vector<8x32xf32>
    %181 = math.tanh %180 : vector<8x32xf32>
    %cst_31 = arith.constant 1.000000e+00 : f32
    %182 = vector.broadcast %cst_31 : f32 to vector<8x32xf32>
    %183 = arith.subf %182, %176 : vector<8x32xf32>
    %184 = arith.mulf %183, %181 : vector<8x32xf32>
    %185 = arith.mulf %176, %163 : vector<8x32xf32>
    %186 = arith.addf %184, %185 : vector<8x32xf32>
    %187 = vector.extract_strided_slice %22 {offsets = [56, 0], sizes = [8, 96], strides = [1, 1]} : vector<64x96xf32> to vector<8x96xf32>
    %cst_32 = arith.constant dense<0.000000e+00> : vector<8x96xf32>
    %188 = tpu.matmul %186, %3, %cst_32 {dimension_numbers = #tpu.dot_dimension_numbers<[1], [0], [0], [1], [0, 0, 1, 1], [], []>} : vector<8x32xf32>, vector<32x96xf32>, vector<8x96xf32> -> vector<8x96xf32>
    %189 = arith.addf %188, %24 : vector<8x96xf32>
    %190 = vector.extract_strided_slice %187 {offsets = [0, 0], sizes = [8, 64], strides = [1, 1]} : vector<8x96xf32> to vector<8x64xf32>
    %191 = vector.extract_strided_slice %189 {offsets = [0, 0], sizes = [8, 64], strides = [1, 1]} : vector<8x96xf32> to vector<8x64xf32>
    %192 = arith.addf %190, %191 : vector<8x64xf32>
    %193 = arith.negf %192 : vector<8x64xf32>
    %194 = math.exp %193 : vector<8x64xf32>
    %cst_33 = arith.constant 1.000000e+00 : f32
    %195 = vector.broadcast %cst_33 : f32 to vector<8x64xf32>
    %196 = arith.addf %195, %194 : vector<8x64xf32>
    %197 = arith.divf %195, %196 : vector<8x64xf32>
    %198 = vector.extract_strided_slice %197 {offsets = [0, 0], sizes = [8, 32], strides = [1, 1]} : vector<8x64xf32> to vector<8x32xf32>
    %199 = vector.extract_strided_slice %197 {offsets = [0, 32], sizes = [8, 32], strides = [1, 1]} : vector<8x64xf32> to vector<8x32xf32>
    %200 = vector.extract_strided_slice %187 {offsets = [0, 64], sizes = [8, 32], strides = [1, 1]} : vector<8x96xf32> to vector<8x32xf32>
    %201 = vector.extract_strided_slice %189 {offsets = [0, 64], sizes = [8, 32], strides = [1, 1]} : vector<8x96xf32> to vector<8x32xf32>
    %202 = arith.mulf %198, %201 : vector<8x32xf32>
    %203 = arith.addf %200, %202 : vector<8x32xf32>
    %204 = math.tanh %203 : vector<8x32xf32>
    %cst_34 = arith.constant 1.000000e+00 : f32
    %205 = vector.broadcast %cst_34 : f32 to vector<8x32xf32>
    %206 = arith.subf %205, %199 : vector<8x32xf32>
    %207 = arith.mulf %206, %204 : vector<8x32xf32>
    %208 = arith.mulf %199, %186 : vector<8x32xf32>
    %209 = arith.addf %207, %208 : vector<8x32xf32>
    %210 = tpu.concatenate %48, %71, %94, %117, %140, %163, %186, %209 in 1 : vector<8x32xf32>, vector<8x32xf32>, vector<8x32xf32>, vector<8x32xf32>, vector<8x32xf32>, vector<8x32xf32>, vector<8x32xf32>, vector<8x32xf32> -> vector<8x256xf32>
    %cst_35 = arith.constant dense<0.000000e+00> : vector<8x32xf32>
    %211 = tpu.matmul %48, %8, %cst_35 {dimension_numbers = #tpu.dot_dimension_numbers<[1], [0], [0], [1], [0, 0, 1, 1], [], []>} : vector<8x32xf32>, vector<32x32xf32>, vector<8x32xf32> -> vector<8x32xf32>
    %cst_36 = arith.constant dense<0.000000e+00> : vector<8x32xf32>
    %212 = tpu.matmul %71, %8, %cst_36 {dimension_numbers = #tpu.dot_dimension_numbers<[1], [0], [0], [1], [0, 0, 1, 1], [], []>} : vector<8x32xf32>, vector<32x32xf32>, vector<8x32xf32> -> vector<8x32xf32>
    %cst_37 = arith.constant dense<0.000000e+00> : vector<8x32xf32>
    %213 = tpu.matmul %94, %8, %cst_37 {dimension_numbers = #tpu.dot_dimension_numbers<[1], [0], [0], [1], [0, 0, 1, 1], [], []>} : vector<8x32xf32>, vector<32x32xf32>, vector<8x32xf32> -> vector<8x32xf32>
    %cst_38 = arith.constant dense<0.000000e+00> : vector<8x32xf32>
    %214 = tpu.matmul %117, %8, %cst_38 {dimension_numbers = #tpu.dot_dimension_numbers<[1], [0], [0], [1], [0, 0, 1, 1], [], []>} : vector<8x32xf32>, vector<32x32xf32>, vector<8x32xf32> -> vector<8x32xf32>
    %cst_39 = arith.constant dense<0.000000e+00> : vector<8x32xf32>
    %215 = tpu.matmul %140, %8, %cst_39 {dimension_numbers = #tpu.dot_dimension_numbers<[1], [0], [0], [1], [0, 0, 1, 1], [], []>} : vector<8x32xf32>, vector<32x32xf32>, vector<8x32xf32> -> vector<8x32xf32>
    %cst_40 = arith.constant dense<0.000000e+00> : vector<8x32xf32>
    %216 = tpu.matmul %163, %8, %cst_40 {dimension_numbers = #tpu.dot_dimension_numbers<[1], [0], [0], [1], [0, 0, 1, 1], [], []>} : vector<8x32xf32>, vector<32x32xf32>, vector<8x32xf32> -> vector<8x32xf32>
    %cst_41 = arith.constant dense<0.000000e+00> : vector<8x32xf32>
    %217 = tpu.matmul %186, %8, %cst_41 {dimension_numbers = #tpu.dot_dimension_numbers<[1], [0], [0], [1], [0, 0, 1, 1], [], []>} : vector<8x32xf32>, vector<32x32xf32>, vector<8x32xf32> -> vector<8x32xf32>
    %cst_42 = arith.constant dense<0.000000e+00> : vector<8x32xf32>
    %218 = tpu.matmul %209, %8, %cst_42 {dimension_numbers = #tpu.dot_dimension_numbers<[1], [0], [0], [1], [0, 0, 1, 1], [], []>} : vector<8x32xf32>, vector<32x32xf32>, vector<8x32xf32> -> vector<8x32xf32>
    %219 = tpu.concatenate %211, %212, %213, %214, %215, %216, %217, %218 in 1 : vector<8x32xf32>, vector<8x32xf32>, vector<8x32xf32>, vector<8x32xf32>, vector<8x32xf32>, vector<8x32xf32>, vector<8x32xf32>, vector<8x32xf32> -> vector<8x256xf32>
    %220 = tpu.concatenate %15, %15, %15, %15, %15, %15, %15, %15 in 1 : vector<1x32xf32>, vector<1x32xf32>, vector<1x32xf32>, vector<1x32xf32>, vector<1x32xf32>, vector<1x32xf32>, vector<1x32xf32>, vector<1x32xf32> -> vector<1x256xf32>
    %221 = vector.broadcast %220 : vector<1x256xf32> to vector<8x256xf32>
    %222 = arith.addf %219, %221 : vector<8x256xf32>
    %223 = vector.shape_cast %13 : vector<1x96xf32> to vector<1x96xf32>
    %224 = vector.broadcast %223 : vector<1x96xf32> to vector<8x96xf32>
    %225 = vector.shape_cast %14 : vector<1x96xf32> to vector<1x96xf32>
    %226 = vector.broadcast %225 : vector<1x96xf32> to vector<8x96xf32>
    %227 = vector.shape_cast %16 : vector<1x32xf32> to vector<1x32xf32>
    %228 = vector.broadcast %227 : vector<1x32xf32> to vector<8x32xf32>
    %229 = tpu.concatenate %17, %17, %17, %17, %17, %17, %17, %17 in 1 : vector<1x32xf32>, vector<1x32xf32>, vector<1x32xf32>, vector<1x32xf32>, vector<1x32xf32>, vector<1x32xf32>, vector<1x32xf32>, vector<1x32xf32> -> vector<1x256xf32>
    %230 = vector.shape_cast %229 : vector<1x256xf32> to vector<1x256xf32>
    %231 = vector.broadcast %230 : vector<1x256xf32> to vector<8x256xf32>
    %232 = tpu.iota {dimensions = array<i32: 1>} : vector<8x32xi32>
    %233 = tpu.iota {dimensions = array<i32: 1>} : vector<8x256xi32>
    %234 = tpu.iota {dimensions = array<i32: 0>} : vector<8x256xi32>
    %c5_i32 = arith.constant 5 : i32
    %235 = vector.broadcast %c5_i32 : i32 to vector<8x256xi32>
    %236 = arith.shrsi %233, %235 : vector<8x256xi32>
    %237 = arith.cmpi eq, %236, %234 : vector<8x256xi32>
    %238 = arith.extui %237 : vector<8x256xi1> to vector<8x256xi32>
    %239 = arith.sitofp %238 : vector<8x256xi32> to vector<8x256xf32>
    %240 = tpu.iota {dimensions = array<i32: 0>} : vector<256x32xi32>
    %241 = tpu.iota {dimensions = array<i32: 1>} : vector<256x32xi32>
    %c31_i32 = arith.constant 31 : i32
    %242 = vector.broadcast %c31_i32 : i32 to vector<256x32xi32>
    %243 = arith.andi %240, %242 : vector<256x32xi32>
    %244 = arith.cmpi eq, %243, %241 : vector<256x32xi32>
    %245 = arith.extui %244 : vector<256x32xi1> to vector<256x32xi32>
    %246 = arith.sitofp %245 : vector<256x32xi32> to vector<256x32xf32>
    %247 = tpu.iota {dimensions = array<i32: 0>} : vector<256x8xi32>
    %248 = tpu.iota {dimensions = array<i32: 1>} : vector<256x8xi32>
    %c5_i32_43 = arith.constant 5 : i32
    %249 = vector.broadcast %c5_i32_43 : i32 to vector<256x8xi32>
    %250 = arith.shrsi %247, %249 : vector<256x8xi32>
    %251 = arith.cmpi eq, %250, %248 : vector<256x8xi32>
    %252 = arith.extui %251 : vector<256x8xi1> to vector<256x8xi32>
    %253 = arith.sitofp %252 : vector<256x8xi32> to vector<256x8xf32>
    %c0_i32 = arith.constant 0 : i32
    %254 = vector.broadcast %c0_i32 : i32 to vector<8x32xi32>
    %255 = arith.cmpi eq, %232, %254 : vector<8x32xi32>
    %256 = arith.extui %255 : vector<8x32xi1> to vector<8x32xi32>
    %257 = arith.sitofp %256 : vector<8x32xi32> to vector<8x32xf32>
    %cst_44 = arith.constant 0.000000e+00 : f32
    %258 = vector.broadcast %cst_44 : f32 to vector<8x32xf32>
    %cst_45 = arith.constant dense<0.000000e+00> : vector<8x96xf32>
    %259 = tpu.matmul %257, %5, %cst_45 {dimension_numbers = #tpu.dot_dimension_numbers<[1], [0], [0], [1], [0, 0, 1, 1], [], []>} : vector<8x32xf32>, vector<32x96xf32>, vector<8x96xf32> -> vector<8x96xf32>
    %cst_46 = arith.constant dense<0.000000e+00> : vector<8x352xf32>
    %260 = tpu.matmul %209, %18, %cst_46 {dimension_numbers = #tpu.dot_dimension_numbers<[1], [0], [0], [1], [0, 0, 1, 1], [], []>} : vector<8x32xf32>, vector<32x352xf32>, vector<8x352xf32> -> vector<8x352xf32>
    %261 = vector.extract_strided_slice %260 {offsets = [0, 0], sizes = [8, 256], strides = [1, 1]} : vector<8x352xf32> to vector<8x256xf32>
    %262 = vector.extract_strided_slice %260 {offsets = [0, 256], sizes = [8, 96], strides = [1, 1]} : vector<8x352xf32> to vector<8x96xf32>
    %263 = arith.addf %262, %226 : vector<8x96xf32>
    %264 = arith.addf %261, %222 : vector<8x256xf32>
    %265 = math.tanh %264 : vector<8x256xf32>
    %266 = arith.mulf %265, %231 : vector<8x256xf32>
    %cst_47 = arith.constant dense<0.000000e+00> : vector<8x8xf32>
    %267 = tpu.matmul %266, %253, %cst_47 {dimension_numbers = #tpu.dot_dimension_numbers<[1], [0], [0], [1], [0, 0, 1, 1], [], []>} : vector<8x256xf32>, vector<256x8xf32>, vector<8x8xf32> -> vector<8x8xf32>
    %cst_48 = arith.constant dense<0xFF800000> : vector<8xf32>
    %268 = vector.multi_reduction <maximumf>, %267, %cst_48 [1] : vector<8x8xf32> to vector<8xf32>
    %269 = vector.shape_cast %268 : vector<8xf32> to vector<8x1xf32>
    %270 = vector.broadcast %269 : vector<8x1xf32> to vector<8x8xf32>
    %271 = arith.subf %267, %270 : vector<8x8xf32>
    %272 = math.exp %271 : vector<8x8xf32>
    %cst_49 = arith.constant dense<0.000000e+00> : vector<8xf32>
    %273 = vector.multi_reduction <add>, %272, %cst_49 [1] : vector<8x8xf32> to vector<8xf32>
    %274 = vector.shape_cast %273 : vector<8xf32> to vector<8x1xf32>
    %275 = tpu.reciprocal %274 {approx = true} : vector<8x1xf32> -> vector<8x1xf32>
    %276 = vector.broadcast %275 : vector<8x1xf32> to vector<8x8xf32>
    %277 = arith.mulf %272, %276 : vector<8x8xf32>
    %cst_50 = arith.constant dense<0.000000e+00> : vector<8x256xf32>
    %278 = tpu.matmul %277, %239, %cst_50 {dimension_numbers = #tpu.dot_dimension_numbers<[1], [0], [0], [1], [0, 0, 1, 1], [], []>} : vector<8x8xf32>, vector<8x256xf32>, vector<8x256xf32> -> vector<8x256xf32>
    %279 = arith.mulf %278, %210 : vector<8x256xf32>
    %cst_51 = arith.constant dense<0.000000e+00> : vector<8x32xf32>
    %280 = tpu.matmul %279, %246, %cst_51 {dimension_numbers = #tpu.dot_dimension_numbers<[1], [0], [0], [1], [0, 0, 1, 1], [], []>} : vector<8x256xf32>, vector<256x32xf32>, vector<8x32xf32> -> vector<8x32xf32>
    %cst_52 = arith.constant dense<0.000000e+00> : vector<8x128xf32>
    %281 = tpu.matmul %280, %6, %cst_52 {dimension_numbers = #tpu.dot_dimension_numbers<[1], [0], [0], [1], [0, 0, 1, 1], [], []>} : vector<8x32xf32>, vector<32x128xf32>, vector<8x128xf32> -> vector<8x128xf32>
    %282 = vector.extract_strided_slice %281 {offsets = [0, 0], sizes = [8, 96], strides = [1, 1]} : vector<8x128xf32> to vector<8x96xf32>
    %283 = arith.addf %259, %282 : vector<8x96xf32>
    %284 = arith.addf %283, %224 : vector<8x96xf32>
    %285 = vector.extract_strided_slice %284 {offsets = [0, 0], sizes = [8, 64], strides = [1, 1]} : vector<8x96xf32> to vector<8x64xf32>
    %286 = vector.extract_strided_slice %263 {offsets = [0, 0], sizes = [8, 64], strides = [1, 1]} : vector<8x96xf32> to vector<8x64xf32>
    %287 = arith.addf %285, %286 : vector<8x64xf32>
    %288 = arith.negf %287 : vector<8x64xf32>
    %289 = math.exp %288 : vector<8x64xf32>
    %cst_53 = arith.constant 1.000000e+00 : f32
    %290 = vector.broadcast %cst_53 : f32 to vector<8x64xf32>
    %291 = arith.addf %290, %289 : vector<8x64xf32>
    %292 = arith.divf %290, %291 : vector<8x64xf32>
    %293 = vector.extract_strided_slice %292 {offsets = [0, 0], sizes = [8, 32], strides = [1, 1]} : vector<8x64xf32> to vector<8x32xf32>
    %294 = vector.extract_strided_slice %292 {offsets = [0, 32], sizes = [8, 32], strides = [1, 1]} : vector<8x64xf32> to vector<8x32xf32>
    %295 = vector.extract_strided_slice %284 {offsets = [0, 64], sizes = [8, 32], strides = [1, 1]} : vector<8x96xf32> to vector<8x32xf32>
    %296 = vector.extract_strided_slice %263 {offsets = [0, 64], sizes = [8, 32], strides = [1, 1]} : vector<8x96xf32> to vector<8x32xf32>
    %297 = arith.mulf %293, %296 : vector<8x32xf32>
    %298 = arith.addf %295, %297 : vector<8x32xf32>
    %299 = math.tanh %298 : vector<8x32xf32>
    %cst_54 = arith.constant 1.000000e+00 : f32
    %300 = vector.broadcast %cst_54 : f32 to vector<8x32xf32>
    %301 = arith.subf %300, %294 : vector<8x32xf32>
    %302 = arith.mulf %301, %299 : vector<8x32xf32>
    %303 = arith.mulf %294, %209 : vector<8x32xf32>
    %304 = arith.addf %302, %303 : vector<8x32xf32>
    %cst_55 = arith.constant dense<0.000000e+00> : vector<8x32xf32>
    %305 = tpu.matmul %304, %9, %cst_55 {dimension_numbers = #tpu.dot_dimension_numbers<[1], [0], [0], [1], [0, 0, 1, 1], [], []>} : vector<8x32xf32>, vector<32x32xf32>, vector<8x32xf32> -> vector<8x32xf32>
    %306 = vector.extract_strided_slice %281 {offsets = [0, 96], sizes = [8, 32], strides = [1, 1]} : vector<8x128xf32> to vector<8x32xf32>
    %307 = arith.addf %305, %306 : vector<8x32xf32>
    %308 = arith.addf %307, %228 : vector<8x32xf32>
    %cst_56 = arith.constant dense<0xFF800000> : vector<8xf32>
    %309 = vector.multi_reduction <maximumf>, %308, %cst_56 [1] : vector<8x32xf32> to vector<8xf32>
    %310 = vector.shape_cast %309 : vector<8xf32> to vector<8x1xf32>
    %311 = vector.broadcast %310 : vector<8x1xf32> to vector<8x32xf32>
    %312 = arith.cmpf oge, %308, %311 : vector<8x32xf32>
    %c32_i32 = arith.constant 32 : i32
    %313 = vector.broadcast %c32_i32 : i32 to vector<8x32xi32>
    %314 = arith.select %312, %232, %313 : vector<8x32xi1>, vector<8x32xi32>
    %cst_57 = arith.constant dense<2147483647> : vector<8xi32>
    %315 = vector.multi_reduction <minsi>, %314, %cst_57 [1] : vector<8x32xi32> to vector<8xi32>
    %316 = vector.shape_cast %315 : vector<8xi32> to vector<8x1xi32>
    %317 = vector.broadcast %316 : vector<8x1xi32> to vector<8x32xi32>
    %318 = arith.cmpi eq, %232, %317 : vector<8x32xi32>
    %319 = arith.extui %318 : vector<8x32xi1> to vector<8x32xi32>
    %320 = arith.sitofp %319 : vector<8x32xi32> to vector<8x32xf32>
    %321 = vector.broadcast %310 : vector<8x1xf32> to vector<8x32xf32>
    %322 = arith.subf %308, %321 : vector<8x32xf32>
    %323 = math.exp %322 : vector<8x32xf32>
    %cst_58 = arith.constant dense<0.000000e+00> : vector<8xf32>
    %324 = vector.multi_reduction <add>, %323, %cst_58 [1] : vector<8x32xf32> to vector<8xf32>
    %325 = vector.shape_cast %324 : vector<8xf32> to vector<8x1xf32>
    %326 = math.log %325 : vector<8x1xf32>
    %327 = arith.addf %310, %326 : vector<8x1xf32>
    %328 = vector.broadcast %327 : vector<8x1xf32> to vector<8x32xf32>
    %329 = arith.subf %308, %328 : vector<8x32xf32>
    %cst_59 = arith.constant dense<0.000000e+00> : vector<8x96xf32>
    %330 = tpu.matmul %320, %5, %cst_59 {dimension_numbers = #tpu.dot_dimension_numbers<[1], [0], [0], [1], [0, 0, 1, 1], [], []>} : vector<8x32xf32>, vector<32x96xf32>, vector<8x96xf32> -> vector<8x96xf32>
    %cst_60 = arith.constant dense<0.000000e+00> : vector<8x352xf32>
    %331 = tpu.matmul %304, %18, %cst_60 {dimension_numbers = #tpu.dot_dimension_numbers<[1], [0], [0], [1], [0, 0, 1, 1], [], []>} : vector<8x32xf32>, vector<32x352xf32>, vector<8x352xf32> -> vector<8x352xf32>
    %332 = vector.extract_strided_slice %331 {offsets = [0, 0], sizes = [8, 256], strides = [1, 1]} : vector<8x352xf32> to vector<8x256xf32>
    %333 = vector.extract_strided_slice %331 {offsets = [0, 256], sizes = [8, 96], strides = [1, 1]} : vector<8x352xf32> to vector<8x96xf32>
    %334 = arith.addf %333, %226 : vector<8x96xf32>
    %335 = arith.addf %332, %222 : vector<8x256xf32>
    %336 = math.tanh %335 : vector<8x256xf32>
    %337 = arith.mulf %336, %231 : vector<8x256xf32>
    %cst_61 = arith.constant dense<0.000000e+00> : vector<8x8xf32>
    %338 = tpu.matmul %337, %253, %cst_61 {dimension_numbers = #tpu.dot_dimension_numbers<[1], [0], [0], [1], [0, 0, 1, 1], [], []>} : vector<8x256xf32>, vector<256x8xf32>, vector<8x8xf32> -> vector<8x8xf32>
    %cst_62 = arith.constant dense<0xFF800000> : vector<8xf32>
    %339 = vector.multi_reduction <maximumf>, %338, %cst_62 [1] : vector<8x8xf32> to vector<8xf32>
    %340 = vector.shape_cast %339 : vector<8xf32> to vector<8x1xf32>
    %341 = vector.broadcast %340 : vector<8x1xf32> to vector<8x8xf32>
    %342 = arith.subf %338, %341 : vector<8x8xf32>
    %343 = math.exp %342 : vector<8x8xf32>
    %cst_63 = arith.constant dense<0.000000e+00> : vector<8xf32>
    %344 = vector.multi_reduction <add>, %343, %cst_63 [1] : vector<8x8xf32> to vector<8xf32>
    %345 = vector.shape_cast %344 : vector<8xf32> to vector<8x1xf32>
    %346 = tpu.reciprocal %345 {approx = true} : vector<8x1xf32> -> vector<8x1xf32>
    %347 = vector.broadcast %346 : vector<8x1xf32> to vector<8x8xf32>
    %348 = arith.mulf %343, %347 : vector<8x8xf32>
    %cst_64 = arith.constant dense<0.000000e+00> : vector<8x256xf32>
    %349 = tpu.matmul %348, %239, %cst_64 {dimension_numbers = #tpu.dot_dimension_numbers<[1], [0], [0], [1], [0, 0, 1, 1], [], []>} : vector<8x8xf32>, vector<8x256xf32>, vector<8x256xf32> -> vector<8x256xf32>
    %350 = arith.mulf %349, %210 : vector<8x256xf32>
    %cst_65 = arith.constant dense<0.000000e+00> : vector<8x32xf32>
    %351 = tpu.matmul %350, %246, %cst_65 {dimension_numbers = #tpu.dot_dimension_numbers<[1], [0], [0], [1], [0, 0, 1, 1], [], []>} : vector<8x256xf32>, vector<256x32xf32>, vector<8x32xf32> -> vector<8x32xf32>
    %cst_66 = arith.constant dense<0.000000e+00> : vector<8x128xf32>
    %352 = tpu.matmul %351, %6, %cst_66 {dimension_numbers = #tpu.dot_dimension_numbers<[1], [0], [0], [1], [0, 0, 1, 1], [], []>} : vector<8x32xf32>, vector<32x128xf32>, vector<8x128xf32> -> vector<8x128xf32>
    %353 = vector.extract_strided_slice %352 {offsets = [0, 0], sizes = [8, 96], strides = [1, 1]} : vector<8x128xf32> to vector<8x96xf32>
    %354 = arith.addf %330, %353 : vector<8x96xf32>
    %355 = arith.addf %354, %224 : vector<8x96xf32>
    %356 = vector.extract_strided_slice %355 {offsets = [0, 0], sizes = [8, 64], strides = [1, 1]} : vector<8x96xf32> to vector<8x64xf32>
    %357 = vector.extract_strided_slice %334 {offsets = [0, 0], sizes = [8, 64], strides = [1, 1]} : vector<8x96xf32> to vector<8x64xf32>
    %358 = arith.addf %356, %357 : vector<8x64xf32>
    %359 = arith.negf %358 : vector<8x64xf32>
    %360 = math.exp %359 : vector<8x64xf32>
    %cst_67 = arith.constant 1.000000e+00 : f32
    %361 = vector.broadcast %cst_67 : f32 to vector<8x64xf32>
    %362 = arith.addf %361, %360 : vector<8x64xf32>
    %363 = arith.divf %361, %362 : vector<8x64xf32>
    %364 = vector.extract_strided_slice %363 {offsets = [0, 0], sizes = [8, 32], strides = [1, 1]} : vector<8x64xf32> to vector<8x32xf32>
    %365 = vector.extract_strided_slice %363 {offsets = [0, 32], sizes = [8, 32], strides = [1, 1]} : vector<8x64xf32> to vector<8x32xf32>
    %366 = vector.extract_strided_slice %355 {offsets = [0, 64], sizes = [8, 32], strides = [1, 1]} : vector<8x96xf32> to vector<8x32xf32>
    %367 = vector.extract_strided_slice %334 {offsets = [0, 64], sizes = [8, 32], strides = [1, 1]} : vector<8x96xf32> to vector<8x32xf32>
    %368 = arith.mulf %364, %367 : vector<8x32xf32>
    %369 = arith.addf %366, %368 : vector<8x32xf32>
    %370 = math.tanh %369 : vector<8x32xf32>
    %cst_68 = arith.constant 1.000000e+00 : f32
    %371 = vector.broadcast %cst_68 : f32 to vector<8x32xf32>
    %372 = arith.subf %371, %365 : vector<8x32xf32>
    %373 = arith.mulf %372, %370 : vector<8x32xf32>
    %374 = arith.mulf %365, %304 : vector<8x32xf32>
    %375 = arith.addf %373, %374 : vector<8x32xf32>
    %cst_69 = arith.constant dense<0.000000e+00> : vector<8x32xf32>
    %376 = tpu.matmul %375, %9, %cst_69 {dimension_numbers = #tpu.dot_dimension_numbers<[1], [0], [0], [1], [0, 0, 1, 1], [], []>} : vector<8x32xf32>, vector<32x32xf32>, vector<8x32xf32> -> vector<8x32xf32>
    %377 = vector.extract_strided_slice %352 {offsets = [0, 96], sizes = [8, 32], strides = [1, 1]} : vector<8x128xf32> to vector<8x32xf32>
    %378 = arith.addf %376, %377 : vector<8x32xf32>
    %379 = arith.addf %378, %228 : vector<8x32xf32>
    %cst_70 = arith.constant dense<0xFF800000> : vector<8xf32>
    %380 = vector.multi_reduction <maximumf>, %379, %cst_70 [1] : vector<8x32xf32> to vector<8xf32>
    %381 = vector.shape_cast %380 : vector<8xf32> to vector<8x1xf32>
    %382 = vector.broadcast %381 : vector<8x1xf32> to vector<8x32xf32>
    %383 = arith.cmpf oge, %379, %382 : vector<8x32xf32>
    %c32_i32_71 = arith.constant 32 : i32
    %384 = vector.broadcast %c32_i32_71 : i32 to vector<8x32xi32>
    %385 = arith.select %383, %232, %384 : vector<8x32xi1>, vector<8x32xi32>
    %cst_72 = arith.constant dense<2147483647> : vector<8xi32>
    %386 = vector.multi_reduction <minsi>, %385, %cst_72 [1] : vector<8x32xi32> to vector<8xi32>
    %387 = vector.shape_cast %386 : vector<8xi32> to vector<8x1xi32>
    %388 = vector.broadcast %387 : vector<8x1xi32> to vector<8x32xi32>
    %389 = arith.cmpi eq, %232, %388 : vector<8x32xi32>
    %390 = arith.extui %389 : vector<8x32xi1> to vector<8x32xi32>
    %391 = arith.sitofp %390 : vector<8x32xi32> to vector<8x32xf32>
    %392 = vector.broadcast %381 : vector<8x1xf32> to vector<8x32xf32>
    %393 = arith.subf %379, %392 : vector<8x32xf32>
    %394 = math.exp %393 : vector<8x32xf32>
    %cst_73 = arith.constant dense<0.000000e+00> : vector<8xf32>
    %395 = vector.multi_reduction <add>, %394, %cst_73 [1] : vector<8x32xf32> to vector<8xf32>
    %396 = vector.shape_cast %395 : vector<8xf32> to vector<8x1xf32>
    %397 = math.log %396 : vector<8x1xf32>
    %398 = arith.addf %381, %397 : vector<8x1xf32>
    %399 = vector.broadcast %398 : vector<8x1xf32> to vector<8x32xf32>
    %400 = arith.subf %379, %399 : vector<8x32xf32>
    %cst_74 = arith.constant dense<0.000000e+00> : vector<8x96xf32>
    %401 = tpu.matmul %391, %5, %cst_74 {dimension_numbers = #tpu.dot_dimension_numbers<[1], [0], [0], [1], [0, 0, 1, 1], [], []>} : vector<8x32xf32>, vector<32x96xf32>, vector<8x96xf32> -> vector<8x96xf32>
    %cst_75 = arith.constant dense<0.000000e+00> : vector<8x352xf32>
    %402 = tpu.matmul %375, %18, %cst_75 {dimension_numbers = #tpu.dot_dimension_numbers<[1], [0], [0], [1], [0, 0, 1, 1], [], []>} : vector<8x32xf32>, vector<32x352xf32>, vector<8x352xf32> -> vector<8x352xf32>
    %403 = vector.extract_strided_slice %402 {offsets = [0, 0], sizes = [8, 256], strides = [1, 1]} : vector<8x352xf32> to vector<8x256xf32>
    %404 = vector.extract_strided_slice %402 {offsets = [0, 256], sizes = [8, 96], strides = [1, 1]} : vector<8x352xf32> to vector<8x96xf32>
    %405 = arith.addf %404, %226 : vector<8x96xf32>
    %406 = arith.addf %403, %222 : vector<8x256xf32>
    %407 = math.tanh %406 : vector<8x256xf32>
    %408 = arith.mulf %407, %231 : vector<8x256xf32>
    %cst_76 = arith.constant dense<0.000000e+00> : vector<8x8xf32>
    %409 = tpu.matmul %408, %253, %cst_76 {dimension_numbers = #tpu.dot_dimension_numbers<[1], [0], [0], [1], [0, 0, 1, 1], [], []>} : vector<8x256xf32>, vector<256x8xf32>, vector<8x8xf32> -> vector<8x8xf32>
    %cst_77 = arith.constant dense<0xFF800000> : vector<8xf32>
    %410 = vector.multi_reduction <maximumf>, %409, %cst_77 [1] : vector<8x8xf32> to vector<8xf32>
    %411 = vector.shape_cast %410 : vector<8xf32> to vector<8x1xf32>
    %412 = vector.broadcast %411 : vector<8x1xf32> to vector<8x8xf32>
    %413 = arith.subf %409, %412 : vector<8x8xf32>
    %414 = math.exp %413 : vector<8x8xf32>
    %cst_78 = arith.constant dense<0.000000e+00> : vector<8xf32>
    %415 = vector.multi_reduction <add>, %414, %cst_78 [1] : vector<8x8xf32> to vector<8xf32>
    %416 = vector.shape_cast %415 : vector<8xf32> to vector<8x1xf32>
    %417 = tpu.reciprocal %416 {approx = true} : vector<8x1xf32> -> vector<8x1xf32>
    %418 = vector.broadcast %417 : vector<8x1xf32> to vector<8x8xf32>
    %419 = arith.mulf %414, %418 : vector<8x8xf32>
    %cst_79 = arith.constant dense<0.000000e+00> : vector<8x256xf32>
    %420 = tpu.matmul %419, %239, %cst_79 {dimension_numbers = #tpu.dot_dimension_numbers<[1], [0], [0], [1], [0, 0, 1, 1], [], []>} : vector<8x8xf32>, vector<8x256xf32>, vector<8x256xf32> -> vector<8x256xf32>
    %421 = arith.mulf %420, %210 : vector<8x256xf32>
    %cst_80 = arith.constant dense<0.000000e+00> : vector<8x32xf32>
    %422 = tpu.matmul %421, %246, %cst_80 {dimension_numbers = #tpu.dot_dimension_numbers<[1], [0], [0], [1], [0, 0, 1, 1], [], []>} : vector<8x256xf32>, vector<256x32xf32>, vector<8x32xf32> -> vector<8x32xf32>
    %cst_81 = arith.constant dense<0.000000e+00> : vector<8x128xf32>
    %423 = tpu.matmul %422, %6, %cst_81 {dimension_numbers = #tpu.dot_dimension_numbers<[1], [0], [0], [1], [0, 0, 1, 1], [], []>} : vector<8x32xf32>, vector<32x128xf32>, vector<8x128xf32> -> vector<8x128xf32>
    %424 = vector.extract_strided_slice %423 {offsets = [0, 0], sizes = [8, 96], strides = [1, 1]} : vector<8x128xf32> to vector<8x96xf32>
    %425 = arith.addf %401, %424 : vector<8x96xf32>
    %426 = arith.addf %425, %224 : vector<8x96xf32>
    %427 = vector.extract_strided_slice %426 {offsets = [0, 0], sizes = [8, 64], strides = [1, 1]} : vector<8x96xf32> to vector<8x64xf32>
    %428 = vector.extract_strided_slice %405 {offsets = [0, 0], sizes = [8, 64], strides = [1, 1]} : vector<8x96xf32> to vector<8x64xf32>
    %429 = arith.addf %427, %428 : vector<8x64xf32>
    %430 = arith.negf %429 : vector<8x64xf32>
    %431 = math.exp %430 : vector<8x64xf32>
    %cst_82 = arith.constant 1.000000e+00 : f32
    %432 = vector.broadcast %cst_82 : f32 to vector<8x64xf32>
    %433 = arith.addf %432, %431 : vector<8x64xf32>
    %434 = arith.divf %432, %433 : vector<8x64xf32>
    %435 = vector.extract_strided_slice %434 {offsets = [0, 0], sizes = [8, 32], strides = [1, 1]} : vector<8x64xf32> to vector<8x32xf32>
    %436 = vector.extract_strided_slice %434 {offsets = [0, 32], sizes = [8, 32], strides = [1, 1]} : vector<8x64xf32> to vector<8x32xf32>
    %437 = vector.extract_strided_slice %426 {offsets = [0, 64], sizes = [8, 32], strides = [1, 1]} : vector<8x96xf32> to vector<8x32xf32>
    %438 = vector.extract_strided_slice %405 {offsets = [0, 64], sizes = [8, 32], strides = [1, 1]} : vector<8x96xf32> to vector<8x32xf32>
    %439 = arith.mulf %435, %438 : vector<8x32xf32>
    %440 = arith.addf %437, %439 : vector<8x32xf32>
    %441 = math.tanh %440 : vector<8x32xf32>
    %cst_83 = arith.constant 1.000000e+00 : f32
    %442 = vector.broadcast %cst_83 : f32 to vector<8x32xf32>
    %443 = arith.subf %442, %436 : vector<8x32xf32>
    %444 = arith.mulf %443, %441 : vector<8x32xf32>
    %445 = arith.mulf %436, %375 : vector<8x32xf32>
    %446 = arith.addf %444, %445 : vector<8x32xf32>
    %cst_84 = arith.constant dense<0.000000e+00> : vector<8x32xf32>
    %447 = tpu.matmul %446, %9, %cst_84 {dimension_numbers = #tpu.dot_dimension_numbers<[1], [0], [0], [1], [0, 0, 1, 1], [], []>} : vector<8x32xf32>, vector<32x32xf32>, vector<8x32xf32> -> vector<8x32xf32>
    %448 = vector.extract_strided_slice %423 {offsets = [0, 96], sizes = [8, 32], strides = [1, 1]} : vector<8x128xf32> to vector<8x32xf32>
    %449 = arith.addf %447, %448 : vector<8x32xf32>
    %450 = arith.addf %449, %228 : vector<8x32xf32>
    %cst_85 = arith.constant dense<0xFF800000> : vector<8xf32>
    %451 = vector.multi_reduction <maximumf>, %450, %cst_85 [1] : vector<8x32xf32> to vector<8xf32>
    %452 = vector.shape_cast %451 : vector<8xf32> to vector<8x1xf32>
    %453 = vector.broadcast %452 : vector<8x1xf32> to vector<8x32xf32>
    %454 = arith.cmpf oge, %450, %453 : vector<8x32xf32>
    %c32_i32_86 = arith.constant 32 : i32
    %455 = vector.broadcast %c32_i32_86 : i32 to vector<8x32xi32>
    %456 = arith.select %454, %232, %455 : vector<8x32xi1>, vector<8x32xi32>
    %cst_87 = arith.constant dense<2147483647> : vector<8xi32>
    %457 = vector.multi_reduction <minsi>, %456, %cst_87 [1] : vector<8x32xi32> to vector<8xi32>
    %458 = vector.shape_cast %457 : vector<8xi32> to vector<8x1xi32>
    %459 = vector.broadcast %458 : vector<8x1xi32> to vector<8x32xi32>
    %460 = arith.cmpi eq, %232, %459 : vector<8x32xi32>
    %461 = arith.extui %460 : vector<8x32xi1> to vector<8x32xi32>
    %462 = arith.sitofp %461 : vector<8x32xi32> to vector<8x32xf32>
    %463 = vector.broadcast %452 : vector<8x1xf32> to vector<8x32xf32>
    %464 = arith.subf %450, %463 : vector<8x32xf32>
    %465 = math.exp %464 : vector<8x32xf32>
    %cst_88 = arith.constant dense<0.000000e+00> : vector<8xf32>
    %466 = vector.multi_reduction <add>, %465, %cst_88 [1] : vector<8x32xf32> to vector<8xf32>
    %467 = vector.shape_cast %466 : vector<8xf32> to vector<8x1xf32>
    %468 = math.log %467 : vector<8x1xf32>
    %469 = arith.addf %452, %468 : vector<8x1xf32>
    %470 = vector.broadcast %469 : vector<8x1xf32> to vector<8x32xf32>
    %471 = arith.subf %450, %470 : vector<8x32xf32>
    %cst_89 = arith.constant dense<0.000000e+00> : vector<8x96xf32>
    %472 = tpu.matmul %462, %5, %cst_89 {dimension_numbers = #tpu.dot_dimension_numbers<[1], [0], [0], [1], [0, 0, 1, 1], [], []>} : vector<8x32xf32>, vector<32x96xf32>, vector<8x96xf32> -> vector<8x96xf32>
    %cst_90 = arith.constant dense<0.000000e+00> : vector<8x352xf32>
    %473 = tpu.matmul %446, %18, %cst_90 {dimension_numbers = #tpu.dot_dimension_numbers<[1], [0], [0], [1], [0, 0, 1, 1], [], []>} : vector<8x32xf32>, vector<32x352xf32>, vector<8x352xf32> -> vector<8x352xf32>
    %474 = vector.extract_strided_slice %473 {offsets = [0, 0], sizes = [8, 256], strides = [1, 1]} : vector<8x352xf32> to vector<8x256xf32>
    %475 = vector.extract_strided_slice %473 {offsets = [0, 256], sizes = [8, 96], strides = [1, 1]} : vector<8x352xf32> to vector<8x96xf32>
    %476 = arith.addf %475, %226 : vector<8x96xf32>
    %477 = arith.addf %474, %222 : vector<8x256xf32>
    %478 = math.tanh %477 : vector<8x256xf32>
    %479 = arith.mulf %478, %231 : vector<8x256xf32>
    %cst_91 = arith.constant dense<0.000000e+00> : vector<8x8xf32>
    %480 = tpu.matmul %479, %253, %cst_91 {dimension_numbers = #tpu.dot_dimension_numbers<[1], [0], [0], [1], [0, 0, 1, 1], [], []>} : vector<8x256xf32>, vector<256x8xf32>, vector<8x8xf32> -> vector<8x8xf32>
    %cst_92 = arith.constant dense<0xFF800000> : vector<8xf32>
    %481 = vector.multi_reduction <maximumf>, %480, %cst_92 [1] : vector<8x8xf32> to vector<8xf32>
    %482 = vector.shape_cast %481 : vector<8xf32> to vector<8x1xf32>
    %483 = vector.broadcast %482 : vector<8x1xf32> to vector<8x8xf32>
    %484 = arith.subf %480, %483 : vector<8x8xf32>
    %485 = math.exp %484 : vector<8x8xf32>
    %cst_93 = arith.constant dense<0.000000e+00> : vector<8xf32>
    %486 = vector.multi_reduction <add>, %485, %cst_93 [1] : vector<8x8xf32> to vector<8xf32>
    %487 = vector.shape_cast %486 : vector<8xf32> to vector<8x1xf32>
    %488 = tpu.reciprocal %487 {approx = true} : vector<8x1xf32> -> vector<8x1xf32>
    %489 = vector.broadcast %488 : vector<8x1xf32> to vector<8x8xf32>
    %490 = arith.mulf %485, %489 : vector<8x8xf32>
    %cst_94 = arith.constant dense<0.000000e+00> : vector<8x256xf32>
    %491 = tpu.matmul %490, %239, %cst_94 {dimension_numbers = #tpu.dot_dimension_numbers<[1], [0], [0], [1], [0, 0, 1, 1], [], []>} : vector<8x8xf32>, vector<8x256xf32>, vector<8x256xf32> -> vector<8x256xf32>
    %492 = arith.mulf %491, %210 : vector<8x256xf32>
    %cst_95 = arith.constant dense<0.000000e+00> : vector<8x32xf32>
    %493 = tpu.matmul %492, %246, %cst_95 {dimension_numbers = #tpu.dot_dimension_numbers<[1], [0], [0], [1], [0, 0, 1, 1], [], []>} : vector<8x256xf32>, vector<256x32xf32>, vector<8x32xf32> -> vector<8x32xf32>
    %cst_96 = arith.constant dense<0.000000e+00> : vector<8x128xf32>
    %494 = tpu.matmul %493, %6, %cst_96 {dimension_numbers = #tpu.dot_dimension_numbers<[1], [0], [0], [1], [0, 0, 1, 1], [], []>} : vector<8x32xf32>, vector<32x128xf32>, vector<8x128xf32> -> vector<8x128xf32>
    %495 = vector.extract_strided_slice %494 {offsets = [0, 0], sizes = [8, 96], strides = [1, 1]} : vector<8x128xf32> to vector<8x96xf32>
    %496 = arith.addf %472, %495 : vector<8x96xf32>
    %497 = arith.addf %496, %224 : vector<8x96xf32>
    %498 = vector.extract_strided_slice %497 {offsets = [0, 0], sizes = [8, 64], strides = [1, 1]} : vector<8x96xf32> to vector<8x64xf32>
    %499 = vector.extract_strided_slice %476 {offsets = [0, 0], sizes = [8, 64], strides = [1, 1]} : vector<8x96xf32> to vector<8x64xf32>
    %500 = arith.addf %498, %499 : vector<8x64xf32>
    %501 = arith.negf %500 : vector<8x64xf32>
    %502 = math.exp %501 : vector<8x64xf32>
    %cst_97 = arith.constant 1.000000e+00 : f32
    %503 = vector.broadcast %cst_97 : f32 to vector<8x64xf32>
    %504 = arith.addf %503, %502 : vector<8x64xf32>
    %505 = arith.divf %503, %504 : vector<8x64xf32>
    %506 = vector.extract_strided_slice %505 {offsets = [0, 0], sizes = [8, 32], strides = [1, 1]} : vector<8x64xf32> to vector<8x32xf32>
    %507 = vector.extract_strided_slice %505 {offsets = [0, 32], sizes = [8, 32], strides = [1, 1]} : vector<8x64xf32> to vector<8x32xf32>
    %508 = vector.extract_strided_slice %497 {offsets = [0, 64], sizes = [8, 32], strides = [1, 1]} : vector<8x96xf32> to vector<8x32xf32>
    %509 = vector.extract_strided_slice %476 {offsets = [0, 64], sizes = [8, 32], strides = [1, 1]} : vector<8x96xf32> to vector<8x32xf32>
    %510 = arith.mulf %506, %509 : vector<8x32xf32>
    %511 = arith.addf %508, %510 : vector<8x32xf32>
    %512 = math.tanh %511 : vector<8x32xf32>
    %cst_98 = arith.constant 1.000000e+00 : f32
    %513 = vector.broadcast %cst_98 : f32 to vector<8x32xf32>
    %514 = arith.subf %513, %507 : vector<8x32xf32>
    %515 = arith.mulf %514, %512 : vector<8x32xf32>
    %516 = arith.mulf %507, %446 : vector<8x32xf32>
    %517 = arith.addf %515, %516 : vector<8x32xf32>
    %cst_99 = arith.constant dense<0.000000e+00> : vector<8x32xf32>
    %518 = tpu.matmul %517, %9, %cst_99 {dimension_numbers = #tpu.dot_dimension_numbers<[1], [0], [0], [1], [0, 0, 1, 1], [], []>} : vector<8x32xf32>, vector<32x32xf32>, vector<8x32xf32> -> vector<8x32xf32>
    %519 = vector.extract_strided_slice %494 {offsets = [0, 96], sizes = [8, 32], strides = [1, 1]} : vector<8x128xf32> to vector<8x32xf32>
    %520 = arith.addf %518, %519 : vector<8x32xf32>
    %521 = arith.addf %520, %228 : vector<8x32xf32>
    %cst_100 = arith.constant dense<0xFF800000> : vector<8xf32>
    %522 = vector.multi_reduction <maximumf>, %521, %cst_100 [1] : vector<8x32xf32> to vector<8xf32>
    %523 = vector.shape_cast %522 : vector<8xf32> to vector<8x1xf32>
    %524 = vector.broadcast %523 : vector<8x1xf32> to vector<8x32xf32>
    %525 = arith.cmpf oge, %521, %524 : vector<8x32xf32>
    %c32_i32_101 = arith.constant 32 : i32
    %526 = vector.broadcast %c32_i32_101 : i32 to vector<8x32xi32>
    %527 = arith.select %525, %232, %526 : vector<8x32xi1>, vector<8x32xi32>
    %cst_102 = arith.constant dense<2147483647> : vector<8xi32>
    %528 = vector.multi_reduction <minsi>, %527, %cst_102 [1] : vector<8x32xi32> to vector<8xi32>
    %529 = vector.shape_cast %528 : vector<8xi32> to vector<8x1xi32>
    %530 = vector.broadcast %529 : vector<8x1xi32> to vector<8x32xi32>
    %531 = arith.cmpi eq, %232, %530 : vector<8x32xi32>
    %532 = arith.extui %531 : vector<8x32xi1> to vector<8x32xi32>
    %533 = arith.sitofp %532 : vector<8x32xi32> to vector<8x32xf32>
    %534 = vector.broadcast %523 : vector<8x1xf32> to vector<8x32xf32>
    %535 = arith.subf %521, %534 : vector<8x32xf32>
    %536 = math.exp %535 : vector<8x32xf32>
    %cst_103 = arith.constant dense<0.000000e+00> : vector<8xf32>
    %537 = vector.multi_reduction <add>, %536, %cst_103 [1] : vector<8x32xf32> to vector<8xf32>
    %538 = vector.shape_cast %537 : vector<8xf32> to vector<8x1xf32>
    %539 = math.log %538 : vector<8x1xf32>
    %540 = arith.addf %523, %539 : vector<8x1xf32>
    %541 = vector.broadcast %540 : vector<8x1xf32> to vector<8x32xf32>
    %542 = arith.subf %521, %541 : vector<8x32xf32>
    %cst_104 = arith.constant dense<0.000000e+00> : vector<8x96xf32>
    %543 = tpu.matmul %533, %5, %cst_104 {dimension_numbers = #tpu.dot_dimension_numbers<[1], [0], [0], [1], [0, 0, 1, 1], [], []>} : vector<8x32xf32>, vector<32x96xf32>, vector<8x96xf32> -> vector<8x96xf32>
    %cst_105 = arith.constant dense<0.000000e+00> : vector<8x352xf32>
    %544 = tpu.matmul %517, %18, %cst_105 {dimension_numbers = #tpu.dot_dimension_numbers<[1], [0], [0], [1], [0, 0, 1, 1], [], []>} : vector<8x32xf32>, vector<32x352xf32>, vector<8x352xf32> -> vector<8x352xf32>
    %545 = vector.extract_strided_slice %544 {offsets = [0, 0], sizes = [8, 256], strides = [1, 1]} : vector<8x352xf32> to vector<8x256xf32>
    %546 = vector.extract_strided_slice %544 {offsets = [0, 256], sizes = [8, 96], strides = [1, 1]} : vector<8x352xf32> to vector<8x96xf32>
    %547 = arith.addf %546, %226 : vector<8x96xf32>
    %548 = arith.addf %545, %222 : vector<8x256xf32>
    %549 = math.tanh %548 : vector<8x256xf32>
    %550 = arith.mulf %549, %231 : vector<8x256xf32>
    %cst_106 = arith.constant dense<0.000000e+00> : vector<8x8xf32>
    %551 = tpu.matmul %550, %253, %cst_106 {dimension_numbers = #tpu.dot_dimension_numbers<[1], [0], [0], [1], [0, 0, 1, 1], [], []>} : vector<8x256xf32>, vector<256x8xf32>, vector<8x8xf32> -> vector<8x8xf32>
    %cst_107 = arith.constant dense<0xFF800000> : vector<8xf32>
    %552 = vector.multi_reduction <maximumf>, %551, %cst_107 [1] : vector<8x8xf32> to vector<8xf32>
    %553 = vector.shape_cast %552 : vector<8xf32> to vector<8x1xf32>
    %554 = vector.broadcast %553 : vector<8x1xf32> to vector<8x8xf32>
    %555 = arith.subf %551, %554 : vector<8x8xf32>
    %556 = math.exp %555 : vector<8x8xf32>
    %cst_108 = arith.constant dense<0.000000e+00> : vector<8xf32>
    %557 = vector.multi_reduction <add>, %556, %cst_108 [1] : vector<8x8xf32> to vector<8xf32>
    %558 = vector.shape_cast %557 : vector<8xf32> to vector<8x1xf32>
    %559 = tpu.reciprocal %558 {approx = true} : vector<8x1xf32> -> vector<8x1xf32>
    %560 = vector.broadcast %559 : vector<8x1xf32> to vector<8x8xf32>
    %561 = arith.mulf %556, %560 : vector<8x8xf32>
    %cst_109 = arith.constant dense<0.000000e+00> : vector<8x256xf32>
    %562 = tpu.matmul %561, %239, %cst_109 {dimension_numbers = #tpu.dot_dimension_numbers<[1], [0], [0], [1], [0, 0, 1, 1], [], []>} : vector<8x8xf32>, vector<8x256xf32>, vector<8x256xf32> -> vector<8x256xf32>
    %563 = arith.mulf %562, %210 : vector<8x256xf32>
    %cst_110 = arith.constant dense<0.000000e+00> : vector<8x32xf32>
    %564 = tpu.matmul %563, %246, %cst_110 {dimension_numbers = #tpu.dot_dimension_numbers<[1], [0], [0], [1], [0, 0, 1, 1], [], []>} : vector<8x256xf32>, vector<256x32xf32>, vector<8x32xf32> -> vector<8x32xf32>
    %cst_111 = arith.constant dense<0.000000e+00> : vector<8x128xf32>
    %565 = tpu.matmul %564, %6, %cst_111 {dimension_numbers = #tpu.dot_dimension_numbers<[1], [0], [0], [1], [0, 0, 1, 1], [], []>} : vector<8x32xf32>, vector<32x128xf32>, vector<8x128xf32> -> vector<8x128xf32>
    %566 = vector.extract_strided_slice %565 {offsets = [0, 0], sizes = [8, 96], strides = [1, 1]} : vector<8x128xf32> to vector<8x96xf32>
    %567 = arith.addf %543, %566 : vector<8x96xf32>
    %568 = arith.addf %567, %224 : vector<8x96xf32>
    %569 = vector.extract_strided_slice %568 {offsets = [0, 0], sizes = [8, 64], strides = [1, 1]} : vector<8x96xf32> to vector<8x64xf32>
    %570 = vector.extract_strided_slice %547 {offsets = [0, 0], sizes = [8, 64], strides = [1, 1]} : vector<8x96xf32> to vector<8x64xf32>
    %571 = arith.addf %569, %570 : vector<8x64xf32>
    %572 = arith.negf %571 : vector<8x64xf32>
    %573 = math.exp %572 : vector<8x64xf32>
    %cst_112 = arith.constant 1.000000e+00 : f32
    %574 = vector.broadcast %cst_112 : f32 to vector<8x64xf32>
    %575 = arith.addf %574, %573 : vector<8x64xf32>
    %576 = arith.divf %574, %575 : vector<8x64xf32>
    %577 = vector.extract_strided_slice %576 {offsets = [0, 0], sizes = [8, 32], strides = [1, 1]} : vector<8x64xf32> to vector<8x32xf32>
    %578 = vector.extract_strided_slice %576 {offsets = [0, 32], sizes = [8, 32], strides = [1, 1]} : vector<8x64xf32> to vector<8x32xf32>
    %579 = vector.extract_strided_slice %568 {offsets = [0, 64], sizes = [8, 32], strides = [1, 1]} : vector<8x96xf32> to vector<8x32xf32>
    %580 = vector.extract_strided_slice %547 {offsets = [0, 64], sizes = [8, 32], strides = [1, 1]} : vector<8x96xf32> to vector<8x32xf32>
    %581 = arith.mulf %577, %580 : vector<8x32xf32>
    %582 = arith.addf %579, %581 : vector<8x32xf32>
    %583 = math.tanh %582 : vector<8x32xf32>
    %cst_113 = arith.constant 1.000000e+00 : f32
    %584 = vector.broadcast %cst_113 : f32 to vector<8x32xf32>
    %585 = arith.subf %584, %578 : vector<8x32xf32>
    %586 = arith.mulf %585, %583 : vector<8x32xf32>
    %587 = arith.mulf %578, %517 : vector<8x32xf32>
    %588 = arith.addf %586, %587 : vector<8x32xf32>
    %cst_114 = arith.constant dense<0.000000e+00> : vector<8x32xf32>
    %589 = tpu.matmul %588, %9, %cst_114 {dimension_numbers = #tpu.dot_dimension_numbers<[1], [0], [0], [1], [0, 0, 1, 1], [], []>} : vector<8x32xf32>, vector<32x32xf32>, vector<8x32xf32> -> vector<8x32xf32>
    %590 = vector.extract_strided_slice %565 {offsets = [0, 96], sizes = [8, 32], strides = [1, 1]} : vector<8x128xf32> to vector<8x32xf32>
    %591 = arith.addf %589, %590 : vector<8x32xf32>
    %592 = arith.addf %591, %228 : vector<8x32xf32>
    %cst_115 = arith.constant dense<0xFF800000> : vector<8xf32>
    %593 = vector.multi_reduction <maximumf>, %592, %cst_115 [1] : vector<8x32xf32> to vector<8xf32>
    %594 = vector.shape_cast %593 : vector<8xf32> to vector<8x1xf32>
    %595 = vector.broadcast %594 : vector<8x1xf32> to vector<8x32xf32>
    %596 = arith.cmpf oge, %592, %595 : vector<8x32xf32>
    %c32_i32_116 = arith.constant 32 : i32
    %597 = vector.broadcast %c32_i32_116 : i32 to vector<8x32xi32>
    %598 = arith.select %596, %232, %597 : vector<8x32xi1>, vector<8x32xi32>
    %cst_117 = arith.constant dense<2147483647> : vector<8xi32>
    %599 = vector.multi_reduction <minsi>, %598, %cst_117 [1] : vector<8x32xi32> to vector<8xi32>
    %600 = vector.shape_cast %599 : vector<8xi32> to vector<8x1xi32>
    %601 = vector.broadcast %600 : vector<8x1xi32> to vector<8x32xi32>
    %602 = arith.cmpi eq, %232, %601 : vector<8x32xi32>
    %603 = arith.extui %602 : vector<8x32xi1> to vector<8x32xi32>
    %604 = arith.sitofp %603 : vector<8x32xi32> to vector<8x32xf32>
    %605 = vector.broadcast %594 : vector<8x1xf32> to vector<8x32xf32>
    %606 = arith.subf %592, %605 : vector<8x32xf32>
    %607 = math.exp %606 : vector<8x32xf32>
    %cst_118 = arith.constant dense<0.000000e+00> : vector<8xf32>
    %608 = vector.multi_reduction <add>, %607, %cst_118 [1] : vector<8x32xf32> to vector<8xf32>
    %609 = vector.shape_cast %608 : vector<8xf32> to vector<8x1xf32>
    %610 = math.log %609 : vector<8x1xf32>
    %611 = arith.addf %594, %610 : vector<8x1xf32>
    %612 = vector.broadcast %611 : vector<8x1xf32> to vector<8x32xf32>
    %613 = arith.subf %592, %612 : vector<8x32xf32>
    %cst_119 = arith.constant dense<0.000000e+00> : vector<8x96xf32>
    %614 = tpu.matmul %604, %5, %cst_119 {dimension_numbers = #tpu.dot_dimension_numbers<[1], [0], [0], [1], [0, 0, 1, 1], [], []>} : vector<8x32xf32>, vector<32x96xf32>, vector<8x96xf32> -> vector<8x96xf32>
    %cst_120 = arith.constant dense<0.000000e+00> : vector<8x352xf32>
    %615 = tpu.matmul %588, %18, %cst_120 {dimension_numbers = #tpu.dot_dimension_numbers<[1], [0], [0], [1], [0, 0, 1, 1], [], []>} : vector<8x32xf32>, vector<32x352xf32>, vector<8x352xf32> -> vector<8x352xf32>
    %616 = vector.extract_strided_slice %615 {offsets = [0, 0], sizes = [8, 256], strides = [1, 1]} : vector<8x352xf32> to vector<8x256xf32>
    %617 = vector.extract_strided_slice %615 {offsets = [0, 256], sizes = [8, 96], strides = [1, 1]} : vector<8x352xf32> to vector<8x96xf32>
    %618 = arith.addf %617, %226 : vector<8x96xf32>
    %619 = arith.addf %616, %222 : vector<8x256xf32>
    %620 = math.tanh %619 : vector<8x256xf32>
    %621 = arith.mulf %620, %231 : vector<8x256xf32>
    %cst_121 = arith.constant dense<0.000000e+00> : vector<8x8xf32>
    %622 = tpu.matmul %621, %253, %cst_121 {dimension_numbers = #tpu.dot_dimension_numbers<[1], [0], [0], [1], [0, 0, 1, 1], [], []>} : vector<8x256xf32>, vector<256x8xf32>, vector<8x8xf32> -> vector<8x8xf32>
    %cst_122 = arith.constant dense<0xFF800000> : vector<8xf32>
    %623 = vector.multi_reduction <maximumf>, %622, %cst_122 [1] : vector<8x8xf32> to vector<8xf32>
    %624 = vector.shape_cast %623 : vector<8xf32> to vector<8x1xf32>
    %625 = vector.broadcast %624 : vector<8x1xf32> to vector<8x8xf32>
    %626 = arith.subf %622, %625 : vector<8x8xf32>
    %627 = math.exp %626 : vector<8x8xf32>
    %cst_123 = arith.constant dense<0.000000e+00> : vector<8xf32>
    %628 = vector.multi_reduction <add>, %627, %cst_123 [1] : vector<8x8xf32> to vector<8xf32>
    %629 = vector.shape_cast %628 : vector<8xf32> to vector<8x1xf32>
    %630 = tpu.reciprocal %629 {approx = true} : vector<8x1xf32> -> vector<8x1xf32>
    %631 = vector.broadcast %630 : vector<8x1xf32> to vector<8x8xf32>
    %632 = arith.mulf %627, %631 : vector<8x8xf32>
    %cst_124 = arith.constant dense<0.000000e+00> : vector<8x256xf32>
    %633 = tpu.matmul %632, %239, %cst_124 {dimension_numbers = #tpu.dot_dimension_numbers<[1], [0], [0], [1], [0, 0, 1, 1], [], []>} : vector<8x8xf32>, vector<8x256xf32>, vector<8x256xf32> -> vector<8x256xf32>
    %634 = arith.mulf %633, %210 : vector<8x256xf32>
    %cst_125 = arith.constant dense<0.000000e+00> : vector<8x32xf32>
    %635 = tpu.matmul %634, %246, %cst_125 {dimension_numbers = #tpu.dot_dimension_numbers<[1], [0], [0], [1], [0, 0, 1, 1], [], []>} : vector<8x256xf32>, vector<256x32xf32>, vector<8x32xf32> -> vector<8x32xf32>
    %cst_126 = arith.constant dense<0.000000e+00> : vector<8x128xf32>
    %636 = tpu.matmul %635, %6, %cst_126 {dimension_numbers = #tpu.dot_dimension_numbers<[1], [0], [0], [1], [0, 0, 1, 1], [], []>} : vector<8x32xf32>, vector<32x128xf32>, vector<8x128xf32> -> vector<8x128xf32>
    %637 = vector.extract_strided_slice %636 {offsets = [0, 0], sizes = [8, 96], strides = [1, 1]} : vector<8x128xf32> to vector<8x96xf32>
    %638 = arith.addf %614, %637 : vector<8x96xf32>
    %639 = arith.addf %638, %224 : vector<8x96xf32>
    %640 = vector.extract_strided_slice %639 {offsets = [0, 0], sizes = [8, 64], strides = [1, 1]} : vector<8x96xf32> to vector<8x64xf32>
    %641 = vector.extract_strided_slice %618 {offsets = [0, 0], sizes = [8, 64], strides = [1, 1]} : vector<8x96xf32> to vector<8x64xf32>
    %642 = arith.addf %640, %641 : vector<8x64xf32>
    %643 = arith.negf %642 : vector<8x64xf32>
    %644 = math.exp %643 : vector<8x64xf32>
    %cst_127 = arith.constant 1.000000e+00 : f32
    %645 = vector.broadcast %cst_127 : f32 to vector<8x64xf32>
    %646 = arith.addf %645, %644 : vector<8x64xf32>
    %647 = arith.divf %645, %646 : vector<8x64xf32>
    %648 = vector.extract_strided_slice %647 {offsets = [0, 0], sizes = [8, 32], strides = [1, 1]} : vector<8x64xf32> to vector<8x32xf32>
    %649 = vector.extract_strided_slice %647 {offsets = [0, 32], sizes = [8, 32], strides = [1, 1]} : vector<8x64xf32> to vector<8x32xf32>
    %650 = vector.extract_strided_slice %639 {offsets = [0, 64], sizes = [8, 32], strides = [1, 1]} : vector<8x96xf32> to vector<8x32xf32>
    %651 = vector.extract_strided_slice %618 {offsets = [0, 64], sizes = [8, 32], strides = [1, 1]} : vector<8x96xf32> to vector<8x32xf32>
    %652 = arith.mulf %648, %651 : vector<8x32xf32>
    %653 = arith.addf %650, %652 : vector<8x32xf32>
    %654 = math.tanh %653 : vector<8x32xf32>
    %cst_128 = arith.constant 1.000000e+00 : f32
    %655 = vector.broadcast %cst_128 : f32 to vector<8x32xf32>
    %656 = arith.subf %655, %649 : vector<8x32xf32>
    %657 = arith.mulf %656, %654 : vector<8x32xf32>
    %658 = arith.mulf %649, %588 : vector<8x32xf32>
    %659 = arith.addf %657, %658 : vector<8x32xf32>
    %cst_129 = arith.constant dense<0.000000e+00> : vector<8x32xf32>
    %660 = tpu.matmul %659, %9, %cst_129 {dimension_numbers = #tpu.dot_dimension_numbers<[1], [0], [0], [1], [0, 0, 1, 1], [], []>} : vector<8x32xf32>, vector<32x32xf32>, vector<8x32xf32> -> vector<8x32xf32>
    %661 = vector.extract_strided_slice %636 {offsets = [0, 96], sizes = [8, 32], strides = [1, 1]} : vector<8x128xf32> to vector<8x32xf32>
    %662 = arith.addf %660, %661 : vector<8x32xf32>
    %663 = arith.addf %662, %228 : vector<8x32xf32>
    %cst_130 = arith.constant dense<0xFF800000> : vector<8xf32>
    %664 = vector.multi_reduction <maximumf>, %663, %cst_130 [1] : vector<8x32xf32> to vector<8xf32>
    %665 = vector.shape_cast %664 : vector<8xf32> to vector<8x1xf32>
    %666 = vector.broadcast %665 : vector<8x1xf32> to vector<8x32xf32>
    %667 = arith.cmpf oge, %663, %666 : vector<8x32xf32>
    %c32_i32_131 = arith.constant 32 : i32
    %668 = vector.broadcast %c32_i32_131 : i32 to vector<8x32xi32>
    %669 = arith.select %667, %232, %668 : vector<8x32xi1>, vector<8x32xi32>
    %cst_132 = arith.constant dense<2147483647> : vector<8xi32>
    %670 = vector.multi_reduction <minsi>, %669, %cst_132 [1] : vector<8x32xi32> to vector<8xi32>
    %671 = vector.shape_cast %670 : vector<8xi32> to vector<8x1xi32>
    %672 = vector.broadcast %671 : vector<8x1xi32> to vector<8x32xi32>
    %673 = arith.cmpi eq, %232, %672 : vector<8x32xi32>
    %674 = arith.extui %673 : vector<8x32xi1> to vector<8x32xi32>
    %675 = arith.sitofp %674 : vector<8x32xi32> to vector<8x32xf32>
    %676 = vector.broadcast %665 : vector<8x1xf32> to vector<8x32xf32>
    %677 = arith.subf %663, %676 : vector<8x32xf32>
    %678 = math.exp %677 : vector<8x32xf32>
    %cst_133 = arith.constant dense<0.000000e+00> : vector<8xf32>
    %679 = vector.multi_reduction <add>, %678, %cst_133 [1] : vector<8x32xf32> to vector<8xf32>
    %680 = vector.shape_cast %679 : vector<8xf32> to vector<8x1xf32>
    %681 = math.log %680 : vector<8x1xf32>
    %682 = arith.addf %665, %681 : vector<8x1xf32>
    %683 = vector.broadcast %682 : vector<8x1xf32> to vector<8x32xf32>
    %684 = arith.subf %663, %683 : vector<8x32xf32>
    %cst_134 = arith.constant dense<0.000000e+00> : vector<8x96xf32>
    %685 = tpu.matmul %675, %5, %cst_134 {dimension_numbers = #tpu.dot_dimension_numbers<[1], [0], [0], [1], [0, 0, 1, 1], [], []>} : vector<8x32xf32>, vector<32x96xf32>, vector<8x96xf32> -> vector<8x96xf32>
    %cst_135 = arith.constant dense<0.000000e+00> : vector<8x352xf32>
    %686 = tpu.matmul %659, %18, %cst_135 {dimension_numbers = #tpu.dot_dimension_numbers<[1], [0], [0], [1], [0, 0, 1, 1], [], []>} : vector<8x32xf32>, vector<32x352xf32>, vector<8x352xf32> -> vector<8x352xf32>
    %687 = vector.extract_strided_slice %686 {offsets = [0, 0], sizes = [8, 256], strides = [1, 1]} : vector<8x352xf32> to vector<8x256xf32>
    %688 = vector.extract_strided_slice %686 {offsets = [0, 256], sizes = [8, 96], strides = [1, 1]} : vector<8x352xf32> to vector<8x96xf32>
    %689 = arith.addf %688, %226 : vector<8x96xf32>
    %690 = arith.addf %687, %222 : vector<8x256xf32>
    %691 = math.tanh %690 : vector<8x256xf32>
    %692 = arith.mulf %691, %231 : vector<8x256xf32>
    %cst_136 = arith.constant dense<0.000000e+00> : vector<8x8xf32>
    %693 = tpu.matmul %692, %253, %cst_136 {dimension_numbers = #tpu.dot_dimension_numbers<[1], [0], [0], [1], [0, 0, 1, 1], [], []>} : vector<8x256xf32>, vector<256x8xf32>, vector<8x8xf32> -> vector<8x8xf32>
    %cst_137 = arith.constant dense<0xFF800000> : vector<8xf32>
    %694 = vector.multi_reduction <maximumf>, %693, %cst_137 [1] : vector<8x8xf32> to vector<8xf32>
    %695 = vector.shape_cast %694 : vector<8xf32> to vector<8x1xf32>
    %696 = vector.broadcast %695 : vector<8x1xf32> to vector<8x8xf32>
    %697 = arith.subf %693, %696 : vector<8x8xf32>
    %698 = math.exp %697 : vector<8x8xf32>
    %cst_138 = arith.constant dense<0.000000e+00> : vector<8xf32>
    %699 = vector.multi_reduction <add>, %698, %cst_138 [1] : vector<8x8xf32> to vector<8xf32>
    %700 = vector.shape_cast %699 : vector<8xf32> to vector<8x1xf32>
    %701 = tpu.reciprocal %700 {approx = true} : vector<8x1xf32> -> vector<8x1xf32>
    %702 = vector.broadcast %701 : vector<8x1xf32> to vector<8x8xf32>
    %703 = arith.mulf %698, %702 : vector<8x8xf32>
    %cst_139 = arith.constant dense<0.000000e+00> : vector<8x256xf32>
    %704 = tpu.matmul %703, %239, %cst_139 {dimension_numbers = #tpu.dot_dimension_numbers<[1], [0], [0], [1], [0, 0, 1, 1], [], []>} : vector<8x8xf32>, vector<8x256xf32>, vector<8x256xf32> -> vector<8x256xf32>
    %705 = arith.mulf %704, %210 : vector<8x256xf32>
    %cst_140 = arith.constant dense<0.000000e+00> : vector<8x32xf32>
    %706 = tpu.matmul %705, %246, %cst_140 {dimension_numbers = #tpu.dot_dimension_numbers<[1], [0], [0], [1], [0, 0, 1, 1], [], []>} : vector<8x256xf32>, vector<256x32xf32>, vector<8x32xf32> -> vector<8x32xf32>
    %cst_141 = arith.constant dense<0.000000e+00> : vector<8x128xf32>
    %707 = tpu.matmul %706, %6, %cst_141 {dimension_numbers = #tpu.dot_dimension_numbers<[1], [0], [0], [1], [0, 0, 1, 1], [], []>} : vector<8x32xf32>, vector<32x128xf32>, vector<8x128xf32> -> vector<8x128xf32>
    %708 = vector.extract_strided_slice %707 {offsets = [0, 0], sizes = [8, 96], strides = [1, 1]} : vector<8x128xf32> to vector<8x96xf32>
    %709 = arith.addf %685, %708 : vector<8x96xf32>
    %710 = arith.addf %709, %224 : vector<8x96xf32>
    %711 = vector.extract_strided_slice %710 {offsets = [0, 0], sizes = [8, 64], strides = [1, 1]} : vector<8x96xf32> to vector<8x64xf32>
    %712 = vector.extract_strided_slice %689 {offsets = [0, 0], sizes = [8, 64], strides = [1, 1]} : vector<8x96xf32> to vector<8x64xf32>
    %713 = arith.addf %711, %712 : vector<8x64xf32>
    %714 = arith.negf %713 : vector<8x64xf32>
    %715 = math.exp %714 : vector<8x64xf32>
    %cst_142 = arith.constant 1.000000e+00 : f32
    %716 = vector.broadcast %cst_142 : f32 to vector<8x64xf32>
    %717 = arith.addf %716, %715 : vector<8x64xf32>
    %718 = arith.divf %716, %717 : vector<8x64xf32>
    %719 = vector.extract_strided_slice %718 {offsets = [0, 0], sizes = [8, 32], strides = [1, 1]} : vector<8x64xf32> to vector<8x32xf32>
    %720 = vector.extract_strided_slice %718 {offsets = [0, 32], sizes = [8, 32], strides = [1, 1]} : vector<8x64xf32> to vector<8x32xf32>
    %721 = vector.extract_strided_slice %710 {offsets = [0, 64], sizes = [8, 32], strides = [1, 1]} : vector<8x96xf32> to vector<8x32xf32>
    %722 = vector.extract_strided_slice %689 {offsets = [0, 64], sizes = [8, 32], strides = [1, 1]} : vector<8x96xf32> to vector<8x32xf32>
    %723 = arith.mulf %719, %722 : vector<8x32xf32>
    %724 = arith.addf %721, %723 : vector<8x32xf32>
    %725 = math.tanh %724 : vector<8x32xf32>
    %cst_143 = arith.constant 1.000000e+00 : f32
    %726 = vector.broadcast %cst_143 : f32 to vector<8x32xf32>
    %727 = arith.subf %726, %720 : vector<8x32xf32>
    %728 = arith.mulf %727, %725 : vector<8x32xf32>
    %729 = arith.mulf %720, %659 : vector<8x32xf32>
    %730 = arith.addf %728, %729 : vector<8x32xf32>
    %cst_144 = arith.constant dense<0.000000e+00> : vector<8x32xf32>
    %731 = tpu.matmul %730, %9, %cst_144 {dimension_numbers = #tpu.dot_dimension_numbers<[1], [0], [0], [1], [0, 0, 1, 1], [], []>} : vector<8x32xf32>, vector<32x32xf32>, vector<8x32xf32> -> vector<8x32xf32>
    %732 = vector.extract_strided_slice %707 {offsets = [0, 96], sizes = [8, 32], strides = [1, 1]} : vector<8x128xf32> to vector<8x32xf32>
    %733 = arith.addf %731, %732 : vector<8x32xf32>
    %734 = arith.addf %733, %228 : vector<8x32xf32>
    %cst_145 = arith.constant dense<0xFF800000> : vector<8xf32>
    %735 = vector.multi_reduction <maximumf>, %734, %cst_145 [1] : vector<8x32xf32> to vector<8xf32>
    %736 = vector.shape_cast %735 : vector<8xf32> to vector<8x1xf32>
    %737 = vector.broadcast %736 : vector<8x1xf32> to vector<8x32xf32>
    %738 = arith.subf %734, %737 : vector<8x32xf32>
    %739 = math.exp %738 : vector<8x32xf32>
    %cst_146 = arith.constant dense<0.000000e+00> : vector<8xf32>
    %740 = vector.multi_reduction <add>, %739, %cst_146 [1] : vector<8x32xf32> to vector<8xf32>
    %741 = vector.shape_cast %740 : vector<8xf32> to vector<8x1xf32>
    %742 = math.log %741 : vector<8x1xf32>
    %743 = arith.addf %736, %742 : vector<8x1xf32>
    %744 = vector.broadcast %743 : vector<8x1xf32> to vector<8x32xf32>
    %745 = arith.subf %734, %744 : vector<8x32xf32>
    %746 = tpu.concatenate %258, %329, %400, %471, %542, %613, %684, %745 in 1 : vector<8x32xf32>, vector<8x32xf32>, vector<8x32xf32>, vector<8x32xf32>, vector<8x32xf32>, vector<8x32xf32>, vector<8x32xf32>, vector<8x32xf32> -> vector<8x256xf32>
    %c0_147 = arith.constant 0 : index
    %c0_148 = arith.constant 0 : index
    %747 = vector.load %arg3[%c0_147, %c0_148] : memref<8x256xf32, #tpu.memory_space<vmem>>, vector<8x256xf32>
    tpu.vector_store %arg3[%c0_147, %c0_148], %746 {strides = array<i32>} : memref<8x256xf32, #tpu.memory_space<vmem>>, vector<8x256xf32>,
    return
  }
}

</mosaic_0001>

<bundles_post_ra>
// kernel: tile.9
= control target key start
LH: loop header
LB: loop body
LE: loop exit
PB: predicated region body
PF: predicated region fallthrough
CT: control target
= control target key end

     0   :  { %vm92_vm0 = vcmask 1047556   ;;  %s459_s14 = smov 96   ;;  %s460_s26 = smov 64   ;;  %vm3_vm1 = vcmask 261120   ;;  %vm96_vm2 = vcmask 1048320   ;;  %vm183_vm3 = vcmask 785920   ;;  %s904_s0 = inlined_call_operand.vmem [shape: f32[32,8,32], index: 0, kind: input, shape index: {}]   ;;  %s905_s1 = inlined_call_operand.vmem [shape: f32[32,256], index: 1, kind: output, shape index: {}]  }
   0x1   :  { %v392_v0 = vld [vmem:[%s904_s0 + $0x7] ss:$8 sm:$0xf]   ;;  %v387_v3 = vld [vmem:[%s904_s0 + $0x3] ss:$8 sm:$0xf]  }
   0x2   :  { %v393_v1 = vld [vmem:[%s904_s0 + $0x7] ss:$8 sm:$0xf0]   ;;  %v388_v4 = vld [vmem:[%s904_s0 + $0x3] ss:$8 sm:$0xf0]  }
   0x3   :  { %v114_v2 = vsel %vm92_vm0, %v393_v1, %v392_v0  ;;  %v93_v5 = vsel %vm92_vm0, %v388_v4, %v387_v3  ;;  %v395_v6 = vld [vmem:[%s904_s0 + $0x87] ss:$8 sm:$0xf]   ;;  %v389_v9 = vld [vmem:[%s904_s0 + $0x83] ss:$8 sm:$0xf]  }
   0x4   :  { %115 = vrot.lane.b32.xlu1 %v114_v2, %s459_s14  ;;  %v396_v7 = vld [vmem:[%s904_s0 + $0x87] ss:$8 sm:$0xf0]   ;;  %94 = vrot.lane.b32.xlu0 %v93_v5, %s459_s14  ;;  %v390_v10 = vld [vmem:[%s904_s0 + $0x83] ss:$8 sm:$0xf0]  }
   0x5   :  { %v125_v8 = vsel %vm92_vm0, %v396_v7, %v395_v6  ;;  %v103_v11 = vsel %vm92_vm0, %v390_v10, %v389_v9  ;;  %v401_v12 = vld [vmem:[%s904_s0 + $0xc3] ss:$8 sm:$0xf]   ;;  %v407_v18 = vld [vmem:[%s904_s0 + $0xc7] ss:$8 sm:$0xf]  }
   0x6   :  { %v402_v13 = vld [vmem:[%s904_s0 + $0xc3] ss:$8 sm:$0xf0]   ;;  %v408_v19 = vld [vmem:[%s904_s0 + $0xc7] ss:$8 sm:$0xf0]  }
   0x7   :  { %v398_v14 = vld [vmem:[%s904_s0 + $0x43] ss:$8 sm:$0xf]   ;;  %v147_v16 = vsel %vm92_vm0, %v402_v13, %v401_v12  ;;  %v404_v20 = vld [vmem:[%s904_s0 + $0x47] ss:$8 sm:$0xf]   ;;  %v169_v22 = vsel %vm92_vm0, %v408_v19, %v407_v18 }
   0x8   :  { %v399_v15 = vld [vmem:[%s904_s0 + $0x43] ss:$8 sm:$0xf0]   ;;  %126 = vrot.lane.b32.xlu1 %v125_v8, %s459_s14  ;;  %104 = vrot.lane.b32.xlu0 %v103_v11, %s459_s14  ;;  %v405_v21 = vld [vmem:[%s904_s0 + $0x47] ss:$8 sm:$0xf0]  }
   0x9   :  { %v136_v17 = vsel %vm92_vm0, %v399_v15, %v398_v14  ;;  %v158_v23 = vsel %vm92_vm0, %v405_v21, %v404_v20  ;;  %v412_v24 = vld [vmem:[%s904_s0 + $0x82] ss:$8 sm:$0xf]   ;;  %v418_v30 = vld [vmem:[%s904_s0 + $0x86] ss:$8 sm:$0xf]  }
   0xa   :  { %v413_v25 = vld [vmem:[%s904_s0 + $0x82] ss:$8 sm:$0xf0]   ;;  %v419_v31 = vld [vmem:[%s904_s0 + $0x86] ss:$8 sm:$0xf0]  }
   0xb   :  { %v410_v26 = vld [vmem:[%s904_s0 + $0x2] ss:$8 sm:$0xf]   ;;  %v190_v28 = vsel %vm92_vm0, %v413_v25, %v412_v24  ;;  %v415_v32 = vld [vmem:[%s904_s0 + $0x6] ss:$8 sm:$0xf]   ;;  %v212_v34 = vsel %vm92_vm0, %v419_v31, %v418_v30 }
   0xc   :  { %148 = vrot.lane.b32.xlu1 %v147_v16, %s459_s14  ;;  %137 = vrot.lane.b32.xlu0 %v136_v17, %s459_s14  ;;  %v411_v27 = vld [vmem:[%s904_s0 + $0x2] ss:$8 sm:$0xf0]   ;;  %v416_v33 = vld [vmem:[%s904_s0 + $0x6] ss:$8 sm:$0xf0]  }
   0xd   :  { %v180_v29 = vsel %vm92_vm0, %v411_v27, %v410_v26  ;;  %v201_v35 = vsel %vm92_vm0, %v416_v33, %v415_v32  ;;  %v424_v36 = vld [vmem:[%s904_s0 + $0xc2] ss:$8 sm:$0xf]   ;;  %v430_v40 = vld [vmem:[%s904_s0 + $0xc6] ss:$8 sm:$0xf]  }
   0xe   :  { %v425_v37 = vld [vmem:[%s904_s0 + $0xc2] ss:$8 sm:$0xf0]   ;;  %v431_v42 = vld [vmem:[%s904_s0 + $0xc6] ss:$8 sm:$0xf0]  }
   0xf   :  { %v421_v38 = vld [vmem:[%s904_s0 + $0x42] ss:$8 sm:$0xf]   ;;  %v234_v41 = vsel %vm92_vm0, %v425_v37, %v424_v36  ;;  %v427_v43 = vld [vmem:[%s904_s0 + $0x46] ss:$8 sm:$0xf]   ;;  %v256_v53 = vsel %vm92_vm0, %v431_v42, %v430_v40 }
  0x10   :  { %170 = vrot.lane.b32.xlu1 %v169_v22, %s459_s14  ;;  %159 = vrot.lane.b32.xlu0 %v158_v23, %s459_s14  ;;  %v422_v39 = vld [vmem:[%s904_s0 + $0x42] ss:$8 sm:$0xf0]   ;;  %v428_v45 = vld [vmem:[%s904_s0 + $0x46] ss:$8 sm:$0xf0]  }
  0x11   :  { %v223_v44 = vsel %vm92_vm0, %v422_v39, %v421_v38  ;;  %v367_v46 = vld [vmem:[%s904_s0 + $0x80] ss:$4 sm:$0xff]   ;;  %v245_v55 = vsel %vm92_vm0, %v428_v45, %v427_v43  ;;  %v435_v56 = vld [vmem:[%s904_s0 + $0x81] ss:$8 sm:$0xf]   ;;  %s461_s25 = smov 32  }
  0x12   :  { %368 = vst.msk [vmem:[%s905_s1 + $0x20] ss:$8 sm:$0x3] %vm3_vm1, %v367_v46   ;;  %369 = vst.msk [vmem:[%s905_s1 + $0x11] ss:$8 sm:$0xc] %vm3_vm1, %v367_v46  }
  0x13   :  { %370 = vst.msk [vmem:[%s905_s1 + $0x2] ss:$8 sm:$0x30] %vm3_vm1, %v367_v46   ;;  %371 = vst.msk [vmem:[%s905_s1 - $0xd] ss:$8 sm:$0xc0] %vm3_vm1, %v367_v46  }
  0x14   :  { %191 = vrot.lane.b32.xlu1 %v190_v28, %s460_s26  ;;  %181 = vrot.lane.b32.xlu0 %v180_v29, %s460_s26  ;;  %v372_v47 = vld [vmem:[%s904_s0 + $0xa0] ss:$4 sm:$0xff]   ;;  %v436_v57 = vld [vmem:[%s904_s0 + $0x81] ss:$8 sm:$0xf0]   ;;  %vm270_vm4 = vcmask 523520  }
  0x15   :  { %v2_v48 = vld [vmem:[%s904_s0] ss:$4 sm:$0xff]   ;;  %373 = vst.msk [vmem:[%s905_s1 + $0x24] ss:$8 sm:$0x3] %vm3_vm1, %v372_v47   ;;  %v277_v60 = vsel %vm92_vm0, %v436_v57, %v435_v56 }
  0x16   :  { %v352_v49 = vld [vmem:[%s904_s0 + $0x20] ss:$4 sm:$0xff]   ;;  %374 = vst.msk [vmem:[%s905_s1 + $0x15] ss:$8 sm:$0xc] %vm3_vm1, %v372_v47  }
  0x17   :  { %375 = vst.msk [vmem:[%s905_s1 + $0x6] ss:$8 sm:$0x30] %vm3_vm1, %v372_v47   ;;  %376 = vst.msk [vmem:[%s905_s1 - $0x9] ss:$8 sm:$0xc0] %vm3_vm1, %v372_v47  }
  0x18   :  { %213 = vrot.lane.b32.xlu1 %v212_v34, %s460_s26  ;;  %202 = vrot.lane.b32.xlu0 %v201_v35, %s460_s26  ;;  %4 = vst.msk [vmem:[%s905_s1] ss:$8 sm:$0x3] %vm3_vm1, %v2_v48   ;;  %349 = vst.msk [vmem:[%s905_s1 - $0xf] ss:$8 sm:$0xc] %vm3_vm1, %v2_v48  }
  0x19   :  { %350 = vst.msk [vmem:[%s905_s1 - $0x1e] ss:$8 sm:$0x30] %vm3_vm1, %v2_v48   ;;  %351 = vst.msk [vmem:[%s905_s1 - $0x2d] ss:$8 sm:$0xc0] %vm3_vm1, %v2_v48  }
  0x1a   :  { %353 = vst.msk [vmem:[%s905_s1 + $0x4] ss:$8 sm:$0x3] %vm3_vm1, %v352_v49   ;;  %354 = vst.msk [vmem:[%s905_s1 - $0xb] ss:$8 sm:$0xc] %vm3_vm1, %v352_v49  }
  0x1b   :  { %355 = vst.msk [vmem:[%s905_s1 - $0x1a] ss:$8 sm:$0x30] %vm3_vm1, %v352_v49   ;;  %356 = vst.msk [vmem:[%s905_s1 - $0x29] ss:$8 sm:$0xc0] %vm3_vm1, %v352_v49  }
  0x1c   :  { %235 = vrot.lane.b32.xlu1 %v234_v41, %s460_s26  ;;  %v377_v50 = vld [vmem:[%s904_s0 + $0xc0] ss:$4 sm:$0xff]   ;;  %224 = vrot.lane.b32.xlu0 %v223_v44, %s460_s26  ;;  %v433_v58 = vld [vmem:[%s904_s0 + $0x1] ss:$8 sm:$0xf]  }
  0x1d   :  { %v382_v51 = vld [vmem:[%s904_s0 + $0xe0] ss:$4 sm:$0xff]   ;;  %378 = vst.msk [vmem:[%s905_s1 + $0x30] ss:$8 sm:$0x3] %vm3_vm1, %v377_v50  }
  0x1e   :  { %v357_v52 = vld [vmem:[%s904_s0 + $0x40] ss:$4 sm:$0xff]   ;;  %379 = vst.msk [vmem:[%s905_s1 + $0x21] ss:$8 sm:$0xc] %vm3_vm1, %v377_v50  }
  0x1f   :  { %380 = vst.msk [vmem:[%s905_s1 + $0x12] ss:$8 sm:$0x30] %vm3_vm1, %v377_v50   ;;  %381 = vst.msk [vmem:[%s905_s1 + $0x3] ss:$8 sm:$0xc0] %vm3_vm1, %v377_v50  }
  0x20   :  { %383 = vst.msk [vmem:[%s905_s1 + $0x34] ss:$8 sm:$0x3] %vm3_vm1, %v382_v51   ;;  %384 = vst.msk [vmem:[%s905_s1 + $0x25] ss:$8 sm:$0xc] %vm3_vm1, %v382_v51   ;;  %257 = vrot.lane.b32.xlu1 %v256_v53, %s460_s26  ;;  %246 = vrot.lane.b32.xlu0 %v245_v55, %s460_s26 }
  0x21   :  { %385 = vst.msk [vmem:[%s905_s1 + $0x16] ss:$8 sm:$0x30] %vm3_vm1, %v382_v51   ;;  %386 = vst.msk [vmem:[%s905_s1 + $0x7] ss:$8 sm:$0xc0] %vm3_vm1, %v382_v51  }
  0x22   :  { %358 = vst.msk [vmem:[%s905_s1 + $0x10] ss:$8 sm:$0x3] %vm3_vm1, %v357_v52   ;;  %359 = vst.msk [vmem:[%s905_s1 + $0x1] ss:$8 sm:$0xc] %vm3_vm1, %v357_v52  }
  0x23   :  { %360 = vst.msk [vmem:[%s905_s1 - $0xe] ss:$8 sm:$0x30] %vm3_vm1, %v357_v52   ;;  %361 = vst.msk [vmem:[%s905_s1 - $0x1d] ss:$8 sm:$0xc0] %vm3_vm1, %v357_v52  }
  0x24   :  { %v362_v54 = vld [vmem:[%s904_s0 + $0x60] ss:$4 sm:$0xff]   ;;  %v434_v59 = vld [vmem:[%s904_s0 + $0x1] ss:$8 sm:$0xf0]   ;;  %278 = vrot.lane.b32.xlu1 %v277_v60, %s461_s25 }
  0x25   :  { %363 = vst.msk [vmem:[%s905_s1 + $0x14] ss:$8 sm:$0x3] %vm3_vm1, %v362_v54   ;;  %364 = vst.msk [vmem:[%s905_s1 + $0x5] ss:$8 sm:$0xc] %vm3_vm1, %v362_v54   ;;  %v267_v61 = vsel %vm92_vm0, %v434_v59, %v433_v58 }
  0x26   :  { %365 = vst.msk [vmem:[%s905_s1 - $0xa] ss:$8 sm:$0x30] %vm3_vm1, %v362_v54   ;;  %366 = vst.msk [vmem:[%s905_s1 - $0x19] ss:$8 sm:$0xc0] %vm3_vm1, %v362_v54   ;;  %268 = vrot.lane.b32.xlu0 %v267_v61, %s461_s25 }
  0x27   :  { %v441_v62 = vld [vmem:[%s904_s0 + $0x85] ss:$8 sm:$0xf]   ;;  %v447_v4 = vld [vmem:[%s904_s0 + $0xc1] ss:$8 sm:$0xf]  }
  0x28   :  { %v442_v63 = vld [vmem:[%s904_s0 + $0x85] ss:$8 sm:$0xf0]   ;;  %v448_v5 = vld [vmem:[%s904_s0 + $0xc1] ss:$8 sm:$0xf0]  }
  0x29   :  { %v438_v0 = vld [vmem:[%s904_s0 + $0x5] ss:$8 sm:$0xf]   ;;  %v299_v2 = vsel %vm92_vm0, %v442_v63, %v441_v62  ;;  %v444_v6 = vld [vmem:[%s904_s0 + $0x41] ss:$8 sm:$0xf]   ;;  %v321_v8 = vsel %vm92_vm0, %v448_v5, %v447_v4 }
  0x2a   :  { %v439_v1 = vld [vmem:[%s904_s0 + $0x5] ss:$8 sm:$0xf0]   ;;  %v445_v7 = vld [vmem:[%s904_s0 + $0x41] ss:$8 sm:$0xf0]   ;;  %300 = vrot.lane.b32.xlu1 %v299_v2, %s461_s25 }
  0x2b   :  { %v288_v3 = vsel %vm92_vm0, %v439_v1, %v438_v0  ;;  %v310_v9 = vsel %vm92_vm0, %v445_v7, %v444_v6  ;;  %v453_v10 = vld [vmem:[%s904_s0 + $0xc5] ss:$8 sm:$0xf]  }
  0x2c   :  { %289 = vrot.lane.b32.xlu0 %v288_v3, %s461_s25  ;;  %v454_v11 = vld [vmem:[%s904_s0 + $0xc5] ss:$8 sm:$0xf0]  }
  0x2d   :  { %v450_v12 = vld [vmem:[%s904_s0 + $0x45] ss:$8 sm:$0xf]   ;;  %v343_v14 = vsel %vm92_vm0, %v454_v11, %v453_v10 }
  0x2e   :  { %v451_v13 = vld [vmem:[%s904_s0 + $0x45] ss:$8 sm:$0xf0]   ;;  %322 = vrot.lane.b32.xlu1 %v321_v8, %s461_s25 }
  0x2f   :  { %v332_v15 = vsel %vm92_vm0, %v451_v13, %v450_v12 }
  0x30   :  { %311 = vrot.lane.b32.xlu0 %v310_v9, %s461_s25 }
  0x32   :  { %344 = vrot.lane.b32.xlu1 %v343_v14, %s461_s25 }
  0x34   :  { %333 = vrot.lane.b32.xlu0 %v332_v15, %s461_s25 }
  0x76   :  { %v116_v16 = vpop.permute.xlu1 %115   ;;  %v95_v17 = vpop.permute.xlu0 %94  }
  0x77   :  { %394 = vst.msk [vmem:[%s905_s1 + $0x8] sm:$0xff] %vm96_vm2, %v116_v16   ;;  %97 = vst.msk [vmem:[%s905_s1] sm:$0xff] %vm96_vm2, %v95_v17  }
  0x7a   :  { %v127_v18 = vpop.permute.xlu1 %126   ;;  %v105_v19 = vpop.permute.xlu0 %104  }
  0x7b   :  { %397 = vst.msk [vmem:[%s905_s1 + $0x28] sm:$0xff] %vm96_vm2, %v127_v18   ;;  %391 = vst.msk [vmem:[%s905_s1 + $0x20] sm:$0xff] %vm96_vm2, %v105_v19  }
  0x7e   :  { %v149_v20 = vpop.permute.xlu1 %148   ;;  %v138_v21 = vpop.permute.xlu0 %137  }
  0x7f   :  { %403 = vst.msk [vmem:[%s905_s1 + $0x30] sm:$0xff] %vm96_vm2, %v149_v20   ;;  %400 = vst.msk [vmem:[%s905_s1 + $0x10] sm:$0xff] %vm96_vm2, %v138_v21  }
  0x82   :  { %v171_v22 = vpop.permute.xlu1 %170   ;;  %v160_v23 = vpop.permute.xlu0 %159  }
  0x83   :  { %409 = vst.msk [vmem:[%s905_s1 + $0x38] sm:$0xff] %vm96_vm2, %v171_v22   ;;  %406 = vst.msk [vmem:[%s905_s1 + $0x18] sm:$0xff] %vm96_vm2, %v160_v23  }
  0x86   :  { %v192_v24 = vpop.permute.xlu1 %191   ;;  %v182_v25 = vpop.permute.xlu0 %181  }
  0x87   :  { %414 = vst.msk [vmem:[%s905_s1 + $0x20] sm:$0xff] %vm183_vm3, %v192_v24   ;;  %184 = vst.msk [vmem:[%s905_s1] sm:$0xff] %vm183_vm3, %v182_v25  }
  0x8a   :  { %v214_v26 = vpop.permute.xlu1 %213   ;;  %v203_v27 = vpop.permute.xlu0 %202  }
  0x8b   :  { %420 = vst.msk [vmem:[%s905_s1 + $0x28] sm:$0xff] %vm183_vm3, %v214_v26   ;;  %417 = vst.msk [vmem:[%s905_s1 + $0x8] sm:$0xff] %vm183_vm3, %v203_v27  }
  0x8e   :  { %v236_v28 = vpop.permute.xlu1 %235   ;;  %v225_v29 = vpop.permute.xlu0 %224  }
  0x8f   :  { %426 = vst.msk [vmem:[%s905_s1 + $0x30] sm:$0xff] %vm183_vm3, %v236_v28   ;;  %423 = vst.msk [vmem:[%s905_s1 + $0x10] sm:$0xff] %vm183_vm3, %v225_v29  }
  0x92   :  { %v258_v30 = vpop.permute.xlu1 %257   ;;  %v247_v31 = vpop.permute.xlu0 %246  }
  0x93   :  { %432 = vst.msk [vmem:[%s905_s1 + $0x38] sm:$0xff] %vm183_vm3, %v258_v30   ;;  %429 = vst.msk [vmem:[%s905_s1 + $0x18] sm:$0xff] %vm183_vm3, %v247_v31  }
  0x96   :  { %v279_v32 = vpop.permute.xlu1 %278  }
  0x97   :  { %437 = vst.msk [vmem:[%s905_s1 + $0x20] sm:$0xff] %vm270_vm4, %v279_v32  }
  0x98   :  { %v269_v33 = vpop.permute.xlu0 %268  }
  0x99   :  { %271 = vst.msk [vmem:[%s905_s1] sm:$0xff] %vm270_vm4, %v269_v33  }
  0x9c   :  { %v301_v34 = vpop.permute.xlu1 %300  }
  0x9d   :  { %443 = vst.msk [vmem:[%s905_s1 + $0x28] sm:$0xff] %vm270_vm4, %v301_v34  }
  0x9e   :  { %v290_v35 = vpop.permute.xlu0 %289  }
  0x9f   :  { %440 = vst.msk [vmem:[%s905_s1 + $0x8] sm:$0xff] %vm270_vm4, %v290_v35  }
  0xa0   :  { %v323_v36 = vpop.permute.xlu1 %322  }
  0xa1   :  { %449 = vst.msk [vmem:[%s905_s1 + $0x30] sm:$0xff] %vm270_vm4, %v323_v36  }
  0xa2   :  { %v312_v37 = vpop.permute.xlu0 %311  }
  0xa3   :  { %446 = vst.msk [vmem:[%s905_s1 + $0x10] sm:$0xff] %vm270_vm4, %v312_v37  }
  0xa4   :  { %v345_v38 = vpop.permute.xlu1 %344  }
  0xa5   :  { %455 = vst.msk [vmem:[%s905_s1 + $0x38] sm:$0xff] %vm270_vm4, %v345_v38  }
  0xa6   :  { %v334_v39 = vpop.permute.xlu0 %333  }
  0xa7   :  { %452 = vst.msk [vmem:[%s905_s1 + $0x18] sm:$0xff] %vm270_vm4, %v334_v39  }

// kernel: seq2seq_forward.1
= control target key start
LH: loop header
LB: loop body
LE: loop exit
PB: predicated region body
PF: predicated region fallthrough
CT: control target
= control target key end

     0   :  { %v11623_v0 = vmov 0.0|0.0   ;;  %vm11618_vm0 = vmmov 0   ;;  %v11621_v4 = vmov 0.0   ;;  %vm11620_vm1 = vcmask 261120   ;;  %s9438_s7 = smov 64   ;;  %s9439_s8 = smov 96   ;;  %s11614_s1 = inlined_call_operand.vmem [shape: f32[168,128], index: 1, kind: input, shape index: {}]   ;;  %s11615_s0 = inlined_call_operand.vmem [shape: f32[64,32], index: 0, kind: input, shape index: {}]   ;;  %s11616_s2 = inlined_call_operand.vmem [shape: f32[32,352], index: 2, kind: input, shape index: {}]   ;;  %s11617_s3 = inlined_call_operand.vmem [shape: f32[8,256], index: 3, kind: output, shape index: {}]  }
   0x1   :  { %8470 = vmatprep.subr.bf16.mxu1 %v11623_v0  ;;  %v14_v1 = vld [vmem:[%s11614_s1] sm:$0xff]  ;;  %v15_v2 = vld [vmem:[%s11614_s1 + $0x8] sm:$0xff]  ;;  %7986 = vmatprep.mubr.msk.f32.mxu1 %vm11618_vm0, %v11621_v4  ;;  %v16_v7 = vld [vmem:[%s11614_s1 + $0x10] sm:$0xff]  ;;  %v55_v16 = vlaneseq  ;;  %s9440_s28 = smov 32  }
   0x2   :  { %v18_v3 = vld [vmem:[%s11614_s1 + $0x20] sm:$0xff]  ;;  %v8462_v5 = vpack.c.bf16 %v15_v2, %v14_v1  ;;  %v19_v6 = vld [vmem:[%s11614_s1 + $0x28] sm:$0xff]  ;;  %v17_v8 = vld [vmem:[%s11614_s1 + $0x18] sm:$0xff] }
   0x3   :  { %v9484_v9 = vpack.c.bf16 %v19_v6, %v18_v3  ;;  %v8466_v10 = vpack.c.bf16 %v17_v8, %v16_v7  ;;  %v20_v11 = vld [vmem:[%s11614_s1 + $0x30] sm:$0xff]  ;;  %v21_v12 = vld [vmem:[%s11614_s1 + $0x38] sm:$0xff]  ;;  %v47_v13 = vld [vmem:[%s11615_s0] sm:$0xff]  ;;  %v9519_v17 = vshrl.u32 %v55_v16, 7 }
   0x4   :  { %8463 = vmatprep.subr.bf16.mxu0 %v8462_v5  ;;  %7966 = vmatprep.mubr.msk.f32.mxu0 %vm11620_vm1, %v47_v13  ;;  %v9497_v14 = vpack.c.bf16 %v21_v12, %v20_v11  ;;  %v48_v15 = vld [vmem:[%s11615_s0 + $0x8] sm:$0xff]  ;;  %v9525_v19 = vld [vmem:[%s11614_s1 + $0xa0] sm:$0xff]  ;;  %v49_v58 = vld [vmem:[%s11615_s0 + $0x10] sm:$0xff] }
   0x5   :  { %8472 = vmatpush3.bf16.msra.mxu1 %v9484_v9  ;;  %8465 = vmatpush3.bf16.msra.mxu0 %v8462_v5  ;;  %v191_v18 = vsub.s32 1, %v9519_v17  ;;  %v57_v26 = vsub.s32 0, %v9519_v17  ;;  %v50_v59 = vld [vmem:[%s11615_s0 + $0x18] sm:$0xff]  ;;  %v51_v60 = vld [vmem:[%s11615_s0 + $0x20] sm:$0xff]  ;;  %v52_v61 = vld [vmem:[%s11615_s0 + $0x28] sm:$0xff] }
   0x6   :  { %8473 = vmatprep.subr.bf16.mxu1 %v11623_v0  ;;  %8467 = vmatprep.subr.bf16.mxu0 %v8466_v10  ;;  %v53_v62 = vld [vmem:[%s11615_s0 + $0x30] sm:$0xff]  ;;  %v54_v63 = vld [vmem:[%s11615_s0 + $0x38] sm:$0xff] }
   0x7   :  { %v9528_v20 = vrot.slane %v9525_v19, %v191_v18  ;;  %v9534_v27 = vrot.slane %v9525_v19, %v57_v26 }
   0x9   :  { %8475 = vmatpush3.bf16.msra.mxu1 %v9497_v14  ;;  %8469 = vmatpush3.bf16.msra.mxu0 %v8466_v10 }
   0xa   :  { %8476 = vmatprep.subr.bf16.mxu1 %v11623_v0  ;;  %8482 = vmatprep.subr.bf16.mxu0 %v11623_v0 }
   0xc   :  { %7987 = vmatmul.mubr.f32.vlgmr.msra.gmra.mrb[0].mxu1 %v11621_v4  ;;  %7967 = vmatmul.mubr.msk.f32.vlgmr.msra.gmra.mrb[0].mxu0 %vm11620_vm1, %v48_v15 }
   0xd   :  { %8478 = vmatpush3.bf16.msra.mxu1 %v9484_v9  ;;  %7997 = vmatprep.mubr.msk.f32.mxu1 %vm11618_vm0, %v11621_v4 }
   0xe   :  { %8479 = vmatprep.subr.bf16.mxu1 %v11623_v0  ;;  %8484 = vmatpush3.bf16.msra.mxu0 %v9484_v9 }
   0xf   :  { %8485 = vmatprep.subr.bf16.mxu0 %v11623_v0  ;;  %7969 = vmatprep.mubr.msk.f32.mxu0 %vm11620_vm1, %v49_v58 }
  0x10   :  { %7970 = vmatmul.mubr.msk.f32.gmra.mrb[2].mxu0 %vm11620_vm1, %v50_v59 }
  0x11   :  { %8481 = vmatpush3.bf16.msra.mxu1 %v9497_v14  ;;  %7972 = vmatprep.mubr.msk.f32.mxu0 %vm11620_vm1, %v51_v60 }
  0x12   :  { %8487 = vmatpush3.bf16.msra.mxu0 %v9497_v14  ;;  %8488 = vmatprep.subr.bf16.mxu1 %v11623_v0 }
  0x13   :  { %8494 = vmatprep.subr.bf16.mxu0 %v11623_v0 }
  0x14   :  { %7973 = vmatmul.mubr.msk.f32.gmra.mrb[4].mxu0 %vm11620_vm1, %v52_v61 }
  0x15   :  { %7975 = vmatprep.mubr.msk.f32.mxu0 %vm11620_vm1, %v53_v62 }
  0x18   :  { %7976 = vmatmul.mubr.msk.f32.gmra.mrb[6].mxu0 %vm11620_vm1, %v54_v63 }
  0x19   :  { %8008 = vmatprep.mubr.msk.f32.mxu0 %vm11618_vm0, %v11621_v4 }
  0xdf   :  { %v262_v21 = vpop.f32.mrb[0].mxu1  ;;  %v7968_v22 = vpop.f32.mrb[0].mxu0 }
  0xe0   :  { %v263_v23 = vadd.f32 %v262_v21, %v9528_v20  ;;  %v7988_v24 = vpop.f32.mrb[1].mxu1  ;;  %v150_v25 = vpop.f32.mrb[1].mxu0  ;;  %v156_v48 = vadd.f32 %v7968_v22, %v9534_v27 }
  0xe1   :  { %v151_v28 = vadd.f32 %v150_v25, %v9534_v27 }
  0xe2   :  { %274 = vrot.lane.b32.xlu0 %v263_v23, %s9438_s7 }
  0xe3   :  { %v266_v29 = vadd.f32 %v263_v23, %v151_v28  ;;  %v7971_v8 = vpop.f32.mrb[2].mxu0 }
  0xe4   :  { %v160_v10 = vpop.f32.mrb[3].mxu0 }
  0xe5   :  { %v6629_v30 = vmul.f32 -1.442695, %v266_v29  ;;  %v161_v24 = vadd.f32 %v160_v10, %v9534_v27 }
  0xe7   :  { %9256 = vpow2.f32 %v6629_v30  ;;  %v9585_v11 = vpop.f32.mrb[4].mxu0 }
  0xe8   :  { %v9587_v12 = vpop.f32.mrb[5].mxu0 }
  0xeb   :  { %v9589_v13 = vpop.f32.mrb[6].mxu0 }
  0xec   :  { %v9591_v15 = vpop.f32.mrb[7].mxu0 }
  0xf1   :  { %v9257_v31 = vpop.eup %9256 }
  0xf2   :  { %v270_v32 = vadd.f32 1.0, %v9257_v31 }
  0xf4   :  { %9258 = vrcp.f32 %v270_v32 }
  0xfe   :  { %v9259_v33 = vpop.eup %9258 }
  0xff   :  { %v284_v39 = vsub.f32 1.0, %v9259_v33  ;;  %v290_v41 = vmul.f32 0.0, %v9259_v33 }
 0x154   :  { %v275_v34 = vpop.permute.xlu0 %274 }
 0x155   :  { %v277_v35 = vmul.f32 %v9259_v33, %v275_v34 }
 0x157   :  { %279 = vrot.lane.b32.xlu0 %v277_v35, %s9438_s7 }
 0x1c9   :  { %v280_v36 = vpop.permute.xlu0 %279 }
 0x1ca   :  { %v282_v37 = vadd.f32 %v280_v36, %v151_v28 }
 0x1cc   :  { %9260 = vtanh.f32 %v282_v37 }
 0x1d6   :  { %v9261_v38 = vpop.eup %9260 }
 0x1d7   :  { %286 = vrot.lane.b32.xlu1 %v9261_v38, %s9439_s8 }
 0x249   :  { %v287_v40 = vpop.permute.xlu1 %286 }
 0x24a   :  { %v289_v42 = vmul.f32 %v287_v40, %v284_v39 }
 0x24c   :  { %v291_v43 = vadd.f32 %v290_v41, %v289_v42 }
 0x24e   :  { %293 = vrot.lane.b32.xlu1 %v291_v43, %s9439_s8 }
 0x2c0   :  { %v9540_v44 = vpop.permute.xlu1 %293 }
 0x2c1   :  { %11803 = vst [vmem:[#allocation2_spill] sm:$0xff] %v9540_v44  ;;  %7998 = vmatmul.mubr.msk.f32.vlgmr.msra.gmra.mrb[2].mxu1 %vm11620_vm1, %v9540_v44 }
 0x2c2   :  { %8490 = vmatpush3.bf16.msra.mxu1 %v9484_v9  ;;  %8019 = vmatprep.mubr.msk.f32.mxu1 %vm11618_vm0, %v11621_v4 }
 0x2c3   :  { %8491 = vmatprep.subr.bf16.mxu1 %v11623_v0 }
 0x2c6   :  { %8493 = vmatpush3.bf16.msra.mxu1 %v9497_v14 }
 0x2c7   :  { %8500 = vmatprep.subr.bf16.mxu1 %v11623_v0 }
 0x394   :  { %v363_v45 = vpop.f32.mrb[2].mxu1 }
 0x395   :  { %v364_v46 = vadd.f32 %v363_v45, %v9528_v20  ;;  %v7999_v47 = vpop.f32.mrb[3].mxu1 }
 0x397   :  { %375 = vrot.lane.b32.xlu0 %v364_v46, %s9438_s7  ;;  %v367_v49 = vadd.f32 %v364_v46, %v156_v48  ;;  %v166_v46 = vadd.f32 %v7971_v8, %v9534_v27 }
 0x399   :  { %v6631_v50 = vmul.f32 -1.442695, %v367_v49 }
 0x39b   :  { %9262 = vpow2.f32 %v6631_v50 }
 0x3a5   :  { %v9263_v51 = vpop.eup %9262 }
 0x3a6   :  { %v371_v52 = vadd.f32 1.0, %v9263_v51 }
 0x3a8   :  { %9264 = vrcp.f32 %v371_v52 }
 0x3b2   :  { %v9265_v53 = vpop.eup %9264 }
 0x3b3   :  { %v385_v2 = vsub.f32 1.0, %v9265_v53  ;;  %v391_v5 = vmul.f32 %v9265_v53, %v291_v43 }
 0x409   :  { %v376_v54 = vpop.permute.xlu0 %375 }
 0x40a   :  { %v378_v55 = vmul.f32 %v9265_v53, %v376_v54 }
 0x40c   :  { %380 = vrot.lane.b32.xlu1 %v378_v55, %s9438_s7 }
 0x47e   :  { %v381_v56 = vpop.permute.xlu1 %380 }
 0x47f   :  { %v383_v57 = vadd.f32 %v381_v56, %v156_v48 }
 0x481   :  { %9266 = vtanh.f32 %v383_v57 }
 0x48b   :  { %v9267_v1 = vpop.eup %9266 }
 0x48c   :  { %387 = vrot.lane.b32.xlu0 %v9267_v1, %s9439_s8 }
 0x4fe   :  { %v388_v3 = vpop.permute.xlu0 %387 }
 0x4ff   :  { %v390_v6 = vmul.f32 %v388_v3, %v385_v2  ;;  %v171_v3 = vadd.f32 %v9587_v12, %v9534_v27 }
 0x501   :  { %v9581_v7 = vadd.f32 %v391_v5, %v390_v6 }
 0x503   :  { %11804 = vst [vmem:[#allocation3_spill] sm:$0xff] %v9581_v7  ;;  %394 = vrot.lane.b32.xlu1 %v9581_v7, %s9439_s8 }
 0x575   :  { %v9593_v18 = vpop.permute.xlu1 %394 }
 0x576   :  { %8009 = vmatmul.mubr.msk.f32.vlgmr.msra.gmra.mrb[8].mxu0 %vm11620_vm1, %v9593_v18 }
 0x577   :  { %8496 = vmatpush3.bf16.msra.mxu0 %v9484_v9  ;;  %8030 = vmatprep.mubr.msk.f32.mxu0 %vm11618_vm0, %v11621_v4 }
 0x578   :  { %8497 = vmatprep.subr.bf16.mxu0 %v11623_v0 }
 0x57b   :  { %8499 = vmatpush3.bf16.msra.mxu0 %v9497_v14 }
 0x57c   :  { %8506 = vmatprep.subr.bf16.mxu0 %v11623_v0 }
 0x649   :  { %v464_v21 = vpop.f32.mrb[8].mxu0 }
 0x64a   :  { %v465_v22 = vadd.f32 %v464_v21, %v9528_v20  ;;  %v8010_v23 = vpop.f32.mrb[9].mxu0 }
 0x64c   :  { %476 = vrot.lane.b32.xlu0 %v465_v22, %s9438_s7  ;;  %v468_v25 = vadd.f32 %v465_v22, %v161_v24 }
 0x64e   :  { %v6633_v26 = vmul.f32 -1.442695, %v468_v25 }
 0x650   :  { %9268 = vpow2.f32 %v6633_v26 }
 0x65a   :  { %v9269_v28 = vpop.eup %9268 }
 0x65b   :  { %v472_v29 = vadd.f32 1.0, %v9269_v28 }
 0x65d   :  { %9270 = vrcp.f32 %v472_v29 }
 0x667   :  { %v9271_v30 = vpop.eup %9270 }
 0x668   :  { %v486_v36 = vsub.f32 1.0, %v9271_v30  ;;  %v492_v38 = vmul.f32 %v9271_v30, %v9581_v7 }
 0x6be   :  { %v477_v31 = vpop.permute.xlu0 %476 }
 0x6bf   :  { %v479_v32 = vmul.f32 %v9271_v30, %v477_v31 }
 0x6c1   :  { %481 = vrot.lane.b32.xlu1 %v479_v32, %s9438_s7 }
 0x733   :  { %v482_v33 = vpop.permute.xlu1 %481 }
 0x734   :  { %v484_v34 = vadd.f32 %v482_v33, %v161_v24 }
 0x736   :  { %9272 = vtanh.f32 %v484_v34 }
 0x740   :  { %v9273_v35 = vpop.eup %9272 }
 0x741   :  { %488 = vrot.lane.b32.xlu0 %v9273_v35, %s9439_s8 }
 0x7b3   :  { %v489_v37 = vpop.permute.xlu0 %488 }
 0x7b4   :  { %v491_v39 = vmul.f32 %v489_v37, %v486_v36  ;;  %v176_v36 = vadd.f32 %v9585_v11, %v9534_v27 }
 0x7b6   :  { %v9609_v40 = vadd.f32 %v492_v38, %v491_v39 }
 0x7b8   :  { %495 = vrot.lane.b32.xlu1 %v9609_v40, %s9439_s8 }
 0x82a   :  { %v9613_v41 = vpop.permute.xlu1 %495 }
 0x82b   :  { %8020 = vmatmul.mubr.msk.f32.vlgmr.msra.gmra.mrb[4].mxu1 %vm11620_vm1, %v9613_v41 }
 0x82c   :  { %8502 = vmatpush3.bf16.msra.mxu1 %v9484_v9  ;;  %8041 = vmatprep.mubr.msk.f32.mxu1 %vm11618_vm0, %v11621_v4 }
 0x82d   :  { %8503 = vmatprep.subr.bf16.mxu1 %v11623_v0 }
 0x830   :  { %8505 = vmatpush3.bf16.msra.mxu1 %v9497_v14 }
 0x831   :  { %8512 = vmatprep.subr.bf16.mxu1 %v11623_v0 }
 0x8fe   :  { %v565_v42 = vpop.f32.mrb[4].mxu1 }
 0x8ff   :  { %v566_v43 = vadd.f32 %v565_v42, %v9528_v20  ;;  %v8021_v45 = vpop.f32.mrb[5].mxu1 }
 0x901   :  { %577 = vrot.lane.b32.xlu0 %v566_v43, %s9438_s7  ;;  %v569_v47 = vadd.f32 %v566_v43, %v166_v46 }
 0x903   :  { %v6635_v48 = vmul.f32 -1.442695, %v569_v47 }
 0x905   :  { %9274 = vpow2.f32 %v6635_v48 }
 0x90f   :  { %v9275_v49 = vpop.eup %9274 }
 0x910   :  { %v573_v50 = vadd.f32 1.0, %v9275_v49 }
 0x912   :  { %9276 = vrcp.f32 %v573_v50 }
 0x91c   :  { %v9277_v51 = vpop.eup %9276 }
 0x91d   :  { %v587_v57 = vsub.f32 1.0, %v9277_v51  ;;  %v593_v59 = vmul.f32 %v9277_v51, %v9609_v40 }
 0x973   :  { %v578_v52 = vpop.permute.xlu0 %577 }
 0x974   :  { %v580_v53 = vmul.f32 %v9277_v51, %v578_v52  ;;  %v30_v52 = vld [vmem:[%s11614_s1 + $0x80] sm:$0xff] }
 0x976   :  { %582 = vrot.lane.b32.xlu1 %v580_v53, %s9438_s7  ;;  %v31_v53 = vld [vmem:[%s11614_s1 + $0x88] sm:$0xff] }
 0x9e8   :  { %v583_v54 = vpop.permute.xlu1 %582 }
 0x9e9   :  { %v585_v55 = vadd.f32 %v583_v54, %v166_v46  ;;  %v9677_v54 = vpack.c.bf16 %v31_v53, %v30_v52 }
 0x9eb   :  { %9278 = vtanh.f32 %v585_v55  ;;  %v32_v55 = vld [vmem:[%s11614_s1 + $0x90] sm:$0xff] }
 0x9f5   :  { %v9279_v56 = vpop.eup %9278 }
 0x9f6   :  { %589 = vrot.lane.b32.xlu0 %v9279_v56, %s9439_s8  ;;  %v33_v56 = vld [vmem:[%s11614_s1 + $0x98] sm:$0xff] }
 0xa68   :  { %v590_v58 = vpop.permute.xlu0 %589 }
 0xa69   :  { %v592_v60 = vmul.f32 %v590_v58, %v587_v57  ;;  %v9690_v58 = vpack.c.bf16 %v33_v56, %v32_v55  ;;  %v35_v56 = vld [vmem:[%s11616_s2] sm:$0xff] }
 0xa6b   :  { %v9629_v61 = vadd.f32 %v593_v59, %v592_v60 }
 0xa6d   :  { %596 = vrot.lane.b32.xlu1 %v9629_v61, %s9439_s8 }
 0xadf   :  { %v9633_v62 = vpop.permute.xlu1 %596 }
 0xae0   :  { %8031 = vmatmul.mubr.msk.f32.vlgmr.msra.gmra.mrb[10].mxu0 %vm11620_vm1, %v9633_v62 }
 0xae1   :  { %8508 = vmatpush3.bf16.msra.mxu0 %v9484_v9  ;;  %8052 = vmatprep.mubr.msk.f32.mxu0 %vm11618_vm0, %v11621_v4 }
 0xae2   :  { %8509 = vmatprep.subr.bf16.mxu0 %v11623_v0 }
 0xae5   :  { %8511 = vmatpush3.bf16.msra.mxu0 %v9497_v14 }
 0xae6   :  { %8518 = vmatprep.subr.bf16.mxu0 %v11623_v0 }
 0xbb3   :  { %v666_v63 = vpop.f32.mrb[10].mxu0 }
 0xbb4   :  { %v667_v1 = vadd.f32 %v666_v63, %v9528_v20  ;;  %v8032_v2 = vpop.f32.mrb[11].mxu0 }
 0xbb6   :  { %678 = vrot.lane.b32.xlu0 %v667_v1, %s9438_s7  ;;  %v670_v5 = vadd.f32 %v667_v1, %v171_v3 }
 0xbb8   :  { %v6637_v6 = vmul.f32 -1.442695, %v670_v5 }
 0xbba   :  { %9280 = vpow2.f32 %v6637_v6 }
 0xbc4   :  { %v9281_v8 = vpop.eup %9280 }
 0xbc5   :  { %v674_v10 = vadd.f32 1.0, %v9281_v8  ;;  %v181_v8 = vadd.f32 %v9591_v15, %v9534_v27 }
 0xbc7   :  { %9282 = vrcp.f32 %v674_v10 }
 0xbd1   :  { %v9283_v21 = vpop.eup %9282 }
 0xbd2   :  { %v688_v28 = vsub.f32 1.0, %v9283_v21  ;;  %v694_v12 = vmul.f32 %v9283_v21, %v9629_v61 }
 0xc28   :  { %v679_v22 = vpop.permute.xlu0 %678 }
 0xc29   :  { %v681_v23 = vmul.f32 %v9283_v21, %v679_v22 }
 0xc2b   :  { %683 = vrot.lane.b32.xlu1 %v681_v23, %s9438_s7 }
 0xc9d   :  { %v684_v24 = vpop.permute.xlu1 %683 }
 0xc9e   :  { %v686_v25 = vadd.f32 %v684_v24, %v171_v3 }
 0xca0   :  { %9284 = vtanh.f32 %v686_v25 }
 0xcaa   :  { %v9285_v26 = vpop.eup %9284 }
 0xcab   :  { %690 = vrot.lane.b32.xlu0 %v9285_v26, %s9439_s8 }
 0xd1d   :  { %v691_v29 = vpop.permute.xlu0 %690 }
 0xd1e   :  { %v693_v30 = vmul.f32 %v691_v29, %v688_v28 }
 0xd20   :  { %v695_v31 = vadd.f32 %v694_v12, %v693_v30 }
 0xd22   :  { %697 = vrot.lane.b32.xlu1 %v695_v31, %s9439_s8 }
 0xd94   :  { %v9651_v32 = vpop.permute.xlu1 %697 }
 0xd95   :  { %11805 = vst [vmem:[#allocation4_spill] sm:$0xff] %v9651_v32  ;;  %8042 = vmatmul.mubr.msk.f32.vlgmr.msra.gmra.mrb[6].mxu1 %vm11620_vm1, %v9651_v32 }
 0xd96   :  { %8514 = vmatpush3.bf16.msra.mxu1 %v9484_v9  ;;  %8063 = vmatprep.mubr.msk.f32.mxu1 %vm11618_vm0, %v11621_v4 }
 0xd97   :  { %8515 = vmatprep.subr.bf16.mxu1 %v11623_v0 }
 0xd9a   :  { %8517 = vmatpush3.bf16.msra.mxu1 %v9497_v14 }
 0xd9b   :  { %8524 = vmatprep.subr.bf16.mxu1 %v11623_v0 }
 0xe68   :  { %v767_v33 = vpop.f32.mrb[6].mxu1 }
 0xe69   :  { %v768_v34 = vadd.f32 %v767_v33, %v9528_v20  ;;  %v8043_v35 = vpop.f32.mrb[7].mxu1 }
 0xe6b   :  { %779 = vrot.lane.b32.xlu0 %v768_v34, %s9438_s7  ;;  %v771_v37 = vadd.f32 %v768_v34, %v176_v36 }
 0xe6d   :  { %v6639_v9 = vmul.f32 -1.442695, %v771_v37 }
 0xe6f   :  { %9286 = vpow2.f32 %v6639_v9 }
 0xe79   :  { %v9287_v38 = vpop.eup %9286 }
 0xe7a   :  { %v775_v39 = vadd.f32 1.0, %v9287_v38 }
 0xe7c   :  { %9288 = vrcp.f32 %v775_v39 }
 0xe86   :  { %v9289_v42 = vpop.eup %9288 }
 0xe87   :  { %v789_v48 = vsub.f32 1.0, %v9289_v42  ;;  %v795_v11 = vmul.f32 %v9289_v42, %v695_v31 }
 0xedd   :  { %v780_v43 = vpop.permute.xlu0 %779 }
 0xede   :  { %v782_v14 = vmul.f32 %v9289_v42, %v780_v43 }
 0xee0   :  { %784 = vrot.lane.b32.xlu1 %v782_v14, %s9438_s7 }
 0xf52   :  { %v785_v45 = vpop.permute.xlu1 %784 }
 0xf53   :  { %v787_v46 = vadd.f32 %v785_v45, %v176_v36 }
 0xf55   :  { %9290 = vtanh.f32 %v787_v46  ;;  %v186_v46 = vadd.f32 %v9589_v13, %v9534_v27  ;;  %v36_v27 = vld [vmem:[%s11616_s2 + $0x8] sm:$0xff]  ;;  %v39_v13 = vld [vmem:[%s11616_s2 + $0x20] sm:$0xff] }
 0xf5f   :  { %v9291_v47 = vpop.eup %9290 }
 0xf60   :  { %791 = vrot.lane.b32.xlu0 %v9291_v47, %s9439_s8 }
 0xfd2   :  { %v792_v49 = vpop.permute.xlu0 %791 }
 0xfd3   :  { %v794_v50 = vmul.f32 %v792_v49, %v789_v48 }
 0xfd5   :  { %v9667_v51 = vadd.f32 %v795_v11, %v794_v50 }
 0xfd7   :  { %11806 = vst [vmem:[#allocation5_spill] sm:$0xff] %v9667_v51  ;;  %798 = vrot.lane.b32.xlu1 %v9667_v51, %s9439_s8 }
0x1049   :  { %v9685_v57 = vpop.permute.xlu1 %798 }
0x104a   :  { %8053 = vmatmul.mubr.msk.f32.vlgmr.msra.gmra.mrb[12].mxu0 %vm11620_vm1, %v9685_v57 }
0x104b   :  { %8520 = vmatpush3.bf16.msra.mxu0 %v9677_v54  ;;  %8074 = vmatprep.mubr.msk.f32.mxu0 %vm11618_vm0, %v11621_v4 }
0x104c   :  { %8521 = vmatprep.subr.bf16.mxu0 %v11623_v0 }
0x104f   :  { %8523 = vmatpush3.bf16.msra.mxu0 %v9690_v58 }
0x1050   :  { %8530 = vmatprep.subr.bf16.mxu0 %v11623_v0 }
0x1052   :  { %8075 = vmatmul.mubr.msk.f32.vlgmr.msra.gmra.mrb[14].mxu0 %vm11620_vm1, %v9540_v44 }
0x1053   :  { %8532 = vmatpush3.bf16.msra.mxu0 %v9677_v54  ;;  %8096 = vmatprep.mubr.msk.f32.mxu0 %vm11618_vm0, %v11621_v4 }
0x1054   :  { %8533 = vmatprep.subr.bf16.mxu0 %v11623_v0 }
0x1057   :  { %8535 = vmatpush3.bf16.msra.mxu0 %v9690_v58 }
0x1058   :  { %8542 = vmatprep.subr.bf16.mxu0 %v11623_v0 }
0x105a   :  { %8097 = vmatmul.mubr.msk.f32.vlgmr.msra.gmra.mrb[16].mxu0 %vm11620_vm1, %v9613_v41 }
0x105b   :  { %8544 = vmatpush3.bf16.msra.mxu0 %v9677_v54  ;;  %8118 = vmatprep.mubr.msk.f32.mxu0 %vm11618_vm0, %v11621_v4 }
0x105c   :  { %8545 = vmatprep.subr.bf16.mxu0 %v11623_v0 }
0x105f   :  { %8547 = vmatpush3.bf16.msra.mxu0 %v9690_v58 }
0x1060   :  { %8554 = vmatprep.subr.bf16.mxu0 %v11623_v0 }
0x1062   :  { %8119 = vmatmul.mubr.msk.f32.vlgmr.msra.gmra.mrb[18].mxu0 %vm11620_vm1, %v9651_v32 }
0x1063   :  { %8556 = vmatpush3.bf16.msra.mxu0 %v9677_v54  ;;  %8140 = vmatprep.mubr.msk.f32.mxu0 %vm11618_vm0, %v11621_v4 }
0x1064   :  { %8557 = vmatprep.subr.bf16.mxu0 %v11623_v0 }
0x1067   :  { %8559 = vmatpush3.bf16.msra.mxu0 %v9690_v58 }
0x111d   :  { %v868_v41 = vpop.f32.mrb[12].mxu0 }
0x111e   :  { %v869_v59 = vadd.f32 %v868_v41, %v9528_v20  ;;  %v8054_v60 = vpop.f32.mrb[13].mxu0  ;;  %v42_v41 = vld [vmem:[%s11616_s2 + $0x38] sm:$0xff] }
0x1120   :  { %880 = vrot.lane.b32.xlu0 %v869_v59, %s9438_s7  ;;  %v872_v10 = vadd.f32 %v869_v59, %v181_v8  ;;  %v45_v59 = vld [vmem:[%s11616_s2 + $0x50] sm:$0xff] }
0x1122   :  { %v6641_v21 = vmul.f32 -1.442695, %v872_v10 }
0x1124   :  { %9292 = vpow2.f32 %v6641_v21 }
0x1125   :  { %v9722_v63 = vpop.f32.mrb[14].mxu0 }
0x1126   :  { %v8076_v1 = vpop.f32.mrb[15].mxu0 }
0x1127   :  { %v9801_v1 = vpack.c.bf16 %v45_v59, %v42_v41 }
0x1129   :  { %11809 = vst [vmem:[#allocation8_spill] sm:$0xff] %v9801_v1 }
0x112d   :  { %v9724_v2 = vpop.f32.mrb[16].mxu0 }
0x112e   :  { %v8098_v3 = vpop.f32.mrb[17].mxu0  ;;  %v9293_v22 = vpop.eup %9292 }
0x112f   :  { %v876_v23 = vadd.f32 1.0, %v9293_v22  ;;  %v41_v3 = vld [vmem:[%s11616_s2 + $0x30] sm:$0xff] }
0x1131   :  { %9294 = vrcp.f32 %v876_v23 }
0x1135   :  { %v9726_v5 = vpop.f32.mrb[18].mxu0 }
0x1136   :  { %v8120_v6 = vpop.f32.mrb[19].mxu0 }
0x1137   :  { %v44_v6 = vld [vmem:[%s11616_s2 + $0x48] sm:$0xff] }
0x113b   :  { %v9295_v24 = vpop.eup %9294 }
0x113c   :  { %v890_v30 = vsub.f32 1.0, %v9295_v24  ;;  %v896_v15 = vmul.f32 %v9295_v24, %v9667_v51 }
0x1192   :  { %v881_v25 = vpop.permute.xlu0 %880 }
0x1193   :  { %v883_v26 = vmul.f32 %v9295_v24, %v881_v25  ;;  %v40_v25 = vld [vmem:[%s11616_s2 + $0x28] sm:$0xff] }
0x1195   :  { %885 = vrot.lane.b32.xlu1 %v883_v26, %s9438_s7 }
0x1207   :  { %v886_v28 = vpop.permute.xlu1 %885 }
0x1208   :  { %v888_v29 = vadd.f32 %v886_v28, %v181_v8  ;;  %v9812_v8 = vpack.c.bf16 %v44_v6, %v41_v3  ;;  %v43_v28 = vld [vmem:[%s11616_s2 + $0x40] sm:$0xff]  ;;  %v11829_v6 = vmov 0 }
0x120a   :  { %9296 = vtanh.f32 %v888_v29  ;;  %11810 = vst [vmem:[#allocation9_spill] sm:$0xff] %v9812_v8 }
0x1214   :  { %v9297_v12 = vpop.eup %9296 }
0x1215   :  { %892 = vrot.lane.b32.xlu0 %v9297_v12, %s9439_s8 }
0x1287   :  { %v893_v31 = vpop.permute.xlu0 %892 }
0x1288   :  { %v895_v33 = vmul.f32 %v893_v31, %v890_v30  ;;  %v9855_v30 = vand.u32 127, %v55_v16  ;;  %v9858_v31 = vadd.s32 128, %v9519_v17  ;;  %v9874_v16 = vadd.s32 16, %v9519_v17 }
0x128a   :  { %v9733_v34 = vadd.f32 %v896_v15, %v895_v33  ;;  %v9861_v15 = vadd.s32 136, %v9519_v17  ;;  %v9864_v33 = vadd.s32 8, %v9519_v17 }
0x128c   :  { %899 = vrot.lane.b32.xlu1 %v9733_v34, %s9439_s8 }
0x12fe   :  { %v900_v35 = vpop.permute.xlu1 %899 }
0x12ff   :  { %8064 = vmatmul.mubr.msk.f32.vlgmr.msra.gmra.mrb[8].mxu1 %vm11620_vm1, %v900_v35  ;;  %8141 = vmatmul.mubr.msk.f32.vlgmr.msra.gmra.mrb[20].mxu0 %vm11620_vm1, %v900_v35  ;;  %v1826_v35 = vshra.s32 %v9519_v17, 5 }
0x1300   :  { %8526 = vmatpush3.bf16.msra.mxu1 %v9677_v54  ;;  %8085 = vmatprep.mubr.msk.f32.mxu1 %vm11618_vm0, %v11621_v4 }
0x1301   :  { %8527 = vmatprep.subr.bf16.mxu1 %v11623_v0  ;;  %2021 = vmatprep.mubr.f32.mxu0 %v11621_v4  ;;  %vm9883_vm2 = vcmp.eq.s32.totalorder %v1826_v35, %v9855_v30  ;;  %v10005_v35 = vadd.s32 72, %v9519_v17 }
0x1304   :  { %8529 = vmatpush3.bf16.msra.mxu1 %v9690_v58 }
0x1305   :  { %8536 = vmatprep.subr.bf16.mxu1 %v11623_v0 }
0x1307   :  { %8086 = vmatmul.mubr.msk.f32.vlgmr.msra.gmra.mrb[10].mxu1 %vm11620_vm1, %v9593_v18 }
0x1308   :  { %8538 = vmatpush3.bf16.msra.mxu1 %v9677_v54  ;;  %8107 = vmatprep.mubr.msk.f32.mxu1 %vm11618_vm0, %v11621_v4 }
0x1309   :  { %8539 = vmatprep.subr.bf16.mxu1 %v11623_v0 }
0x130c   :  { %8541 = vmatpush3.bf16.msra.mxu1 %v9690_v58 }
0x130d   :  { %8548 = vmatprep.subr.bf16.mxu1 %v11623_v0 }
0x130f   :  { %8108 = vmatmul.mubr.msk.f32.vlgmr.msra.gmra.mrb[12].mxu1 %vm11620_vm1, %v9633_v62 }
0x1310   :  { %8550 = vmatpush3.bf16.msra.mxu1 %v9677_v54  ;;  %8129 = vmatprep.mubr.msk.f32.mxu1 %vm11618_vm0, %v11621_v4 }
0x1311   :  { %8551 = vmatprep.subr.bf16.mxu1 %v11623_v0 }
0x1314   :  { %8553 = vmatpush3.bf16.msra.mxu1 %v9690_v58 }
0x1315   :  { %8560 = vmatprep.subr.bf16.mxu1 %v11623_v0 }
0x1317   :  { %8130 = vmatmul.mubr.msk.f32.vlgmr.msra.gmra.mrb[14].mxu1 %vm11620_vm1, %v9685_v57  ;;  %v9788_v57 = vpack.c.bf16 %v39_v13, %v36_v27  ;;  %v9939_v27 = vadd.s32 184, %v9519_v17  ;;  %v11826_v13 = vmov 0 }
0x1318   :  { %8562 = vmatpush3.bf16.msra.mxu1 %v9677_v54  ;;  %8151 = vmatprep.mubr.msk.f32.mxu1 %vm11618_vm0, %v11621_v4 }
0x1319   :  { %8563 = vmatprep.subr.bf16.mxu1 %v11623_v0  ;;  %11807 = vst [vmem:[#allocation6_spill] sm:$0xff] %v9788_v57  ;;  %8567 = vmatprep.subr.bf16.mxu0 %v9788_v57  ;;  %v1849_v3 = vshra.s32 %v9939_v27, 5 }
0x131c   :  { %8565 = vmatpush3.bf16.msra.mxu1 %v9690_v58  ;;  %v38_v58 = vld [vmem:[%s11616_s2 + $0x18] sm:$0xff] }
0x131d   :  { %8574 = vmatprep.subr.bf16.mxu1 %v11623_v0  ;;  %v9799_v60 = vpack.c.bf16 %v38_v58, %v35_v56 }
0x131f   :  { %11808 = vst [vmem:[#allocation7_spill] sm:$0xff] %v9799_v60  ;;  %8569 = vmatpush1.bf16.msra.mxu0 %v9799_v60 }
0x1320   :  { %8571 = vmatprep.subr.bf16.mxu0 %v9801_v1 }
0x1323   :  { %8573 = vmatpush1.bf16.msra.mxu0 %v9812_v8 }
0x13d2   :  { %v969_v18 = vpop.f32.mrb[8].mxu1  ;;  %v1508_v62 = vpop.f32.mrb[20].mxu0 }
0x13d3   :  { %v970_v36 = vadd.f32 %v969_v18, %v9528_v20  ;;  %v8065_v37 = vpop.f32.mrb[9].mxu1  ;;  %v8142_v9 = vpop.f32.mrb[21].mxu0  ;;  %v9868_v18 = vadd.s32 144, %v9519_v17 }
0x13d4   :  { %v1843_v37 = vshra.s32 %v9861_v15, 5  ;;  %v1827_v9 = vshra.s32 %v9864_v33, 5 }
0x13d5   :  { %981 = vrot.lane.b32.xlu0 %v970_v36, %s9438_s7  ;;  %v973_v47 = vadd.f32 %v970_v36, %v186_v46  ;;  %v1842_v36 = vshra.s32 %v9858_v31, 5 }
0x13d6   :  { %vm1875_vm4 = vcmp.eq.s32.totalorder %v1843_v37, %v9855_v30  ;;  %vm1859_vm5 = vcmp.eq.s32.totalorder %v1827_v9, %v9855_v30 }
0x13d7   :  { %v6643_v48 = vmul.f32 -1.442695, %v973_v47  ;;  %vm1874_vm3 = vcmp.eq.s32.totalorder %v1842_v36, %v9855_v30  ;;  %vm9913_vm10 = vmpackc.low %vm1859_vm5, %vm9883_vm2  ;;  %v11838_v36 = vmov 0  ;;  %v10030_v47 = vadd.s32 88, %v9519_v17 }
0x13d8   :  { %vm9894_vm6 = vmpackc.low %vm1875_vm4, %vm1874_vm3 }
0x13d9   :  { %9298 = vpow2.f32 %v6643_v48  ;;  %v9906_v48 = vadd.s32 160, %v9519_v17 }
0x13da   :  { %v1158_v38 = vpop.f32.mrb[10].mxu1 }
0x13db   :  { %v8087_v39 = vpop.f32.mrb[11].mxu1 }
0x13e2   :  { %v1298_v42 = vpop.f32.mrb[12].mxu1 }
0x13e3   :  { %v8109_v43 = vpop.f32.mrb[13].mxu1  ;;  %v9299_v49 = vpop.eup %9298 }
0x13e4   :  { %v977_v11 = vadd.f32 1.0, %v9299_v49  ;;  %v11625_v49 = vmov 1.0|1.0  }
0x13e5   :  { %8581 = vmatprep.subr.msk.bf16.mxu0 %vm9894_vm6, %v11625_v49 }
0x13e6   :  { %9300 = vrcp.f32 %v977_v11  ;;  %v11820_v11 = vmov 0 }
0x13e7   :  { %v11821_v11 = vsel %vm9913_vm10, 4294967295, %v11820_v11 }
0x13e8   :  { %11822 = vst [vmem:[#allocation13_spill] sm:$0xff] %v11821_v11 }
0x13ea   :  { %v1438_v14 = vpop.f32.mrb[14].mxu1 }
0x13eb   :  { %v8131_v45 = vpop.f32.mrb[15].mxu1 }
0x13f0   :  { %v9301_v20 = vpop.eup %9300 }
0x13f1   :  { %v991_v10 = vsub.f32 1.0, %v9301_v20  ;;  %v997_v22 = vmul.f32 %v9301_v20, %v9733_v34 }
0x1447   :  { %v982_v50 = vpop.permute.xlu0 %981 }
0x1448   :  { %v984_v52 = vmul.f32 %v9301_v20, %v982_v50  ;;  %v9919_v20 = vadd.s32 168, %v9519_v17  ;;  %v9922_v50 = vadd.s32 32, %v9519_v17 }
0x144a   :  { %986 = vrot.lane.b32.xlu1 %v984_v52, %s9438_s7  ;;  %v9925_v52 = vadd.s32 40, %v9519_v17  ;;  %v1847_v56 = vshra.s32 %v9919_v20, 5  ;;  %v1830_v58 = vshra.s32 %v9922_v50, 5 }
0x144c   :  { %v1831_v41 = vshra.s32 %v9925_v52, 5  ;;  %vm1879_vm15 = vcmp.eq.s32.totalorder %v1847_v56, %v9855_v30  ;;  %vm1862_vm2 = vcmp.eq.s32.totalorder %v1830_v58, %v9855_v30 }
0x144e   :  { %vm1863_vm3 = vcmp.eq.s32.totalorder %v1831_v41, %v9855_v30  ;;  %v11844_v41 = vmov 0 }
0x14bc   :  { %v987_v53 = vpop.permute.xlu1 %986 }
0x14bd   :  { %v989_v54 = vadd.f32 %v987_v53, %v186_v46  ;;  %v11815_v46 = vmov 0  ;;  %v11823_v53 = vmov 0 }
0x14be   :  { %v11816_v46 = vsel %vm9894_vm6, 4294967295, %v11815_v46 }
0x14bf   :  { %9302 = vtanh.f32 %v989_v54  ;;  %11817 = vst [vmem:[#allocation12_spill] sm:$0xff] %v11816_v46  ;;  %v1846_v54 = vshra.s32 %v9906_v48, 5 }
0x14c1   :  { %vm1878_vm14 = vcmp.eq.s32.totalorder %v1846_v54, %v9855_v30  ;;  %v11841_v54 = vmov 0 }
0x14c2   :  { %vm9962_vm4 = vmpackc.low %vm1879_vm15, %vm1878_vm14 }
0x14c3   :  { %v11830_v6 = vsel %vm9962_vm4, 4294967295, %v11829_v6 }
0x14c4   :  { %11831 = vst [vmem:[#allocation16_spill] sm:$0xff] %v11830_v6 }
0x14c9   :  { %v9303_v55 = vpop.eup %9302 }
0x14ca   :  { %993 = vrot.lane.b32.xlu0 %v9303_v55, %s9439_s8  ;;  %v9936_v55 = vadd.s32 176, %v9519_v17 }
0x14cc   :  { %v1848_v59 = vshra.s32 %v9936_v55, 5 }
0x14ce   :  { %1617 = vrot.lane.b32.xlu0 %v9525_v19, %s9440_s28  ;;  %vm1880_vm5 = vcmp.eq.s32.totalorder %v1848_v59, %v9855_v30 }
0x14d2   :  { %1599 = vrot.lane.b32.xlu0 %v1438_v14, %s9440_s28  ;;  %v1828_v14 = vshra.s32 %v9874_v16, 5 }
0x14d4   :  { %vm9901_vm9 = vcmp.eq.s32.totalorder %v1828_v14, %v9855_v30  ;;  %v10022_v14 = vadd.s32 216, %v9519_v17 }
0x14d6   :  { %1587 = vrot.lane.b32.xlu0 %v1158_v38, %s9440_s28  ;;  %v9880_v38 = vadd.s32 24, %v9519_v17  ;;  %v1853_v58 = vshra.s32 %v10022_v14, 5 }
0x14d8   :  { %v1829_v45 = vshra.s32 %v9880_v38, 5 }
0x14da   :  { %1591 = vrot.lane.b32.xlu0 %v9724_v2, %s9438_s7  ;;  %v37_v2 = vld [vmem:[%s11616_s2 + $0x10] sm:$0xff]  ;;  %vm1861_vm11 = vcmp.eq.s32.totalorder %v1829_v45, %v9855_v30  ;;  %v10027_v45 = vadd.s32 80, %v9519_v17 }
0x14db   :  { %v9835_v26 = vpack.c.bf16 %v40_v25, %v37_v2  ;;  %vm9946_vm13 = vmpackc.low %vm1861_vm11, %vm9901_vm9 }
0x14dc   :  { %v11827_v13 = vsel %vm9946_vm13, 4294967295, %v11826_v13  ;;  %v1836_v59 = vshra.s32 %v10027_v45, 5 }
0x14dd   :  { %11811 = vst [vmem:[#allocation10_spill] sm:$0xff] %v9835_v26  ;;  %11828 = vst [vmem:[#allocation15_spill] sm:$0xff] %v11827_v13 }
0x14de   :  { %1595 = vrot.lane.b32.xlu0 %v1298_v42, %s9439_s8  ;;  %v1844_v42 = vshra.s32 %v9868_v18, 5 }
0x14e0   :  { %vm1876_vm7 = vcmp.eq.s32.totalorder %v1844_v42, %v9855_v30  ;;  %v1835_v42 = vshra.s32 %v10005_v35, 5 }
0x153c   :  { %v994_v21 = vpop.permute.xlu0 %993 }
0x153d   :  { %v996_v23 = vmul.f32 %v994_v21, %v991_v10  ;;  %v11832_v10 = vmov 0  ;;  %v11835_v21 = vmov 0 }
0x153f   :  { %v9820_v24 = vadd.f32 %v997_v22, %v996_v23  ;;  %v9986_v22 = vadd.s32 48, %v9519_v17  ;;  %v9989_v23 = vadd.s32 56, %v9519_v17 }
0x1541   :  { %1512 = vrot.lane.b32.xlu1 %v9820_v24, %s9439_s8  ;;  %v1832_v2 = vshra.s32 %v9986_v22, 5  ;;  %v1833_v25 = vshra.s32 %v9989_v23, 5 }
0x1543   :  { %vm1864_vm11 = vcmp.eq.s32.totalorder %v1832_v2, %v9855_v30  ;;  %vm1865_vm14 = vcmp.eq.s32.totalorder %v1833_v25, %v9855_v30  ;;  %v10050_v2 = vadd.s32 224, %v9519_v17  ;;  %v10053_v25 = vadd.s32 232, %v9519_v17 }
0x1544   :  { %vm10007_vm15 = vmpackc.low %vm1865_vm14, %vm1864_vm11  ;;  %vm1867_vm11 = vcmp.eq.s32.totalorder %v1835_v42, %v9855_v30 }
0x1545   :  { %1620 = vrot.lane.b32.xlu1 %v9525_v19, %s9438_s7  ;;  %v11839_v36 = vsel %vm10007_vm15, 4294967295, %v11838_v36  ;;  %v1854_v42 = vshra.s32 %v10050_v2, 5 }
0x1546   :  { %11840 = vst [vmem:[#allocation19_spill] sm:$0xff] %v11839_v36  ;;  %v11860_v36 = vmov 0 }
0x1549   :  { %1623 = vrot.lane.b32.xlu1 %v9525_v19, %s9439_s8  ;;  %v46_v19 = vld [vmem:[%s11616_s2 + $0x58] sm:$0xff] }
0x154a   :  { %v9846_v12 = vpack.c.bf16 %v46_v19, %v43_v28  ;;  %v9994_v28 = vadd.s32 192, %v9519_v17  ;;  %v9997_v19 = vadd.s32 200, %v9519_v17 }
0x154c   :  { %11812 = vst [vmem:[#allocation11_spill] sm:$0xff] %v9846_v12  ;;  %v1850_v37 = vshra.s32 %v9994_v28, 5  ;;  %v1851_v9 = vshra.s32 %v9997_v19, 5 }
0x154d   :  { %1603 = vrot.lane.b32.xlu1 %v1508_v62, %s9438_s7  ;;  %v9871_v62 = vadd.s32 152, %v9519_v17 }
0x154f   :  { %v1845_v43 = vshra.s32 %v9871_v62, 5 }
0x1551   :  { %vm1877_vm8 = vcmp.eq.s32.totalorder %v1845_v43, %v9855_v30  ;;  %v10019_v43 = vadd.s32 208, %v9519_v17 }
0x1552   :  { %vm9930_vm12 = vmpackc.low %vm1877_vm8, %vm1876_vm7  ;;  %vm1881_vm7 = vcmp.eq.s32.totalorder %v1849_v3, %v9855_v30  ;;  %v1837_v3 = vshra.s32 %v10030_v47, 5 }
0x1553   :  { %v11824_v53 = vsel %vm9930_vm12, 4294967295, %v11823_v53  ;;  %vm9971_vm8 = vmpackc.low %vm1863_vm3, %vm1862_vm2  ;;  %vm1882_vm2 = vcmp.eq.s32.totalorder %v1850_v37, %v9855_v30  ;;  %vm1883_vm3 = vcmp.eq.s32.totalorder %v1851_v9, %v9855_v30  ;;  %v1852_v56 = vshra.s32 %v10019_v43, 5 }
0x1554   :  { %11825 = vst [vmem:[#allocation14_spill] sm:$0xff] %v11824_v53  ;;  %v11833_v10 = vsel %vm9971_vm8, 4294967295, %v11832_v10  ;;  %vm9975_vm9 = vmpackc.low %vm1881_vm7, %vm1880_vm5  ;;  %v10061_v37 = vadd.s32 96, %v9519_v17  ;;  %v10064_v9 = vadd.s32 104, %v9519_v17 }
0x1555   :  { %11834 = vst [vmem:[#allocation17_spill] sm:$0xff] %v11833_v10  ;;  %v11836_v21 = vsel %vm9975_vm9, 4294967295, %v11835_v21  ;;  %vm10032_vm5 = vmpackc.low %vm1883_vm3, %vm1882_vm2  ;;  %vm1884_vm2 = vcmp.eq.s32.totalorder %v1852_v56, %v9855_v30  ;;  %vm1885_vm3 = vcmp.eq.s32.totalorder %v1853_v58, %v9855_v30  ;;  %v1855_v56 = vshra.s32 %v10053_v25, 5 }
0x1556   :  { %11837 = vst [vmem:[#allocation18_spill] sm:$0xff] %v11836_v21  ;;  %v11842_v54 = vsel %vm10032_vm5, 4294967295, %v11841_v54  ;;  %v11850_v58 = vmov 0 }
0x1557   :  { %11843 = vst [vmem:[#allocation20_spill] sm:$0xff] %v11842_v54 }
0x15b3   :  { %v1513_v29 = vpop.permute.xlu1 %1512 }
0x15b4   :  { %8152 = vmatmul.mubr.msk.f32.vlgmr.msra.gmra.mrb[16].mxu1 %vm11620_vm1, %v1513_v29  ;;  %6719 = vmatmul.mubr.msk.f32.vlgmr.msra.gmra.mrb[22].mxu0 %vm11620_vm1, %v1513_v29 }
0x15b5   :  { %8576 = vmatpush3.bf16.msra.mxu1 %v9835_v26  ;;  %8162 = vmatprep.mubr.msk.f32.mxu1 %vm11618_vm0, %v11621_v4  ;;  %vm1869_vm0 = vcmp.eq.s32.totalorder %v1837_v3, %v9855_v30  ;;  %v10087_v3 = vadd.s32 248, %v9519_v17  ;;  %v11853_v26 = vmov 1.0|1.0  }
0x15b6   :  { %8577 = vmatprep.subr.bf16.mxu1 %v11623_v0  ;;  %8583 = vmatpush3.bf16.msk.msra.mxu0 %vm9913_vm10, %v11625_v49  ;;  %v1839_v0 = vshra.s32 %v10064_v9, 5 }
0x15b7   :  { %8585 = vmatprep.subr.msk.bf16.mxu0 %vm9930_vm12, %v11625_v49  ;;  %v1621_v10 = vpop.permute.xlu1 %1620 }
0x15b9   :  { %8579 = vmatpush3.bf16.msra.mxu1 %v9846_v12  ;;  %v10095_v12 = vadd.s32 120, %v9519_v17 }
0x15ba   :  { %8587 = vmatpush3.bf16.msk.msra.mxu0 %vm9946_vm13, %v11625_v49 }
0x15bb   :  { %8589 = vmatprep.subr.msk.bf16.mxu0 %vm9962_vm4, %v11625_v49  ;;  %v1841_v54 = vshra.s32 %v10095_v12, 5  ;;  %v1624_v53 = vpop.permute.xlu1 %1623 }
0x15bc   :  { %8163 = vmatmul.mubr.msk.f32.vlgmr.msra.gmra.mrb[18].mxu1 %vm11620_vm1, %v1513_v29  ;;  %v10002_v29 = vadd.s32 64, %v9519_v17 }
0x15bd   :  { %2254 = vmatprep.mubr.f32.mxu1 %v11621_v4  ;;  %v1838_v4 = vshra.s32 %v10061_v37, 5 }
0x15be   :  { %8591 = vmatpush3.bf16.msk.msra.mxu0 %vm9971_vm8, %v11625_v49  ;;  %v1834_v39 = vshra.s32 %v10002_v29, 5 }
0x15bf   :  { %8593 = vmatprep.subr.msk.bf16.mxu0 %vm9975_vm9, %v11625_v49  ;;  %v1604_v60 = vpop.permute.xlu1 %1603  ;;  %vm11885_vm9 = vcmask 64512  }
0x15c0   :  { %vm1866_vm7 = vcmp.eq.s32.totalorder %v1834_v39, %v9855_v30  ;;  %v11847_v39 = vmov 0 }
0x15c1   :  { %vm10043_vm14 = vmpackc.low %vm1867_vm11, %vm1866_vm7  ;;  %vm1868_vm11 = vcmp.eq.s32.totalorder %v1836_v59, %v9855_v30  ;;  %v10084_v59 = vadd.s32 240, %v9519_v17 }
0x15c2   :  { %8595 = vmatpush3.bf16.msk.msra.mxu0 %vm10007_vm15, %v11625_v49  ;;  %v11845_v41 = vsel %vm10043_vm14, 4294967295, %v11844_v41  ;;  %vm10066_vm7 = vmpackc.low %vm1885_vm3, %vm1884_vm2  ;;  %vm1886_vm2 = vcmp.eq.s32.totalorder %v1854_v42, %v9855_v30  ;;  %vm1887_vm3 = vcmp.eq.s32.totalorder %v1855_v56, %v9855_v30  ;;  %v1857_v56 = vshra.s32 %v10087_v3, 5 }
0x15c3   :  { %8597 = vmatprep.subr.msk.bf16.mxu0 %vm10032_vm5, %v11625_v49  ;;  %11846 = vst [vmem:[#allocation21_spill] sm:$0xff] %v11845_v41  ;;  %v11848_v39 = vsel %vm10066_vm7, 4294967295, %v11847_v39  ;;  %vm10077_vm1 = vmpackc.low %vm1869_vm0, %vm1868_vm11  ;;  %vm1870_vm11 = vcmp.eq.s32.totalorder %v1838_v4, %v9855_v30  ;;  %v1856_v42 = vshra.s32 %v10084_v59, 5  ;;  %v11857_v41 = vmov 0 }
0x15c4   :  { %11849 = vst [vmem:[#allocation22_spill] sm:$0xff] %v11848_v39  ;;  %v11851_v58 = vsel %vm10077_vm1, 4294967295, %v11850_v58  ;;  %vm10100_vm0 = vmpackc.low %vm1887_vm3, %vm1886_vm2  ;;  %v11854_v39 = vmov 0  ;;  %vm1889_vm3 = vcmp.eq.s32.totalorder %v1857_v56, %v9855_v30  ;;  %v1618_v56 = vpop.permute.xlu0 %1617 }
0x15c5   :  { %11852 = vst [vmem:[#allocation23_spill] sm:$0xff] %v11851_v58  ;;  %v11855_v39 = vsel %vm10100_vm0, 4294967295, %v11854_v39  ;;  %vm1888_vm2 = vcmp.eq.s32.totalorder %v1856_v42, %v9855_v30  ;;  %v11863_v42 = vmov 0 }
0x15c6   :  { %8599 = vmatpush3.bf16.msk.msra.mxu0 %vm10043_vm14, %v11625_v49  ;;  %11856 = vst [vmem:[#allocation24_spill] sm:$0xff] %v11855_v39 }
0x15c7   :  { %8601 = vmatprep.subr.msk.bf16.mxu0 %vm10066_vm7, %v11625_v49  ;;  %v10092_v49 = vadd.s32 112, %v9519_v17  ;;  %vm1871_vm7 = vcmp.eq.s32.totalorder %v1839_v0, %v9855_v30 }
0x15c8   :  { %vm10111_vm14 = vmpackc.low %vm1871_vm7, %vm1870_vm11  ;;  %vm1873_vm7 = vcmp.eq.s32.totalorder %v1841_v54, %v9855_v30  ;;  %v11866_v54 = vmov 0.0|0.0  }
0x15c9   :  { %v11858_v41 = vsel %vm10111_vm14, 4294967295, %v11857_v41  ;;  %v1840_v58 = vshra.s32 %v10092_v49, 5 }
0x15ca   :  { %8603 = vmatpush3.bf16.msk.msra.mxu0 %vm10077_vm1, %v11853_v26  ;;  %11859 = vst [vmem:[#allocation25_spill] sm:$0xff] %v11858_v41  ;;  %vm10119_vm1 = vmpackc.low %vm1889_vm3, %vm1888_vm2  ;;  %vm11684_vm2 = vcmask 523264   ;;  %vm11683_vm3 = vcmask 785408  }
0x15cb   :  { %8605 = vmatprep.subr.msk.bf16.mxu0 %vm10100_vm0, %v11853_v26  ;;  %v11861_v36 = vsel %vm10119_vm1, 4294967295, %v11860_v36  ;;  %vm1872_vm0 = vcmp.eq.s32.totalorder %v1840_v58, %v9855_v30 }
0x15cc   :  { %11862 = vst [vmem:[#allocation26_spill] sm:$0xff] %v11861_v36  ;;  %vm10132_vm11 = vmpackc.low %vm1873_vm7, %vm1872_vm0  ;;  %v10143_v36 = vld [vmem:[%s11614_s1 + $0xa0] sm:$0xff]  ;;  %vm11867_vm0 = vcmask 261120  }
0x15cd   :  { %v11864_v42 = vsel %vm10132_vm11, 4294967295, %v11863_v42  ;;  %v1626_v6 = vsel %vm11867_vm0, %v10143_v36, %v1618_v56  ;;  %vm11868_vm7 = vmmov %vm11867_vm0 }
0x15ce   :  { %8607 = vmatpush3.bf16.msk.msra.mxu0 %vm10111_vm14, %v11853_v26  ;;  %11865 = vst [vmem:[#allocation27_spill] sm:$0xff] %v11864_v42  ;;  %v1627_v42 = vsel %vm11684_vm2, %v1626_v6, %v1621_v10 }
0x15cf   :  { %8609 = vmatprep.subr.msk.bf16.mxu0 %vm10119_vm1, %v11853_v26  ;;  %v1628_v11 = vsel %vm11683_vm3, %v1627_v42, %v1624_v53 }
0x15d2   :  { %8611 = vmatpush3.bf16.msk.msra.mxu0 %vm10132_vm11, %v11853_v26 }
0x15d3   :  { %8644 = vmatprep.subr.bf16.mxu0 %v11866_v54 }
0x1687   :  { %v1582_v0 = vpop.f32.mrb[16].mxu1  ;;  %v2023_v4 = vpop.f32.mrb[22].mxu0 }
0x1688   :  { %v2025_v39 = vpop.f32.mrb[23].mxu0  ;;  %1607 = vrot.lane.b32.xlu1 %v1582_v0, %s9439_s8  ;;  %v8153_v21 = vpop.f32.mrb[17].mxu1 }
0x1689   :  { %v1600_v0 = vpop.permute.xlu0 %1599 }
0x168a   :  { %v1613_v6 = vsel %vm11867_vm0, %v9726_v5, %v1600_v0 }
0x168b   :  { %v1614_v32 = vsel %vm11684_vm2, %v1613_v6, %v1604_v60 }
0x168d   :  { %v1588_v41 = vpop.permute.xlu0 %1587 }
0x168e   :  { %v1610_v1 = vsel %vm11868_vm7, %v9722_v63, %v1588_v41  ;;  %vm11871_vm7 = vmmov %vm11867_vm0  ;;  %vm11874_vm0 = vmmov 0  }
0x168f   :  { %v2094_v58 = vpop.f32.mrb[18].mxu1 }
0x1690   :  { %v8164_v21 = vpop.f32.mrb[19].mxu1 }
0x1691   :  { %v1592_v13 = vpop.permute.xlu0 %1591  ;;  %v10149_v21 = vsub.s32 4, %v9519_v17 }
0x1692   :  { %v1611_v57 = vsel %vm11684_vm2, %v1610_v1, %v1592_v13  ;;  %v1647_v1 = vsel %vm11871_vm7, %v1621_v10, %v1624_v53  ;;  %vm11685_vm7 = vcmask 64512  }
0x1693   :  { %v1632_v8 = vrot.slane %v1628_v11, %v10149_v21  ;;  %v1648_v5 = vsel %vm11684_vm2, %v1647_v1, %v10143_v36 }
0x1695   :  { %v1596_v46 = vpop.permute.xlu0 %1595 }
0x1696   :  { %v1612_v44 = vsel %vm11683_vm3, %v1611_v57, %v1596_v46 }
0x1697   :  { %v10159_v7 = vadd.f32 %v1632_v8, %v1612_v44  ;;  %v1649_v44 = vsel %vm11683_vm3, %v1648_v5, %v1618_v56  ;;  %v11875_v5 = vmov 0 }
0x1698   :  { %v10172_v57 = vrot.slane %v1649_v44, %v10149_v21  ;;  %v11728_v44 = vmov 1.0  }
0x1699   :  { %11869 = vst [vmem:[#allocation28_spill] sm:$0xff] %v10159_v7  ;;  %v2099_v42 = vadd.f32 %v2023_v4, %v10159_v7 }
0x169a   :  { %11872 = vst [vmem:[#allocation30_spill] sm:$0xff] %v10172_v57 }
0x169b   :  { %9304 = vtanh.f32 %v2099_v42 }
0x16a5   :  { %v9305_v60 = vpop.eup %9304 }
0x16fa   :  { %v1608_v51 = vpop.permute.xlu1 %1607 }
0x16fb   :  { %v1615_v11 = vsel %vm11683_vm3, %v1614_v32, %v1608_v51  ;;  %v2103_v51 = vmul.f32 %v9305_v60, %v10172_v57  ;;  %v11877_v60 = vmov 0 }
0x16fc   :  { %v10164_v54 = vadd.f32 %v1632_v8, %v1615_v11  ;;  %v11873_v8 = vmov 0.0  }
0x16fe   :  { %11870 = vst [vmem:[#allocation29_spill] sm:$0xff] %v10164_v54  ;;  %v2100_v63 = vadd.f32 %v2025_v39, %v10164_v54  ;;  %v1641_v39 = vsub.s32 3, %v9519_v17 }
0x1700   :  { %9306 = vtanh.f32 %v2100_v63  ;;  %v10183_v4 = vrot.slane %v10143_v36, %v1641_v39 }
0x1702   :  { %v10188_v56 = vadd.f32 %v2094_v58, %v10183_v4  ;;  %v1659_v58 = vshra.s32 %v9855_v30, 5 }
0x1704   :  { %vm10208_vm2 = vcmp.eq.s32.totalorder %v1659_v58, %v9519_v17  ;;  %v11902_v58 = vmov 0 }
0x1705   :  { %v11878_v60 = vsel %vm10208_vm2, 4294967295, %v11877_v60 }
0x170a   :  { %v9307_v46 = vpop.eup %9306 }
0x170b   :  { %v2104_v32 = vmul.f32 %v9307_v46, %v10172_v57  ;;  %v1715_v46 = vand.u32 31, %v9861_v15  ;;  %v1716_v15 = vand.u32 31, %v9868_v18 }
0x170d   :  { %2169 = vmatprep.mubr.f32.mxu0 %v2104_v32  ;;  %vm1747_vm11 = vcmp.eq.s32.totalorder %v1715_v46, %v9855_v30  ;;  %v1729_v46 = vand.u32 31, %v10087_v3  ;;  %v27_v3 = vld [vmem:[%s11614_s1 + $0x68] sm:$0xff] }
0x170e   :  { %2170 = vmatmul.mubr.f32.vlgmr.msra.gmra.mrb[24].mxu0 %v2103_v51  ;;  %v1698_v51 = vand.u32 31, %v9519_v17 }
0x170f   :  { %8173 = vmatprep.mubr.msk.f32.mxu0 %vm11874_vm0, %v11873_v8 }
0x17e1   :  { %v7365_v53 = vpop.f32.mrb[24].mxu0 }
0x17e2   :  { %v7366_v13 = vpop.f32.mrb[25].mxu0 }
0x17e3   :  { %v7367_v10 = vadd.f32 %v7366_v13, %v7365_v53  ;;  %v1717_v53 = vand.u32 31, %v9871_v62  ;;  %v1700_v13 = vand.u32 31, %v9874_v16  ;;  %v11881_v62 = vmov 0 }
0x17e4   :  { %v1702_v16 = vand.u32 31, %v9922_v50  ;;  %v11886_v50 = vmov 0 }
0x17e5   :  { %v2176_v41 = vsel %vm11685_vm7, %v7367_v10, -inf  ;;  %vm1732_vm5 = vcmp.eq.s32.totalorder %v1700_v13, %v9855_v30 }
0x17e6   :  { %2177 = vmax.xlane.f32.xlu1 %v2176_v41  ;;  %v1718_v41 = vand.u32 31, %v9906_v48  ;;  %v1720_v48 = vand.u32 31, %v9936_v55  ;;  %v1704_v55 = vand.u32 31, %v9986_v22  ;;  %v11890_v22 = vmov 0 }
0x17e8   :  { %vm1750_vm8 = vcmp.eq.s32.totalorder %v1718_v41, %v9855_v30  ;;  %v11916_v41 = vld [vmem:[#allocation4_spill] sm:$0xff] }
0x17f7   :  { %1000 = vrot.lane.b32.xlu1 %v9609_v40, %s9440_s28  ;;  %v1656_v40 = vadd.s32 128, %v9855_v30 }
0x17f9   :  { %v1660_v1 = vshra.s32 %v1656_v40, 5  ;;  %v1726_v40 = vand.u32 31, %v10050_v2  ;;  %v1710_v2 = vand.u32 31, %v10061_v37  ;;  %v11904_v37 = vmov 0 }
0x17fb   :  { %1011 = vrot.lane.b32.xlu1 %v9820_v24, %s9438_s7  ;;  %vm10198_vm3 = vcmp.eq.s32.totalorder %v1660_v1, %v9519_v17  ;;  %v1727_v1 = vand.u32 31, %v10053_v25  ;;  %v1711_v25 = vand.u32 31, %v10064_v9  ;;  %v11906_v9 = vmov 0 }
0x17fc   :  { %v11876_v5 = vsel %vm10198_vm3, 4294967295, %v11875_v5  ;;  %6753 = vmatprep.subr.msk.mxu1 %vm10198_vm3, %v11728_v44 }
0x17fd   :  { %6754 = vmatpush1.msk.msra.mxu1 %vm10208_vm2, %v11728_v44  ;;  %vm1730_vm2 = vcmp.eq.s32.totalorder %v1698_v51, %v9855_v30  ;;  %v1713_v51 = vand.u32 31, %v10095_v12  ;;  %v11913_v12 = vmov 0.0|0.0  }
0x17ff   :  { %2488 = vrot.lane.b32.xlu1 %v10188_v56, %s9438_s7 }
0x1873   :  { %v2178_v0 = vpop.xlane.xlu1 %2177 }
0x1874   :  { %v2179_v6 = vsub.f32 %v7367_v10, %v2178_v0  ;;  %v1701_v10 = vand.u32 31, %v9880_v38  ;;  %v11883_v0 = vmov 0  ;;  %v1703_v38 = vand.u32 31, %v9925_v52 }
0x1875   :  { %v11888_v52 = vmov 0 }
0x1876   :  { %v2180_v42 = vmul.f32 1.442695, %v2179_v6  ;;  %vm1733_vm15 = vcmp.eq.s32.totalorder %v1701_v10, %v9855_v30  ;;  %v1722_v6 = vand.u32 31, %v9994_v28  ;;  %v1706_v28 = vand.u32 31, %v10002_v29  ;;  %v11915_v10 = vld [vmem:[#allocation5_spill] sm:$0xff] }
0x1877   :  { %v11894_v29 = vmov 0  ;;  %v1001_v13 = vpop.permute.xlu1 %1000 }
0x1878   :  { %9308 = vpow2.f32 %v2180_v42  ;;  %v1723_v42 = vand.u32 31, %v9997_v19  ;;  %v1707_v19 = vand.u32 31, %v10005_v35  ;;  %v11896_v35 = vmov 0 }
0x1882   :  { %v9309_v11 = vpop.eup %9308 }
0x1883   :  { %v2182_v63 = vsel %vm11685_vm7, %v9309_v11, 0.0 }
0x1884   :  { %2183 = vadd.xlane.f32.xlu0 %v2182_v63  ;;  %v1725_v63 = vand.u32 31, %v10022_v14  ;;  %v1709_v14 = vand.u32 31, %v10030_v47  ;;  %v11900_v47 = vmov 0 }
0x189a   :  { %1007 = vrot.lane.b32.xlu0 %v9733_v34, %s9440_s28  ;;  %v1714_v34 = vand.u32 31, %v9858_v31  ;;  %v1699_v31 = vand.u32 31, %v9864_v33  ;;  %v1719_v33 = vand.u32 31, %v9919_v20  ;;  %v1721_v20 = vand.u32 31, %v9939_v27 }
0x189b   :  { %v1705_v27 = vand.u32 31, %v9989_v23  ;;  %v11892_v23 = vmov 0 }
0x189c   :  { %vm1746_vm7 = vcmp.eq.s32.totalorder %v1714_v34, %v9855_v30  ;;  %v1728_v34 = vand.u32 31, %v10084_v59  ;;  %v26_v59 = vld [vmem:[%s11614_s1 + $0x60] sm:$0xff] }
0x189d   :  { %vm10219_vm1 = vmpackc.low %vm1747_vm11, %vm1746_vm7  ;;  %vm1731_vm11 = vcmp.eq.s32.totalorder %v1699_v31, %v9855_v30  ;;  %vm1748_vm7 = vcmp.eq.s32.totalorder %v1716_v15, %v9855_v30  ;;  %v11908_v31 = vmov 0  ;;  %v10399_v15 = vpack.c.bf16 %v27_v3, %v26_v59  ;;  %v11930_v59 = vld [vmem:[#allocation7_spill] sm:$0xff]  ;;  %v11931_v3 = vld [vmem:[#allocation8_spill] sm:$0xff] }
0x189e   :  { %1003 = vrot.lane.b32.xlu0 %v9629_v61, %s9438_s7  ;;  %v11879_v61 = vmov 0  ;;  %8613 = vmatprep.subr.msk.bf16.mxu1 %vm10219_vm1, %v11853_v26  ;;  %vm10238_vm3 = vmpackc.low %vm1731_vm11, %vm1730_vm2  ;;  %vm1751_vm2 = vcmp.eq.s32.totalorder %v1719_v33, %v9855_v30  ;;  %vm1734_vm11 = vcmp.eq.s32.totalorder %v1702_v16, %v9855_v30  ;;  %v22_v16 = vld [vmem:[%s11614_s1 + $0x40] sm:$0xff] }
0x189f   :  { %v11880_v61 = vsel %vm10219_vm1, 4294967295, %v11879_v61  ;;  %vm1749_vm1 = vcmp.eq.s32.totalorder %v1717_v53, %v9855_v30  ;;  %v11882_v62 = vsel %vm10238_vm3, 4294967295, %v11881_v62  ;;  %11914 = vst [vmem:[#allocation32_spill] sm:$0xff] %v10399_v15  ;;  %8646 = vmatpush3.bf16.msra.mxu0 %v10399_v15 }
0x18a0   :  { %vm10242_vm14 = vmpackc.low %vm1749_vm1, %vm1748_vm7  ;;  %vm1735_vm7 = vcmp.eq.s32.totalorder %v1703_v38, %v9855_v30  ;;  %8647 = vmatprep.subr.bf16.mxu0 %v11913_v12  ;;  %v23_v38 = vld [vmem:[%s11614_s1 + $0x48] sm:$0xff] }
0x18a1   :  { %v11884_v0 = vsel %vm10242_vm14, 4294967295, %v11883_v0  ;;  %vm10261_vm1 = vmpackc.low %vm1733_vm15, %vm1732_vm5  ;;  %vm1736_vm5 = vcmp.eq.s32.totalorder %v1704_v55, %v9855_v30 }
0x18a2   :  { %v11887_v50 = vsel %vm10261_vm1, 4294967295, %v11886_v50 }
0x1911   :  { %v2184_v32 = vpop.xlane.xlu0 %2183 }
0x1912   :  { %9310 = vrcp.f32 %v2184_v32  ;;  %v1712_v32 = vand.u32 31, %v10092_v49  ;;  %v11910_v49 = vmov 0 }
0x1915   :  { %v1008_v53 = vpop.permute.xlu0 %1007 }
0x191c   :  { %v9311_v39 = vpop.eup %9310 }
0x191d   :  { %v2186_v18 = vmul.f32 %v9311_v39, %v9309_v11  ;;  %v1724_v11 = vand.u32 31, %v10019_v43  ;;  %v1708_v43 = vand.u32 31, %v10027_v45  ;;  %v11898_v45 = vmov 0 }
0x191f   :  { %6755 = vmatmul.mubr.msk.f32.vlgmr.msra.gmra.mrb[20].mxu1 %vm11885_vm9, %v2186_v18  ;;  %vm10265_vm9 = vmpackc.low %vm1751_vm2, %vm1750_vm8  ;;  %vm1737_vm2 = vcmp.eq.s32.totalorder %v1705_v27, %v9855_v30  ;;  %v1004_v18 = vpop.permute.xlu0 %1003  ;;  %v1012_v27 = vpop.permute.xlu1 %1011 }
0x1920   :  { %8615 = vmatpush3.bf16.msk.msra.mxu1 %vm10238_vm3, %v11853_v26  ;;  %v11889_v52 = vsel %vm10265_vm9, 4294967295, %v11888_v52  ;;  %vm1752_vm3 = vcmp.eq.s32.totalorder %v1720_v48, %v9855_v30  ;;  %vm10283_vm8 = vmpackc.low %vm1735_vm7, %vm1734_vm11  ;;  %vm1738_vm11 = vcmp.eq.s32.totalorder %v1706_v28, %v9855_v30  ;;  %vm1739_vm7 = vcmp.eq.s32.totalorder %v1707_v19, %v9855_v30  ;;  %v11919_v48 = vld [vmem:[#allocation3_spill] sm:$0xff] }
0x1921   :  { %8617 = vmatprep.subr.msk.bf16.mxu1 %vm10242_vm14, %v11853_v26  ;;  %vm1753_vm14 = vcmp.eq.s32.totalorder %v1721_v20, %v9855_v30  ;;  %v11891_v22 = vsel %vm10283_vm8, 4294967295, %v11890_v22  ;;  %v11920_v20 = vld [vmem:[#allocation2_spill] sm:$0xff] }
0x1922   :  { %vm10287_vm15 = vmpackc.low %vm1753_vm14, %vm1752_vm3 }
0x1923   :  { %v11893_v23 = vsel %vm10287_vm15, 4294967295, %v11892_v23  ;;  %vm10305_vm14 = vmpackc.low %vm1737_vm2, %vm1736_vm5  ;;  %vm1740_vm5 = vcmp.eq.s32.totalorder %v1708_v43, %v9855_v30  ;;  %vm1741_vm2 = vcmp.eq.s32.totalorder %v1709_v14, %v9855_v30  ;;  %v10424_v43 = vpack.c.bf16 %v23_v38, %v22_v16 }
0x1924   :  { %8619 = vmatpush3.bf16.msk.msra.mxu1 %vm10261_vm1, %v11853_v26  ;;  %vm1754_vm1 = vcmp.eq.s32.totalorder %v1722_v6, %v9855_v30  ;;  %v11895_v29 = vsel %vm10305_vm14, 4294967295, %v11894_v29  ;;  %v1637_v16 = vsub.s32 2, %v9519_v17 }
0x1925   :  { %8621 = vmatprep.subr.msk.bf16.mxu1 %vm10265_vm9, %v11853_v26  ;;  %vm1755_vm9 = vcmp.eq.s32.totalorder %v1723_v42, %v9855_v30  ;;  %11925 = vst [vmem:[#allocation5_spill] sm:$0xff] %v10424_v43 }
0x1926   :  { %vm10309_vm3 = vmpackc.low %vm1755_vm9, %vm1754_vm1  ;;  %v10466_v38 = vrot.slane %v10143_v36, %v1637_v16  ;;  %v11937_v16 = vld [vmem:[#allocation14_spill] sm:$0xff] }
0x1927   :  { %v11897_v35 = vsel %vm10309_vm3, 4294967295, %v11896_v35  ;;  %vm10327_vm1 = vmpackc.low %vm1739_vm7, %vm1738_vm11  ;;  %vm1742_vm11 = vcmp.eq.s32.totalorder %v1710_v2, %v9855_v30  ;;  %vm1743_vm7 = vcmp.eq.s32.totalorder %v1711_v25, %v9855_v30  ;;  %v28_v25 = vld [vmem:[%s11614_s1 + $0x70] sm:$0xff] }
0x1928   :  { %8623 = vmatpush3.bf16.msk.msra.mxu1 %vm10283_vm8, %v11853_v26  ;;  %vm1756_vm8 = vcmp.eq.s32.totalorder %v1724_v11, %v9855_v30  ;;  %v11899_v45 = vsel %vm10327_vm1, 4294967295, %v11898_v45 }
0x1929   :  { %8625 = vmatprep.subr.msk.bf16.mxu1 %vm10287_vm15, %v11853_v26  ;;  %vm1757_vm15 = vcmp.eq.s32.totalorder %v1725_v63, %v9855_v30 }
0x192a   :  { %vm10331_vm9 = vmpackc.low %vm1757_vm15, %vm1756_vm8 }
0x192b   :  { %v11901_v47 = vsel %vm10331_vm9, 4294967295, %v11900_v47  ;;  %vm10347_vm8 = vmpackc.low %vm1741_vm2, %vm1740_vm5 }
0x192c   :  { %8627 = vmatpush3.bf16.msk.msra.mxu1 %vm10305_vm14, %v11853_v26  ;;  %vm1758_vm14 = vcmp.eq.s32.totalorder %v1726_v40, %v9855_v30  ;;  %v11903_v58 = vsel %vm10347_vm8, 4294967295, %v11902_v58  ;;  %vm10363_vm5 = vmpackc.low %vm1743_vm7, %vm1742_vm11  ;;  %vm1744_vm11 = vcmp.eq.s32.totalorder %v1712_v32, %v9855_v30  ;;  %vm1745_vm7 = vcmp.eq.s32.totalorder %v1713_v51, %v9855_v30  ;;  %v24_v40 = vld [vmem:[%s11614_s1 + $0x50] sm:$0xff]  ;;  %v11928_v32 = vld [vmem:[#allocation6_spill] sm:$0xff] }
0x192d   :  { %8629 = vmatprep.subr.msk.bf16.mxu1 %vm10309_vm3, %v11853_v26  ;;  %vm1759_vm3 = vcmp.eq.s32.totalorder %v1727_v1, %v9855_v30  ;;  %v11907_v9 = vsel %vm10363_vm5, 4294967295, %v11906_v9  ;;  %v25_v1 = vld [vmem:[%s11614_s1 + $0x58] sm:$0xff] }
0x192e   :  { %vm10351_vm15 = vmpackc.low %vm1759_vm3, %vm1758_vm14  ;;  %vm1760_vm14 = vcmp.eq.s32.totalorder %v1728_v34, %v9855_v30  ;;  %vm1761_vm3 = vcmp.eq.s32.totalorder %v1729_v46, %v9855_v30  ;;  %v10437_v2 = vpack.c.bf16 %v25_v1, %v24_v40  ;;  %v29_v34 = vld [vmem:[%s11614_s1 + $0x78] sm:$0xff]  ;;  %v2489_v40 = vpop.permute.xlu1 %2488 }
0x192f   :  { %v11905_v37 = vsel %vm10351_vm15, 4294967295, %v11904_v37  ;;  %vm10376_vm2 = vmpackc.low %vm1761_vm3, %vm1760_vm14  ;;  %vm11917_vm14 = vcmask 261120   ;;  %vm11918_vm3 = vcmask 523264   ;;  %v10445_v46 = vpack.c.bf16 %v29_v34, %v28_v25 }
0x1930   :  { %8631 = vmatpush3.bf16.msk.msra.mxu1 %vm10327_vm1, %v11853_v26  ;;  %v11909_v31 = vsel %vm10376_vm2, 4294967295, %v11908_v31  ;;  %v1019_v33 = vsel %vm11917_vm14, %v11916_v41, %v11915_v10  ;;  %11926 = vst [vmem:[#allocation4_spill] sm:$0xff] %v10437_v2 }
0x1931   :  { %8633 = vmatprep.subr.msk.bf16.mxu1 %vm10331_vm9, %v11853_v26  ;;  %v1020_v39 = vsel %vm11918_vm3, %v1019_v33, %v1008_v53  ;;  %11927 = vst [vmem:[#allocation3_spill] sm:$0xff] %v10445_v46  ;;  %8649 = vmatpush3.bf16.msra.mxu0 %v10445_v46  ;;  %v11932_v53 = vld [vmem:[#allocation9_spill] sm:$0xff] }
0x1932   :  { %8656 = vmatprep.subr.bf16.mxu0 %v11913_v12 }
0x1934   :  { %8635 = vmatpush3.bf16.msk.msra.mxu1 %vm10347_vm8, %v11853_v26 }
0x1935   :  { %8637 = vmatprep.subr.msk.bf16.mxu1 %vm10351_vm15, %v11853_v26 }
0x1938   :  { %8639 = vmatpush3.bf16.msk.msra.mxu1 %vm10363_vm5, %v11853_v26  ;;  %vm10385_vm5 = vmpackc.low %vm1745_vm7, %vm1744_vm11 }
0x1939   :  { %8641 = vmatprep.subr.msk.bf16.mxu1 %vm10376_vm2, %v11853_v26  ;;  %v11911_v49 = vsel %vm10385_vm5, 4294967295, %v11910_v49  ;;  %vm11921_vm11 = vmmov %vm11917_vm14  ;;  %vm11923_vm14 = vcmask 785408  }
0x193a   :  { %11912 = vst [vmem:[#allocation31_spill] sm:$0xff] %v11911_v49  ;;  %v1014_v55 = vsel %vm11921_vm11, %v11920_v20, %v11919_v48  ;;  %vm11922_vm7 = vmmov %vm11918_vm3  ;;  %v10418_v28 = vsel %vm11923_vm14, %v1020_v39, %v1012_v27  ;;  %vm1954_vm11 = vcmp.eq.s32.totalorder %v9855_v30, 0 }
0x193b   :  { %v1016_v42 = vsel %vm11922_vm7, %v1014_v55, %v1001_v13  ;;  %vm11924_vm3 = vmmov %vm11923_vm14  ;;  %v6718_v51 = vsel %vm1954_vm11, 1.0, %v11873_v8  ;;  %vm11929_vm7 = vcmask 261120  }
0x193c   :  { %8643 = vmatpush3.bf16.msk.msra.mxu1 %vm10385_vm5, %v11853_v26  ;;  %v10421_v11 = vsel %vm11924_vm3, %v1016_v42, %v1004_v18  ;;  %vm11934_vm14 = vmmov %vm11929_vm7 }
0x193d   :  { %8650 = vmatprep.subr.bf16.mxu1 %v11913_v12  ;;  %vm11935_vm3 = vmmov %vm11929_vm7 }
0x19f2   :  { %v2256_v6 = vpop.f32.mrb[20].mxu1 }
0x19f3   :  { %v2258_v19 = vpop.f32.mrb[21].mxu1  ;;  %v2261_v14 = vmul.f32 %v2256_v6, %v10421_v11 }
0x19f4   :  { %v2262_v63 = vmul.f32 %v2258_v19, %v10418_v28 }
0x19f6   :  { %2327 = vmatprep.mubr.f32.mxu1 %v2262_v63 }
0x19f7   :  { %2328 = vmatmul.mubr.f32.vlgmr.msra.gmra.mrb[22].mxu1 %v2261_v14 }
0x19f8   :  { %8652 = vmatpush3.bf16.msra.mxu1 %v10424_v43  ;;  %8184 = vmatprep.mubr.msk.f32.mxu1 %vm11874_vm0, %v11873_v8 }
0x19f9   :  { %8653 = vmatprep.subr.bf16.mxu1 %v11913_v12 }
0x19fc   :  { %8655 = vmatpush3.bf16.msra.mxu1 %v10437_v2 }
0x19fd   :  { %8663 = vmatprep.subr.bf16.mxu1 %v11928_v32 }
0x19ff   :  { %8185 = vmatmul.mubr.msk.f32.vlgmr.msra.gmra.mrb[24].mxu1 %vm11929_vm7, %v6718_v51 }
0x1a00   :  { %8665 = vmatpush1.bf16.msra.mxu1 %v11930_v59  ;;  %2703 = vmatprep.mubr.f32.mxu1 %v11873_v8 }
0x1a01   :  { %8667 = vmatprep.subr.bf16.mxu1 %v11931_v3 }
0x1a04   :  { %8669 = vmatpush1.bf16.msra.mxu1 %v11932_v53 }
0x1a05   :  { %8677 = vmatprep.subr.msk.bf16.mxu1 %vm9894_vm6, %v11853_v26 }
0x1aca   :  { %v7400_v10 = vpop.f32.mrb[22].mxu1 }
0x1acb   :  { %v7401_v41 = vpop.f32.mrb[23].mxu1 }
0x1acc   :  { %v7402_v33 = vadd.f32 %v7401_v41, %v7400_v10 }
0x1ace   :  { %8174 = vmatmul.mubr.msk.f32.vlgmr.msra.gmra.mrb[26].mxu0 %vm11934_vm14, %v7402_v33 }
0x1acf   :  { %8195 = vmatprep.mubr.msk.f32.mxu0 %vm11874_vm0, %v11873_v8 }
0x1ad2   :  { %v2475_v39 = vpop.f32.mrb[24].mxu1 }
0x1ad3   :  { %v8186_v18 = vpop.f32.mrb[25].mxu1 }
0x1ad4   :  { %v11936_v18 = vld [vmem:[#allocation13_spill] sm:$0xff] }
0x1ba1   :  { %v10468_v48 = vpop.f32.mrb[26].mxu0 }
0x1ba2   :  { %v2476_v20 = vadd.f32 %v2475_v39, %v10468_v48  ;;  %v8175_v55 = vpop.f32.mrb[27].mxu0 }
0x1ba3   :  { %v11940_v55 = vld [vmem:[#allocation17_spill] sm:$0xff] }
0x1ba4   :  { %v2479_v27 = vadd.f32 %v2476_v20, %v10466_v38  ;;  %v11939_v20 = vld [vmem:[#allocation16_spill] sm:$0xff]  ;;  %vm11941_vm11 = vnez %v11940_v55 }
0x1ba6   :  { %v2480_v6 = vadd.f32 %v2479_v27, %v10188_v56 }
0x1ba8   :  { %v6790_v42 = vmul.f32 -1.442695, %v2480_v6  ;;  %v11944_v6 = vld [vmem:[#allocation19_spill] sm:$0xff] }
0x1ba9   :  { %vm11945_vm14 = vnez %v11944_v6 }
0x1baa   :  { %9312 = vpow2.f32 %v6790_v42  ;;  %v11946_v42 = vld [vmem:[#allocation20_spill] sm:$0xff] }
0x1bb4   :  { %v9313_v19 = vpop.eup %9312 }
0x1bb5   :  { %v2484_v63 = vadd.f32 1.0, %v9313_v19  ;;  %v11948_v19 = vld [vmem:[#allocation21_spill] sm:$0xff] }
0x1bb7   :  { %9314 = vrcp.f32 %v2484_v63  ;;  %v11950_v63 = vld [vmem:[#allocation22_spill] sm:$0xff] }
0x1bc1   :  { %v9315_v14 = vpop.eup %9314 }
0x1bc2   :  { %v2491_v17 = vmul.f32 %v9315_v14, %v2489_v40  ;;  %v2498_v51 = vsub.f32 1.0, %v9315_v14  ;;  %v2504_v56 = vmul.f32 %v9315_v14, %v9820_v24  ;;  %v11938_v24 = vld [vmem:[#allocation15_spill] sm:$0xff]  ;;  %v11954_v40 = vld [vmem:[#allocation24_spill] sm:$0xff] }
0x1bc3   :  { %v11952_v14 = vld [vmem:[#allocation23_spill] sm:$0xff] }
0x1bc4   :  { %2493 = vrot.lane.b32.xlu0 %v2491_v17, %s9438_s7  ;;  %v11956_v17 = vld [vmem:[#allocation25_spill] sm:$0xff] }
0x1c36   :  { %v2494_v1 = vpop.permute.xlu0 %2493 }
0x1c37   :  { %v2496_v25 = vadd.f32 %v2494_v1, %v2479_v27  ;;  %v11942_v27 = vld [vmem:[#allocation18_spill] sm:$0xff] }
0x1c38   :  { %vm11943_vm7 = vnez %v11942_v27  ;;  %v11958_v1 = vld [vmem:[#allocation26_spill] sm:$0xff] }
0x1c39   :  { %9316 = vtanh.f32 %v2496_v25  ;;  %v11960_v25 = vld [vmem:[#allocation27_spill] sm:$0xff] }
0x1c43   :  { %v9317_v34 = vpop.eup %9316 }
0x1c44   :  { %2500 = vrot.lane.b32.xlu1 %v9317_v34, %s9439_s8 }
0x1cb6   :  { %v2501_v10 = vpop.permute.xlu1 %2500 }
0x1cb7   :  { %v2503_v41 = vmul.f32 %v2501_v10, %v2498_v51 }
0x1cb9   :  { %v10476_v33 = vadd.f32 %v2504_v56, %v2503_v41 }
0x1cbb   :  { %2507 = vrot.lane.b32.xlu0 %v10476_v33, %s9439_s8 }
0x1d2d   :  { %v10480_v39 = vpop.permute.xlu0 %2507 }
0x1d2e   :  { %6793 = vmatmul.mubr.msk.f32.vlgmr.msra.gmra.mrb[26].mxu1 %vm11935_vm3, %v10480_v39  ;;  %vm11947_vm3 = vnez %v11946_v42 }
0x1d2f   :  { %8679 = vmatpush3.bf16.msk.msra.mxu1 %vm9913_vm10, %v11853_v26 }
0x1d30   :  { %8681 = vmatprep.subr.msk.bf16.mxu1 %vm9930_vm12, %v11853_v26 }
0x1d33   :  { %8683 = vmatpush3.bf16.msk.msra.mxu1 %vm9946_vm13, %v11853_v26  ;;  %vm11949_vm13 = vnez %v11948_v19 }
0x1d34   :  { %8685 = vmatprep.subr.msk.bf16.mxu1 %vm9962_vm4, %v11853_v26  ;;  %vm11951_vm4 = vnez %v11950_v63 }
0x1d37   :  { %8687 = vmatpush3.bf16.msk.msra.mxu1 %vm11941_vm11, %v11853_v26  ;;  %vm11953_vm11 = vnez %v11952_v14 }
0x1d38   :  { %8689 = vmatprep.subr.msk.bf16.mxu1 %vm11943_vm7, %v11853_v26  ;;  %vm11955_vm7 = vnez %v11954_v40 }
0x1d3b   :  { %8691 = vmatpush3.bf16.msk.msra.mxu1 %vm11945_vm14, %v11853_v26  ;;  %vm11957_vm14 = vnez %v11956_v17 }
0x1d3c   :  { %8693 = vmatprep.subr.msk.bf16.mxu1 %vm11947_vm3, %v11853_v26  ;;  %vm11959_vm3 = vnez %v11958_v1 }
0x1d3f   :  { %8695 = vmatpush3.bf16.msk.msra.mxu1 %vm11949_vm13, %v11853_v26  ;;  %vm11961_vm13 = vnez %v11960_v25 }
0x1d40   :  { %8697 = vmatprep.subr.msk.bf16.mxu1 %vm11951_vm4, %v11853_v26  ;;  %vm11974_vm4 = vnez %v11882_v62 }
0x1d43   :  { %8699 = vmatpush3.bf16.msk.msra.mxu1 %vm11953_vm11, %v11853_v26  ;;  %vm11973_vm11 = vcmask 64512  }
0x1d44   :  { %8701 = vmatprep.subr.msk.bf16.mxu1 %vm11955_vm7, %v11853_v26  ;;  %vm11972_vm7 = vnez %v11880_v61 }
0x1d47   :  { %8703 = vmatpush3.bf16.msk.msra.mxu1 %vm11957_vm14, %v11853_v26 }
0x1d48   :  { %8705 = vmatprep.subr.msk.bf16.mxu1 %vm11959_vm3, %v11853_v26  ;;  %vm11969_vm3 = vnez %v11876_v5 }
0x1d4b   :  { %8707 = vmatpush3.bf16.msk.msra.mxu1 %vm11961_vm13, %v11853_v26  ;;  %vm11962_vm13 = vcmask 64512  }
0x1d4c   :  { %8740 = vmatprep.subr.bf16.mxu1 %v11913_v12 }
0x1e01   :  { %v2705_v34 = vpop.f32.mrb[26].mxu1 }
0x1e02   :  { %v2781_v51 = vadd.f32 %v2705_v34, %v10159_v7  ;;  %v2707_v10 = vpop.f32.mrb[27].mxu1 }
0x1e03   :  { %v2782_v56 = vadd.f32 %v2707_v10, %v10164_v54 }
0x1e04   :  { %9318 = vtanh.f32 %v2781_v51 }
0x1e05   :  { %9320 = vtanh.f32 %v2782_v56 }
0x1e0e   :  { %v9319_v41 = vpop.eup %9318 }
0x1e0f   :  { %v9321_v44 = vpop.eup %9320  ;;  %v2785_v1 = vmul.f32 %v9319_v41, %v10172_v57 }
0x1e10   :  { %v2786_v17 = vmul.f32 %v9321_v44, %v10172_v57 }
0x1e12   :  { %2851 = vmatprep.mubr.f32.mxu1 %v2786_v17  ;;  %v9431_v17 = vld [vmem:[%s11614_s1 + $0x90] sm:$0xff] }
0x1e13   :  { %2852 = vmatmul.mubr.f32.vlgmr.msra.gmra.mrb[28].mxu1 %v2785_v1  ;;  %v9432_v1 = vld [vmem:[%s11614_s1 + $0x98] sm:$0xff] }
0x1e14   :  { %8742 = vmatpush3.bf16.msra.mxu1 %v10399_v15  ;;  %8217 = vmatprep.mubr.msk.f32.mxu1 %vm11874_vm0, %v11873_v8  ;;  %v9251_v56 = vpack.i.bf16 %v9432_v1, %v9431_v17  ;;  %v9433_v15 = vld [vmem:[%s11614_s1 + $0x80] sm:$0xff]  ;;  %v9434_v17 = vld [vmem:[%s11614_s1 + $0x88] sm:$0xff] }
0x1e15   :  { %8743 = vmatprep.subr.bf16.mxu1 %v11913_v12  ;;  %v9246_v1 = vpack.i.bf16 %v9434_v17, %v9433_v15 }
0x1e18   :  { %8745 = vmatpush3.bf16.msra.mxu1 %v10445_v46 }
0x1e19   :  { %8752 = vmatprep.subr.bf16.mxu1 %v11913_v12 }
0x1ee6   :  { %v7455_v34 = vpop.f32.mrb[28].mxu1 }
0x1ee7   :  { %v7456_v51 = vpop.f32.mrb[29].mxu1 }
0x1ee8   :  { %v7457_v10 = vadd.f32 %v7456_v51, %v7455_v34 }
0x1eea   :  { %v2857_v44 = vsel %vm11962_vm13, %v7457_v10, -inf }
0x1eeb   :  { %2858 = vmax.xlane.f32.xlu1 %v2857_v44 }
0x1efc   :  { %9252 = vrot.lane.b32.xlu1 %v9251_v56, %s9439_s8 }
0x1f00   :  { %2526 = vrot.lane.b32.xlu1 %v10468_v48, %s9440_s28  ;;  %v1646_v48 = vrot.slane %v10143_v36, %v10149_v21  ;;  %v11966_v36 = vld [vmem:[#allocation10_spill] sm:$0xff]  ;;  %v11967_v21 = vld [vmem:[#allocation11_spill] sm:$0xff] }
0x1f78   :  { %v2859_v41 = vpop.xlane.xlu1 %2858 }
0x1f79   :  { %v2860_v46 = vsub.f32 %v7457_v10, %v2859_v41 }
0x1f7b   :  { %v2861_v34 = vmul.f32 1.442695, %v2860_v46 }
0x1f7c   :  { %v9253_v10 = vpop.permute.xlu1 %9252 }
0x1f7d   :  { %9322 = vpow2.f32 %v2861_v34  ;;  %v9255_v41 = vunpack.i.h.bf16 %v9253_v10  ;;  %v9254_v34 = vunpack.i.l.bf16 %v9253_v10 }
0x1f7f   :  { %v10563_v7 = vpack.c.bf16 %v9255_v41, %v9254_v34 }
0x1f81   :  { %11964 = vst [vmem:[#allocation13_spill] sm:$0xff] %v10563_v7 }
0x1f87   :  { %v9323_v51 = vpop.eup %9322 }
0x1f88   :  { %v2863_v44 = vsel %vm11962_vm13, %v9323_v51, 0.0  ;;  %vm11965_vm13 = vcmask 261120  }
0x1f89   :  { %2864 = vadd.xlane.f32.xlu0 %v2863_v44  ;;  %vm11970_vm14 = vmmov %vm11965_vm13 }
0x1f9f   :  { %9247 = vrot.lane.b32.xlu0 %v9246_v1, %s9439_s8 }
0x1fa3   :  { %2602 = vrot.lane.b32.xlu0 %v1646_v48, %s9439_s8 }
0x2016   :  { %v2865_v46 = vpop.xlane.xlu0 %2864 }
0x2017   :  { %9324 = vrcp.f32 %v2865_v46 }
0x201a   :  { %v9248_v56 = vpop.permute.xlu0 %9247 }
0x201b   :  { %v9250_v44 = vunpack.i.h.bf16 %v9248_v56  ;;  %v9249_v57 = vunpack.i.l.bf16 %v9248_v56 }
0x201d   :  { %v10561_v54 = vpack.c.bf16 %v9250_v44, %v9249_v57  ;;  %v11968_v57 = vmov 1.0  }
0x201e   :  { %v10635_v1 = vpop.permute.xlu0 %2602 }
0x201f   :  { %11963 = vst [vmem:[#allocation2_spill] sm:$0xff] %v10561_v54  ;;  %8658 = vmatpush3.bf16.msra.mxu0 %v10561_v54 }
0x2020   :  { %8659 = vmatprep.subr.bf16.mxu0 %v11913_v12 }
0x2021   :  { %v9325_v15 = vpop.eup %9324 }
0x2022   :  { %v2867_v17 = vmul.f32 %v9325_v15, %v9323_v51 }
0x2023   :  { %8661 = vmatpush3.bf16.msra.mxu0 %v10563_v7 }
0x2024   :  { %8670 = vmatprep.subr.bf16.mxu0 %v11913_v12 }
0x2026   :  { %8196 = vmatmul.mubr.msk.f32.vlgmr.msra.gmra.mrb[28].mxu0 %vm11965_vm13, %v10480_v39  ;;  %vm11971_vm13 = vnez %v11878_v60 }
0x2027   :  { %8672 = vmatpush3.bf16.msra.mxu0 %v11966_v36  ;;  %8206 = vmatprep.mubr.msk.f32.mxu0 %vm11874_vm0, %v11873_v8 }
0x2028   :  { %8673 = vmatprep.subr.bf16.mxu0 %v11913_v12 }
0x202b   :  { %8675 = vmatpush3.bf16.msra.mxu0 %v11967_v21 }
0x202c   :  { %6827 = vmatprep.subr.msk.mxu0 %vm11969_vm3, %v11968_v57  ;;  %vm11977_vm3 = vnez %v11889_v52 }
0x202e   :  { %8207 = vmatmul.mubr.msk.f32.vlgmr.msra.gmra.mrb[30].mxu0 %vm11970_vm14, %v10480_v39  ;;  %vm11975_vm14 = vnez %v11884_v0  ;;  %v2527_v39 = vpop.permute.xlu1 %2526 }
0x202f   :  { %6828 = vmatpush1.msk.msra.mxu0 %vm11971_vm13, %v11968_v57  ;;  %2935 = vmatprep.mubr.f32.mxu0 %v11873_v8  ;;  %vm11976_vm13 = vnez %v11887_v50 }
0x2030   :  { %8709 = vmatprep.subr.msk.bf16.mxu0 %vm11972_vm7, %v11853_v26  ;;  %vm11978_vm7 = vnez %v11891_v22 }
0x2032   :  { %6829 = vmatmul.mubr.msk.f32.vlgmr.msra.gmra.mrb[32].mxu0 %vm11973_vm11, %v2867_v17  ;;  %vm11979_vm11 = vnez %v11893_v23 }
0x2033   :  { %8711 = vmatpush3.bf16.msk.msra.mxu0 %vm11974_vm4, %v11853_v26  ;;  %vm11980_vm4 = vnez %v11895_v29 }
0x2034   :  { %8713 = vmatprep.subr.msk.bf16.mxu0 %vm11975_vm14, %v11853_v26  ;;  %vm11981_vm14 = vnez %v11897_v35 }
0x2037   :  { %8715 = vmatpush3.bf16.msk.msra.mxu0 %vm11976_vm13, %v11853_v26 }
0x2038   :  { %8717 = vmatprep.subr.msk.bf16.mxu0 %vm11977_vm3, %v11853_v26 }
0x203b   :  { %8719 = vmatpush3.bf16.msk.msra.mxu0 %vm11978_vm7, %v11853_v26 }
0x203c   :  { %8721 = vmatprep.subr.msk.bf16.mxu0 %vm11979_vm11, %v11853_v26 }
0x203f   :  { %8723 = vmatpush3.bf16.msk.msra.mxu0 %vm11980_vm4, %v11853_v26  ;;  %vm11982_vm4 = vnez %v11907_v9 }
0x2040   :  { %8725 = vmatprep.subr.msk.bf16.mxu0 %vm11981_vm14, %v11853_v26 }
0x2043   :  { %8727 = vmatpush3.bf16.msk.msra.mxu0 %vm10327_vm1, %v11853_v26 }
0x2044   :  { %8729 = vmatprep.subr.msk.bf16.mxu0 %vm10331_vm9, %v11853_v26 }
0x2047   :  { %8731 = vmatpush3.bf16.msk.msra.mxu0 %vm10347_vm8, %v11853_v26 }
0x2048   :  { %8733 = vmatprep.subr.msk.bf16.mxu0 %vm10351_vm15, %v11853_v26 }
0x204b   :  { %8735 = vmatpush3.bf16.msk.msra.mxu0 %vm11982_vm4, %v11853_v26  ;;  %vm11984_vm4 = vcmask 261120  }
0x204c   :  { %8737 = vmatprep.subr.msk.bf16.mxu0 %vm10376_vm2, %v11853_v26 }
0x204f   :  { %8739 = vmatpush3.bf16.msk.msra.mxu0 %vm10385_vm5, %v11853_v26  ;;  %vm11986_vm5 = vcmask 261120  }
0x2050   :  { %8746 = vmatprep.subr.bf16.mxu0 %v11913_v12  ;;  %vm11987_vm2 = vmmov %vm11986_vm5 }
0x20f9   :  { %v2597_v51 = vpop.f32.mrb[28].mxu0 }
0x20fa   :  { %v2598_v48 = vadd.f32 %v2597_v51, %v2527_v39  ;;  %v8197_v46 = vpop.f32.mrb[29].mxu0 }
0x20fc   :  { %v10638_v10 = vadd.f32 %v10635_v1, %v2598_v48 }
0x20fe   :  { %11983 = vst [vmem:[#allocation14_spill] sm:$0xff] %v10638_v10  ;;  %v2606_v56 = vsel %vm11984_vm4, %v10638_v10, -inf }
0x20ff   :  { %2607 = vmax.xlane.f32.xlu1 %v2606_v56 }
0x2101   :  { %v2776_v41 = vpop.f32.mrb[30].mxu0 }
0x2102   :  { %v8208_v34 = vpop.f32.mrb[31].mxu0  ;;  %v2780_v39 = vadd.f32 %v2776_v41, %v10183_v4 }
0x2105   :  { %v2937_v44 = vpop.f32.mrb[32].mxu0 }
0x2106   :  { %v2939_v15 = vpop.f32.mrb[33].mxu0  ;;  %v2942_v49 = vmul.f32 %v2937_v44, %v10421_v11 }
0x2107   :  { %v2943_v17 = vmul.f32 %v2939_v15, %v10418_v28 }
0x2109   :  { %3008 = vmatprep.mubr.f32.mxu0 %v2943_v17 }
0x210a   :  { %3009 = vmatmul.mubr.f32.vlgmr.msra.gmra.mrb[34].mxu0 %v2942_v49 }
0x210b   :  { %8748 = vmatpush3.bf16.msra.mxu0 %v10424_v43  ;;  %8228 = vmatprep.mubr.msk.f32.mxu0 %vm11874_vm0, %v11873_v8 }
0x210c   :  { %8749 = vmatprep.subr.bf16.mxu0 %v11913_v12 }
0x210f   :  { %8751 = vmatpush3.bf16.msra.mxu0 %v10437_v2 }
0x2110   :  { %3169 = vrot.lane.b32.xlu1 %v2780_v39, %s9438_s7  ;;  %8759 = vmatprep.subr.bf16.mxu0 %v11928_v32 }
0x218c   :  { %v10652_v51 = vpop.xlane.xlu1 %2607 }
0x218d   :  { %11985 = vst [vmem:[#allocation15_spill] sm:$0xff] %v10652_v51  ;;  %vm2609_vm4 = vcmp.ge.f32.partialorder %v10638_v10, %v10652_v51 }
0x218e   :  { %v2610_v49 = vsel %vm2609_vm4, %v9855_v30, 32  ;;  %vm11988_vm4 = vcmask 261120  }
0x218f   :  { %v2611_v48 = vsel %vm11986_vm5, %v2610_v49, 2147483647 }
0x2190   :  { %v2613_v46 = vshra.s32 %v2611_v48, 16  ;;  %v2612_v15 = vand.u32 65535, %v2611_v48 }
0x2192   :  { %v2615_v56 = vcvt.s32.f32 %v2613_v46  ;;  %v2614_v49 = vcvt.s32.f32 %v2612_v15 }
0x2194   :  { %2616 = vmin.xlane.f32.xlu0 %v2615_v56 }
0x21dd   :  { %v7490_v34 = vpop.f32.mrb[34].mxu0 }
0x21de   :  { %v7491_v41 = vpop.f32.mrb[35].mxu0 }
0x21df   :  { %v7492_v44 = vadd.f32 %v7491_v41, %v7490_v34 }
0x21e1   :  { %8218 = vmatmul.mubr.msk.f32.vlgmr.msra.gmra.mrb[30].mxu1 %vm11987_vm2, %v7492_v44 }
0x21e2   :  { %8754 = vmatpush3.bf16.msra.mxu1 %v10561_v54  ;;  %8239 = vmatprep.mubr.msk.f32.mxu1 %vm11874_vm0, %v11873_v8 }
0x21e3   :  { %8755 = vmatprep.subr.bf16.mxu1 %v11913_v12 }
0x21e6   :  { %8757 = vmatpush3.bf16.msra.mxu1 %v10563_v7 }
0x21e7   :  { %8766 = vmatprep.subr.bf16.mxu1 %v11913_v12 }
0x2221   :  { %v2617_v17 = vpop.xlane.xlu0 %2616 }
0x2222   :  { %vm2618_vm5 = vcmp.eq.f32.partialorder %v2615_v56, %v2617_v17  ;;  %v2623_v34 = vcvt.f32.s32 %v2617_v17 }
0x2223   :  { %v2619_v46 = vsel %vm2618_vm5, %v2614_v49, inf  ;;  %vm11989_vm5 = vmmov %vm11988_vm4 }
0x2224   :  { %2620 = vmin.xlane.f32.xlu0 %v2619_v46  ;;  %v2624_v44 = vshll.u32 %v2623_v34, 16  ;;  %v3170_v46 = vpop.permute.xlu1 %3169 }
0x22b1   :  { %v2621_v41 = vpop.xlane.xlu0 %2620 }
0x22b2   :  { %v2622_v10 = vcvt.f32.s32 %v2621_v41 }
0x22b4   :  { %v2625_v51 = vadd.s32 %v2624_v44, %v2622_v10  ;;  %v10665_v54 = vpop.f32.mrb[30].mxu1 }
0x22b5   :  { %v8219_v32 = vpop.f32.mrb[31].mxu1 }
0x22b6   :  { %vm2626_vm2 = vcmp.eq.s32.totalorder %v9855_v30, %v2625_v51 }
0x22b7   :  { %v6792_v7 = vsel %vm2626_vm2, 1.0, %v11873_v8  ;;  %vm11990_vm2 = vmmov %vm11988_vm4 }
0x22b8   :  { %8229 = vmatmul.mubr.msk.f32.vlgmr.msra.gmra.mrb[36].mxu0 %vm11988_vm4, %v6792_v7  ;;  %vm11991_vm4 = vnez %v11938_v24 }
0x22b9   :  { %8761 = vmatpush1.bf16.msra.mxu0 %v11930_v59  ;;  %3364 = vmatprep.mubr.f32.mxu0 %v11873_v8 }
0x22ba   :  { %8763 = vmatprep.subr.bf16.mxu0 %v11931_v3 }
0x22bd   :  { %8765 = vmatpush1.bf16.msra.mxu0 %v11932_v53 }
0x22be   :  { %8773 = vmatprep.subr.msk.bf16.mxu0 %vm9894_vm6, %v11853_v26  ;;  %vm11994_vm6 = vcmask 261120  }
0x238b   :  { %v3156_v10 = vpop.f32.mrb[36].mxu0 }
0x238c   :  { %v3157_v32 = vadd.f32 %v3156_v10, %v10665_v54  ;;  %v8230_v51 = vpop.f32.mrb[37].mxu0 }
0x238e   :  { %v3160_v48 = vadd.f32 %v3157_v32, %v10466_v38 }
0x2390   :  { %v3161_v56 = vadd.f32 %v3160_v48, %v2780_v39 }
0x2392   :  { %v6864_v7 = vmul.f32 -1.442695, %v3161_v56 }
0x2394   :  { %9326 = vpow2.f32 %v6864_v7 }
0x239e   :  { %v9327_v15 = vpop.eup %9326 }
0x239f   :  { %v3165_v17 = vadd.f32 1.0, %v9327_v15 }
0x23a1   :  { %9328 = vrcp.f32 %v3165_v17  ;;  %v12010_v17 = vld [vmem:[#allocation28_spill] sm:$0xff] }
0x23ab   :  { %v9329_v49 = vpop.eup %9328 }
0x23ac   :  { %v3172_v34 = vmul.f32 %v9329_v49, %v3170_v46  ;;  %v3179_v10 = vsub.f32 1.0, %v9329_v49  ;;  %v3185_v39 = vmul.f32 %v9329_v49, %v10476_v33  ;;  %v12007_v33 = vld [vmem:[#allocation26_spill] sm:$0xff] }
0x23ae   :  { %3174 = vrot.lane.b32.xlu0 %v3172_v34, %s9438_s7 }
0x2420   :  { %v3175_v41 = vpop.permute.xlu0 %3174 }
0x2421   :  { %v3177_v44 = vadd.f32 %v3175_v41, %v3160_v48  ;;  %v12011_v41 = vld [vmem:[#allocation29_spill] sm:$0xff] }
0x2423   :  { %9330 = vtanh.f32 %v3177_v44 }
0x242d   :  { %v9331_v13 = vpop.eup %9330 }
0x242e   :  { %3181 = vrot.lane.b32.xlu1 %v9331_v13, %s9439_s8  ;;  %v12005_v13 = vld [vmem:[#allocation25_spill] sm:$0xff] }
0x24a0   :  { %v3182_v51 = vpop.permute.xlu1 %3181 }
0x24a1   :  { %v3184_v32 = vmul.f32 %v3182_v51, %v3179_v10 }
0x24a3   :  { %v10682_v56 = vadd.f32 %v3185_v39, %v3184_v32 }
0x24a5   :  { %3188 = vrot.lane.b32.xlu1 %v10682_v56, %s9439_s8 }
0x2517   :  { %v3189_v7 = vpop.permute.xlu1 %3188 }
0x2518   :  { %8240 = vmatmul.mubr.msk.f32.vlgmr.msra.gmra.mrb[32].mxu1 %vm11989_vm5, %v3189_v7  ;;  %6867 = vmatmul.mubr.msk.f32.vlgmr.msra.gmra.mrb[38].mxu0 %vm11990_vm2, %v3189_v7  ;;  %vm11992_vm5 = vnez %v11876_v5  ;;  %vm11993_vm2 = vnez %v11939_v20 }
0x2519   :  { %8768 = vmatpush3.bf16.msra.mxu1 %v11966_v36  ;;  %8250 = vmatprep.mubr.msk.f32.mxu1 %vm11874_vm0, %v11873_v8 }
0x251a   :  { %8769 = vmatprep.subr.bf16.mxu1 %v11913_v12  ;;  %8775 = vmatpush3.bf16.msk.msra.mxu0 %vm9913_vm10, %v11853_v26  ;;  %vm11995_vm10 = vnez %v11878_v60 }
0x251b   :  { %8777 = vmatprep.subr.msk.bf16.mxu0 %vm9930_vm12, %v11853_v26  ;;  %vm11996_vm12 = vnez %v11940_v55 }
0x251d   :  { %8771 = vmatpush3.bf16.msra.mxu1 %v11967_v21 }
0x251e   :  { %8779 = vmatpush3.bf16.msk.msra.mxu0 %vm11991_vm4, %v11853_v26  ;;  %6901 = vmatprep.subr.msk.mxu1 %vm11992_vm5, %v11968_v57  ;;  %vm11997_vm4 = vnez %v11880_v61  ;;  %vm11998_vm5 = vnez %v11942_v27 }
0x251f   :  { %8781 = vmatprep.subr.msk.bf16.mxu0 %vm11993_vm2, %v11853_v26  ;;  %vm12001_vm2 = vnez %v11948_v19 }
0x2520   :  { %8251 = vmatmul.mubr.msk.f32.vlgmr.msra.gmra.mrb[34].mxu1 %vm11994_vm6, %v3189_v7  ;;  %vm11999_vm6 = vnez %v11944_v6  ;;  %v12012_v7 = vld [vmem:[#allocation30_spill] sm:$0xff] }
0x2521   :  { %6902 = vmatpush1.msk.msra.mxu1 %vm11995_vm10, %v11968_v57  ;;  %3596 = vmatprep.mubr.f32.mxu1 %v11873_v8  ;;  %vm12000_vm10 = vnez %v11946_v42 }
0x2522   :  { %8783 = vmatpush3.bf16.msk.msra.mxu0 %vm11996_vm12, %v11853_v26  ;;  %8805 = vmatprep.subr.msk.bf16.mxu1 %vm11997_vm4, %v11853_v26  ;;  %vm12002_vm12 = vnez %v11950_v63  ;;  %vm12003_vm4 = vnez %v11952_v14  ;;  %v12189_v63 = vld [vmem:[#allocation32_spill] sm:$0xff] }
0x2523   :  { %8785 = vmatprep.subr.msk.bf16.mxu0 %vm11998_vm5, %v11853_v26  ;;  %vm12004_vm5 = vnez %v11954_v40 }
0x2526   :  { %8787 = vmatpush3.bf16.msk.msra.mxu0 %vm11999_vm6, %v11853_v26  ;;  %vm12006_vm6 = vnez %v12005_v13  ;;  %v12013_v13 = vld [vmem:[#allocation32_spill] sm:$0xff] }
0x2527   :  { %8789 = vmatprep.subr.msk.bf16.mxu0 %vm12000_vm10, %v11853_v26  ;;  %vm12008_vm10 = vnez %v12007_v33 }
0x252a   :  { %8791 = vmatpush3.bf16.msk.msra.mxu0 %vm12001_vm2, %v11853_v26  ;;  %vm12009_vm2 = vnez %v11960_v25 }
0x252b   :  { %8793 = vmatprep.subr.msk.bf16.mxu0 %vm12002_vm12, %v11853_v26 }
0x252e   :  { %8795 = vmatpush3.bf16.msk.msra.mxu0 %vm12003_vm4, %v11853_v26  ;;  %vm12022_vm4 = vnez %v11884_v0 }
0x252f   :  { %8797 = vmatprep.subr.msk.bf16.mxu0 %vm12004_vm5, %v11853_v26 }
0x2532   :  { %8799 = vmatpush3.bf16.msk.msra.mxu0 %vm12006_vm6, %v11853_v26  ;;  %vm12018_vm6 = vcmask 261120  }
0x2533   :  { %8801 = vmatprep.subr.msk.bf16.mxu0 %vm12008_vm10, %v11853_v26  ;;  %vm12020_vm5 = vmmov %vm12018_vm6 }
0x2536   :  { %8803 = vmatpush3.bf16.msk.msra.mxu0 %vm12009_vm2, %v11853_v26  ;;  %vm12015_vm2 = vcmask 64512  }
0x2537   :  { %8836 = vmatprep.subr.bf16.mxu0 %v11913_v12  ;;  %vm12017_vm10 = vmmov %vm12015_vm2 }
0x25eb   :  { %v3262_v48 = vpop.f32.mrb[32].mxu1  ;;  %v3366_v15 = vpop.f32.mrb[38].mxu0 }
0x25ec   :  { %v3442_v49 = vadd.f32 %v3366_v15, %v12010_v17  ;;  %v8241_v46 = vpop.f32.mrb[33].mxu1  ;;  %v3368_v34 = vpop.f32.mrb[39].mxu0  ;;  %v12014_v15 = vld [vmem:[#allocation3_spill] sm:$0xff] }
0x25ed   :  { %v3443_v44 = vadd.f32 %v3368_v34, %v12011_v41 }
0x25ee   :  { %9332 = vtanh.f32 %v3442_v49 }
0x25ef   :  { %9334 = vtanh.f32 %v3443_v44 }
0x25f3   :  { %v10752_v10 = vpop.f32.mrb[34].mxu1 }
0x25f4   :  { %v8252_v51 = vpop.f32.mrb[35].mxu1 }
0x25f8   :  { %v9333_v39 = vpop.eup %9332 }
0x25f9   :  { %v9335_v32 = vpop.eup %9334  ;;  %v3446_v33 = vmul.f32 %v9333_v39, %v12012_v7 }
0x25fa   :  { %v3447_v25 = vmul.f32 %v9335_v32, %v12012_v7 }
0x25fc   :  { %3512 = vmatprep.mubr.f32.mxu0 %v3447_v25 }
0x25fd   :  { %3513 = vmatmul.mubr.f32.vlgmr.msra.gmra.mrb[40].mxu0 %v3446_v33 }
0x25fe   :  { %8838 = vmatpush3.bf16.msra.mxu0 %v12013_v13  ;;  %8261 = vmatprep.mubr.msk.f32.mxu0 %vm11874_vm0, %v11873_v8 }
0x25ff   :  { %8839 = vmatprep.subr.bf16.mxu0 %v11913_v12 }
0x2602   :  { %8841 = vmatpush3.bf16.msra.mxu0 %v12014_v15 }
0x2603   :  { %8848 = vmatprep.subr.bf16.mxu0 %v11913_v12 }
0x26d0   :  { %v7545_v49 = vpop.f32.mrb[40].mxu0 }
0x26d1   :  { %v7546_v46 = vpop.f32.mrb[41].mxu0 }
0x26d2   :  { %v7547_v34 = vadd.f32 %v7546_v46, %v7545_v49 }
0x26d4   :  { %v3518_v44 = vsel %vm12015_vm2, %v7547_v34, -inf }
0x26d5   :  { %3519 = vmax.xlane.f32.xlu0 %v3518_v44 }
0x26eb   :  { %3191 = vrot.lane.b32.xlu0 %v10665_v54, %s9440_s28 }
0x2762   :  { %v3520_v25 = vpop.xlane.xlu0 %3519 }
0x2763   :  { %v3521_v33 = vsub.f32 %v7547_v34, %v3520_v25 }
0x2765   :  { %v3522_v51 = vmul.f32 1.442695, %v3521_v33 }
0x2766   :  { %v3192_v39 = vpop.permute.xlu0 %3191 }
0x2767   :  { %9336 = vpow2.f32 %v3522_v51  ;;  %v3263_v32 = vadd.f32 %v3262_v48, %v3192_v39 }
0x2769   :  { %v10766_v15 = vadd.f32 %v3263_v32, %v10635_v1 }
0x276b   :  { %12016 = vst [vmem:[#allocation16_spill] sm:$0xff] %v10766_v15  ;;  %v3267_v49 = vsel %vm12018_vm6, %v10766_v15, -inf  ;;  %vm12021_vm6 = vnez %v11882_v62 }
0x2771   :  { %v9337_v13 = vpop.eup %9336 }
0x2772   :  { %v3524_v7 = vsel %vm12017_vm10, %v9337_v13, 0.0 }
0x2773   :  { %3525 = vadd.xlane.f32.xlu1 %v3524_v7 }
0x2777   :  { %3268 = vmax.xlane.f32.xlu1 %v3267_v49 }
0x2800   :  { %v3526_v46 = vpop.xlane.xlu1 %3525 }
0x2801   :  { %9338 = vrcp.f32 %v3526_v46  ;;  %v3441_v46 = vadd.f32 %v10752_v10, %v10183_v4  ;;  %v12028_v10 = vld [vmem:[#allocation6_spill] sm:$0xff] }
0x2804   :  { %v10771_v54 = vpop.xlane.xlu1 %3268 }
0x2805   :  { %12019 = vst [vmem:[#allocation17_spill] sm:$0xff] %v10771_v54  ;;  %vm3270_vm2 = vcmp.ge.f32.partialorder %v10766_v15, %v10771_v54 }
0x2806   :  { %v3271_v48 = vsel %vm3270_vm2, %v9855_v30, 32  ;;  %vm12024_vm2 = vnez %v11907_v9 }
0x2807   :  { %v3272_v34 = vsel %vm12020_vm5, %v3271_v48, 2147483647  ;;  %vm12023_vm5 = vnez %v11895_v29 }
0x2808   :  { %v3274_v44 = vshra.s32 %v3272_v34, 16  ;;  %v3273_v7 = vand.u32 65535, %v3272_v34 }
0x280a   :  { %v3276_v25 = vcvt.s32.f32 %v3274_v44  ;;  %v3275_v32 = vcvt.s32.f32 %v3273_v7 }
0x280b   :  { %v9339_v33 = vpop.eup %9338 }
0x280c   :  { %v3528_v51 = vmul.f32 %v9339_v33, %v9337_v13  ;;  %3277 = vmin.xlane.f32.xlu1 %v3276_v25  ;;  %v12026_v13 = vld [vmem:[#allocation31_spill] sm:$0xff] }
0x280e   :  { %6903 = vmatmul.mubr.msk.f32.vlgmr.msra.gmra.mrb[36].mxu1 %vm12017_vm10, %v3528_v51  ;;  %vm12025_vm10 = vnez %v11909_v31 }
0x280f   :  { %8807 = vmatpush3.bf16.msk.msra.mxu1 %vm12021_vm6, %v11853_v26 }
0x2810   :  { %8809 = vmatprep.subr.msk.bf16.mxu1 %vm12022_vm4, %v11853_v26 }
0x2813   :  { %8811 = vmatpush3.bf16.msk.msra.mxu1 %vm11976_vm13, %v11853_v26 }
0x2814   :  { %8813 = vmatprep.subr.msk.bf16.mxu1 %vm11977_vm3, %v11853_v26 }
0x2817   :  { %8815 = vmatpush3.bf16.msk.msra.mxu1 %vm11978_vm7, %v11853_v26 }
0x2818   :  { %8817 = vmatprep.subr.msk.bf16.mxu1 %vm11979_vm11, %v11853_v26 }
0x281b   :  { %8819 = vmatpush3.bf16.msk.msra.mxu1 %vm12023_vm5, %v11853_v26 }
0x281c   :  { %8821 = vmatprep.subr.msk.bf16.mxu1 %vm11981_vm14, %v11853_v26 }
0x281f   :  { %8823 = vmatpush3.bf16.msk.msra.mxu1 %vm10327_vm1, %v11853_v26  ;;  %vm12027_vm1 = vnez %v12026_v13 }
0x2820   :  { %8825 = vmatprep.subr.msk.bf16.mxu1 %vm10331_vm9, %v11853_v26  ;;  %vm12041_vm9 = vcmask 261120  }
0x2823   :  { %8827 = vmatpush3.bf16.msk.msra.mxu1 %vm10347_vm8, %v11853_v26 }
0x2824   :  { %8829 = vmatprep.subr.msk.bf16.mxu1 %vm10351_vm15, %v11853_v26  ;;  %vm12040_vm15 = vnez %v11939_v20 }
0x2827   :  { %8831 = vmatpush3.bf16.msk.msra.mxu1 %vm12024_vm2, %v11853_v26 }
0x2828   :  { %8833 = vmatprep.subr.msk.bf16.mxu1 %vm12025_vm10, %v11853_v26 }
0x282b   :  { %8835 = vmatpush3.bf16.msk.msra.mxu1 %vm12027_vm1, %v11853_v26  ;;  %vm12029_vm1 = vcmask 261120  }
0x282c   :  { %8842 = vmatprep.subr.bf16.mxu1 %v11913_v12  ;;  %vm12032_vm2 = vmmov %vm12029_vm1 }
0x2899   :  { %v3278_v39 = vpop.xlane.xlu1 %3277 }
0x289a   :  { %vm3279_vm8 = vcmp.eq.f32.partialorder %v3276_v25, %v3278_v39  ;;  %v3284_v34 = vcvt.f32.s32 %v3278_v39  ;;  %v12030_v39 = vld [vmem:[#allocation12_spill] sm:$0xff] }
0x289b   :  { %v3280_v49 = vsel %vm3279_vm8, %v3275_v32, inf  ;;  %vm12031_vm10 = vnez %v12030_v39 }
0x289c   :  { %3281 = vmin.xlane.f32.xlu1 %v3280_v49  ;;  %v3285_v7 = vshll.u32 %v3284_v34, 16  ;;  %v12033_v34 = vld [vmem:[#allocation2_spill] sm:$0xff] }
0x28ad   :  { %3830 = vrot.lane.b32.xlu1 %v3441_v46, %s9438_s7 }
0x28e1   :  { %v3598_v48 = vpop.f32.mrb[36].mxu1 }
0x28e2   :  { %v3600_v44 = vpop.f32.mrb[37].mxu1  ;;  %v3603_v51 = vmul.f32 %v3598_v48, %v10421_v11 }
0x28e3   :  { %v3604_v33 = vmul.f32 %v3600_v44, %v10418_v28 }
0x28e5   :  { %3669 = vmatprep.mubr.f32.mxu1 %v3604_v33 }
0x28e6   :  { %3670 = vmatmul.mubr.f32.vlgmr.msra.gmra.mrb[38].mxu1 %v3603_v51 }
0x28e7   :  { %8844 = vmatpush3.bf16.msra.mxu1 %v10424_v43  ;;  %8272 = vmatprep.mubr.msk.f32.mxu1 %vm11874_vm0, %v11873_v8 }
0x28e8   :  { %8845 = vmatprep.subr.bf16.mxu1 %v11913_v12 }
0x28eb   :  { %8847 = vmatpush3.bf16.msra.mxu1 %v10437_v2 }
0x28ec   :  { %8855 = vmatprep.subr.bf16.mxu1 %v12028_v10 }
0x2929   :  { %v3282_v25 = vpop.xlane.xlu1 %3281 }
0x292a   :  { %v3283_v32 = vcvt.f32.s32 %v3282_v25  ;;  %v12034_v25 = vld [vmem:[#allocation13_spill] sm:$0xff] }
0x292c   :  { %v3286_v49 = vadd.s32 %v3285_v7, %v3283_v32 }
0x292e   :  { %vm3287_vm8 = vcmp.eq.s32.totalorder %v9855_v30, %v3286_v49 }
0x292f   :  { %v6866_v48 = vsel %vm3287_vm8, 1.0, %v11873_v8  ;;  %vm12036_vm8 = vnez %v11936_v18 }
0x2930   :  { %8273 = vmatmul.mubr.msk.f32.vlgmr.msra.gmra.mrb[40].mxu1 %vm12029_vm1, %v6866_v48 }
0x2931   :  { %8857 = vmatpush1.bf16.msra.mxu1 %v11930_v59  ;;  %4025 = vmatprep.mubr.f32.mxu1 %v11873_v8 }
0x2932   :  { %8859 = vmatprep.subr.bf16.mxu1 %v11931_v3 }
0x2935   :  { %8861 = vmatpush1.bf16.msra.mxu1 %v11932_v53  ;;  %v3831_v53 = vpop.permute.xlu1 %3830 }
0x2936   :  { %8869 = vmatprep.subr.msk.bf16.mxu1 %vm12031_vm10, %v11853_v26  ;;  %vm12037_vm10 = vnez %v11937_v16 }
0x29b9   :  { %v7580_v44 = vpop.f32.mrb[38].mxu1 }
0x29ba   :  { %v7581_v33 = vpop.f32.mrb[39].mxu1 }
0x29bb   :  { %v7582_v51 = vadd.f32 %v7581_v33, %v7580_v44 }
0x29bd   :  { %8262 = vmatmul.mubr.msk.f32.vlgmr.msra.gmra.mrb[42].mxu0 %vm12032_vm2, %v7582_v51  ;;  %vm12035_vm2 = vmmov %vm12029_vm1 }
0x29be   :  { %8850 = vmatpush3.bf16.msra.mxu0 %v12033_v34  ;;  %8283 = vmatprep.mubr.msk.f32.mxu0 %vm11874_vm0, %v11873_v8 }
0x29bf   :  { %8851 = vmatprep.subr.bf16.mxu0 %v11913_v12 }
0x29c2   :  { %8853 = vmatpush3.bf16.msra.mxu0 %v12034_v25 }
0x29c3   :  { %8862 = vmatprep.subr.bf16.mxu0 %v11913_v12 }
0x2a03   :  { %v3817_v7 = vpop.f32.mrb[40].mxu1 }
0x2a04   :  { %v8274_v32 = vpop.f32.mrb[41].mxu1 }
0x2a90   :  { %v10852_v49 = vpop.f32.mrb[42].mxu0 }
0x2a91   :  { %v3818_v48 = vadd.f32 %v3817_v7, %v10852_v49  ;;  %v8263_v44 = vpop.f32.mrb[43].mxu0 }
0x2a93   :  { %v3821_v33 = vadd.f32 %v3818_v48, %v10466_v38 }
0x2a95   :  { %v3822_v51 = vadd.f32 %v3821_v33, %v3441_v46 }
0x2a97   :  { %v6938_v15 = vmul.f32 -1.442695, %v3822_v51 }
0x2a99   :  { %9340 = vpow2.f32 %v6938_v15 }
0x2aa3   :  { %v9341_v54 = vpop.eup %9340 }
0x2aa4   :  { %v3826_v34 = vadd.f32 1.0, %v9341_v54 }
0x2aa6   :  { %9342 = vrcp.f32 %v3826_v34 }
0x2ab0   :  { %v9343_v39 = vpop.eup %9342 }
0x2ab1   :  { %v3833_v25 = vmul.f32 %v9343_v39, %v3831_v53  ;;  %v3840_v7 = vsub.f32 1.0, %v9343_v39  ;;  %v3846_v46 = vmul.f32 %v9343_v39, %v10682_v56  ;;  %v12055_v53 = vld [vmem:[#allocation27_spill] sm:$0xff] }
0x2ab3   :  { %3835 = vrot.lane.b32.xlu0 %v3833_v25, %s9438_s7 }
0x2b25   :  { %v3836_v3 = vpop.permute.xlu0 %3835 }
0x2b26   :  { %v3838_v32 = vadd.f32 %v3836_v3, %v3821_v33  ;;  %v12053_v3 = vld [vmem:[#allocation26_spill] sm:$0xff] }
0x2b28   :  { %9344 = vtanh.f32 %v3838_v32 }
0x2b32   :  { %v9345_v59 = vpop.eup %9344 }
0x2b33   :  { %3842 = vrot.lane.b32.xlu0 %v9345_v59, %s9439_s8  ;;  %v12051_v59 = vld [vmem:[#allocation25_spill] sm:$0xff] }
0x2ba5   :  { %v3843_v44 = vpop.permute.xlu0 %3842 }
0x2ba6   :  { %v3845_v48 = vmul.f32 %v3843_v44, %v3840_v7 }
0x2ba8   :  { %v10859_v15 = vadd.f32 %v3846_v46, %v3845_v48  ;;  %v12057_v48 = vld [vmem:[#allocation30_spill] sm:$0xff] }
0x2baa   :  { %3849 = vrot.lane.b32.xlu0 %v10859_v15, %s9439_s8 }
0x2c1c   :  { %v3850_v54 = vpop.permute.xlu0 %3849 }
0x2c1d   :  { %8284 = vmatmul.mubr.msk.f32.vlgmr.msra.gmra.mrb[44].mxu0 %vm12029_vm1, %v3850_v54  ;;  %6941 = vmatmul.mubr.msk.f32.vlgmr.msra.gmra.mrb[42].mxu1 %vm12035_vm2, %v3850_v54  ;;  %vm12038_vm1 = vnez %v11938_v24  ;;  %vm12039_vm2 = vnez %v11876_v5 }
0x2c1e   :  { %8864 = vmatpush3.bf16.msra.mxu0 %v11966_v36  ;;  %8294 = vmatprep.mubr.msk.f32.mxu0 %vm11874_vm0, %v11873_v8 }
0x2c1f   :  { %8865 = vmatprep.subr.bf16.mxu0 %v11913_v12  ;;  %8871 = vmatpush3.bf16.msk.msra.mxu1 %vm12036_vm8, %v11853_v26  ;;  %vm12042_vm8 = vnez %v11878_v60 }
0x2c20   :  { %8873 = vmatprep.subr.msk.bf16.mxu1 %vm12037_vm10, %v11853_v26  ;;  %vm12043_vm10 = vnez %v11940_v55 }
0x2c22   :  { %8867 = vmatpush3.bf16.msra.mxu0 %v11967_v21 }
0x2c23   :  { %8875 = vmatpush3.bf16.msk.msra.mxu1 %vm12038_vm1, %v11853_v26  ;;  %6975 = vmatprep.subr.msk.mxu0 %vm12039_vm2, %v11968_v57  ;;  %vm12044_vm1 = vnez %v11880_v61  ;;  %vm12045_vm2 = vnez %v11942_v27 }
0x2c24   :  { %8877 = vmatprep.subr.msk.bf16.mxu1 %vm12040_vm15, %v11853_v26  ;;  %vm12048_vm15 = vnez %v11948_v19 }
0x2c25   :  { %8295 = vmatmul.mubr.msk.f32.vlgmr.msra.gmra.mrb[46].mxu0 %vm12041_vm9, %v3850_v54  ;;  %vm12046_vm9 = vnez %v11944_v6 }
0x2c26   :  { %6976 = vmatpush1.msk.msra.mxu0 %vm12042_vm8, %v11968_v57  ;;  %4257 = vmatprep.mubr.f32.mxu0 %v11873_v8  ;;  %vm12047_vm8 = vnez %v11946_v42 }
0x2c27   :  { %8879 = vmatpush3.bf16.msk.msra.mxu1 %vm12043_vm10, %v11853_v26  ;;  %8901 = vmatprep.subr.msk.bf16.mxu0 %vm12044_vm1, %v11853_v26  ;;  %vm12049_vm1 = vnez %v11952_v14  ;;  %v12190_v14 = vld [vmem:[#allocation3_spill] sm:$0xff] }
0x2c28   :  { %8881 = vmatprep.subr.msk.bf16.mxu1 %vm12045_vm2, %v11853_v26  ;;  %vm12050_vm2 = vnez %v11954_v40 }
0x2c2b   :  { %8883 = vmatpush3.bf16.msk.msra.mxu1 %vm12046_vm9, %v11853_v26  ;;  %vm12052_vm9 = vnez %v12051_v59 }
0x2c2c   :  { %8885 = vmatprep.subr.msk.bf16.mxu1 %vm12047_vm8, %v11853_v26  ;;  %vm12054_vm8 = vnez %v12053_v3  ;;  %v12058_v3 = vld [vmem:[#allocation32_spill] sm:$0xff] }
0x2c2f   :  { %8887 = vmatpush3.bf16.msk.msra.mxu1 %vm12048_vm15, %v11853_v26  ;;  %vm12056_vm15 = vnez %v12055_v53 }
0x2c30   :  { %8889 = vmatprep.subr.msk.bf16.mxu1 %vm12002_vm12, %v11853_v26 }
0x2c33   :  { %8891 = vmatpush3.bf16.msk.msra.mxu1 %vm12049_vm1, %v11853_v26 }
0x2c34   :  { %8893 = vmatprep.subr.msk.bf16.mxu1 %vm12050_vm2, %v11853_v26 }
0x2c37   :  { %8895 = vmatpush3.bf16.msk.msra.mxu1 %vm12052_vm9, %v11853_v26  ;;  %vm12063_vm9 = vcmask 261120  }
0x2c38   :  { %8897 = vmatprep.subr.msk.bf16.mxu1 %vm12054_vm8, %v11853_v26  ;;  %vm12065_vm2 = vmmov %vm12063_vm9 }
0x2c3b   :  { %8899 = vmatpush3.bf16.msk.msra.mxu1 %vm12056_vm15, %v11853_v26  ;;  %vm12060_vm15 = vcmask 64512  }
0x2c3c   :  { %8932 = vmatprep.subr.bf16.mxu1 %v11913_v12  ;;  %vm12062_vm8 = vmmov %vm12060_vm15 }
0x2cf0   :  { %v3923_v56 = vpop.f32.mrb[44].mxu0  ;;  %v4027_v39 = vpop.f32.mrb[42].mxu1 }
0x2cf1   :  { %v4103_v34 = vadd.f32 %v4027_v39, %v12010_v17  ;;  %v8285_v25 = vpop.f32.mrb[45].mxu0  ;;  %v4029_v33 = vpop.f32.mrb[43].mxu1  ;;  %v12059_v39 = vld [vmem:[#allocation3_spill] sm:$0xff] }
0x2cf2   :  { %v4104_v51 = vadd.f32 %v4029_v33, %v12011_v41 }
0x2cf3   :  { %9346 = vtanh.f32 %v4103_v34 }
0x2cf4   :  { %9348 = vtanh.f32 %v4104_v51 }
0x2cf8   :  { %v10929_v32 = vpop.f32.mrb[46].mxu0 }
0x2cf9   :  { %v8296_v7 = vpop.f32.mrb[47].mxu0 }
0x2cfd   :  { %v9347_v44 = vpop.eup %9346 }
0x2cfe   :  { %v9349_v46 = vpop.eup %9348  ;;  %v4107_v53 = vmul.f32 %v9347_v44, %v12057_v48 }
0x2cff   :  { %v4108_v54 = vmul.f32 %v9349_v46, %v12057_v48 }
0x2d01   :  { %4173 = vmatprep.mubr.f32.mxu1 %v4108_v54 }
0x2d02   :  { %4174 = vmatmul.mubr.f32.vlgmr.msra.gmra.mrb[44].mxu1 %v4107_v53 }
0x2d03   :  { %8934 = vmatpush3.bf16.msra.mxu1 %v12058_v3  ;;  %8305 = vmatprep.mubr.msk.f32.mxu1 %vm11874_vm0, %v11873_v8 }
0x2d04   :  { %8935 = vmatprep.subr.bf16.mxu1 %v11913_v12 }
0x2d07   :  { %8937 = vmatpush3.bf16.msra.mxu1 %v12059_v39 }
0x2d08   :  { %8944 = vmatprep.subr.bf16.mxu1 %v11913_v12 }
0x2dd5   :  { %v7635_v34 = vpop.f32.mrb[44].mxu1 }
0x2dd6   :  { %v7636_v25 = vpop.f32.mrb[45].mxu1 }
0x2dd7   :  { %v7637_v33 = vadd.f32 %v7636_v25, %v7635_v34 }
0x2dd9   :  { %v4179_v51 = vsel %vm12060_vm15, %v7637_v33, -inf }
0x2dda   :  { %4180 = vmax.xlane.f32.xlu0 %v4179_v51 }
0x2df0   :  { %3852 = vrot.lane.b32.xlu0 %v10852_v49, %s9440_s28 }
0x2e67   :  { %v4181_v53 = vpop.xlane.xlu0 %4180 }
0x2e68   :  { %v4182_v7 = vsub.f32 %v7637_v33, %v4181_v53 }
0x2e6a   :  { %v4183_v44 = vmul.f32 1.442695, %v4182_v7 }
0x2e6b   :  { %v3853_v46 = vpop.permute.xlu0 %3852 }
0x2e6c   :  { %9350 = vpow2.f32 %v4183_v44  ;;  %v3924_v54 = vadd.f32 %v3923_v56, %v3853_v46 }
0x2e6e   :  { %v10943_v39 = vadd.f32 %v3924_v54, %v10635_v1 }
0x2e70   :  { %12061 = vst [vmem:[#allocation18_spill] sm:$0xff] %v10943_v39  ;;  %v3928_v34 = vsel %vm12063_vm9, %v10943_v39, -inf  ;;  %vm12067_vm9 = vnez %v11901_v47 }
0x2e76   :  { %v9351_v3 = vpop.eup %9350 }
0x2e77   :  { %v4185_v48 = vsel %vm12062_vm8, %v9351_v3, 0.0 }
0x2e78   :  { %4186 = vadd.xlane.f32.xlu1 %v4185_v48 }
0x2e7c   :  { %3929 = vmax.xlane.f32.xlu1 %v3928_v34  ;;  %v4102_v34 = vadd.f32 %v10929_v32, %v10183_v4 }
0x2f05   :  { %v4187_v25 = vpop.xlane.xlu1 %4186 }
0x2f06   :  { %9352 = vrcp.f32 %v4187_v25 }
0x2f09   :  { %v10948_v49 = vpop.xlane.xlu1 %3929 }
0x2f0a   :  { %12064 = vst [vmem:[#allocation19_spill] sm:$0xff] %v10948_v49  ;;  %vm3931_vm15 = vcmp.ge.f32.partialorder %v10943_v39, %v10948_v49 }
0x2f0b   :  { %v3932_v56 = vsel %vm3931_vm15, %v9855_v30, 32  ;;  %vm12068_vm15 = vnez %v11903_v58 }
0x2f0c   :  { %v3933_v33 = vsel %vm12065_vm2, %v3932_v56, 2147483647  ;;  %vm12066_vm2 = vnez %v11899_v45 }
0x2f0d   :  { %v3935_v51 = vshra.s32 %v3933_v33, 16 }
0x2f0f   :  { %v3937_v53 = vcvt.s32.f32 %v3935_v51 }
0x2f10   :  { %v9353_v7 = vpop.eup %9352 }
0x2f11   :  { %v4189_v44 = vmul.f32 %v9353_v7, %v9351_v3  ;;  %3938 = vmin.xlane.f32.xlu1 %v3937_v53  ;;  %v3934_v3 = vand.u32 65535, %v3933_v33 }
0x2f13   :  { %6977 = vmatmul.mubr.msk.f32.vlgmr.msra.gmra.mrb[48].mxu0 %vm12062_vm8, %v4189_v44  ;;  %vm12069_vm8 = vnez %v11905_v37  ;;  %v3936_v46 = vcvt.s32.f32 %v3934_v3 }
0x2f14   :  { %8903 = vmatpush3.bf16.msk.msra.mxu0 %vm12021_vm6, %v11853_v26 }
0x2f15   :  { %8905 = vmatprep.subr.msk.bf16.mxu0 %vm12022_vm4, %v11853_v26 }
0x2f18   :  { %8907 = vmatpush3.bf16.msk.msra.mxu0 %vm11976_vm13, %v11853_v26 }
0x2f19   :  { %8909 = vmatprep.subr.msk.bf16.mxu0 %vm11977_vm3, %v11853_v26 }
0x2f1c   :  { %8911 = vmatpush3.bf16.msk.msra.mxu0 %vm11978_vm7, %v11853_v26 }
0x2f1d   :  { %8913 = vmatprep.subr.msk.bf16.mxu0 %vm11979_vm11, %v11853_v26 }
0x2f20   :  { %8915 = vmatpush3.bf16.msk.msra.mxu0 %vm12023_vm5, %v11853_v26  ;;  %vm12070_vm5 = vnez %v11907_v9 }
0x2f21   :  { %8917 = vmatprep.subr.msk.bf16.mxu0 %vm11981_vm14, %v11853_v26  ;;  %vm12071_vm14 = vnez %v11909_v31 }
0x2f24   :  { %8919 = vmatpush3.bf16.msk.msra.mxu0 %vm12066_vm2, %v11853_v26  ;;  %vm12072_vm2 = vnez %v12026_v13 }
0x2f25   :  { %8921 = vmatprep.subr.msk.bf16.mxu0 %vm12067_vm9, %v11853_v26  ;;  %vm12088_vm9 = vcmask 261120  }
0x2f28   :  { %8923 = vmatpush3.bf16.msk.msra.mxu0 %vm12068_vm15, %v11853_v26 }
0x2f29   :  { %8925 = vmatprep.subr.msk.bf16.mxu0 %vm12069_vm8, %v11853_v26  ;;  %vm12087_vm8 = vnez %v11939_v20 }
0x2f2c   :  { %8927 = vmatpush3.bf16.msk.msra.mxu0 %vm12070_vm5, %v11853_v26 }
0x2f2d   :  { %8929 = vmatprep.subr.msk.bf16.mxu0 %vm12071_vm14, %v11853_v26 }
0x2f30   :  { %8931 = vmatpush3.bf16.msk.msra.mxu0 %vm12072_vm2, %v11853_v26  ;;  %vm12073_vm2 = vcmask 261120  }
0x2f31   :  { %8938 = vmatprep.subr.bf16.mxu0 %v11913_v12  ;;  %vm12079_vm5 = vmmov %vm12073_vm2 }
0x2f9e   :  { %v3939_v48 = vpop.xlane.xlu1 %3938 }
0x2f9f   :  { %vm3940_vm15 = vcmp.eq.f32.partialorder %v3937_v53, %v3939_v48  ;;  %v3945_v32 = vcvt.f32.s32 %v3939_v48  ;;  %v12077_v48 = vld [vmem:[#allocation12_spill] sm:$0xff] }
0x2fa0   :  { %v3941_v54 = vsel %vm3940_vm15, %v3936_v46, inf  ;;  %vm12078_vm14 = vnez %v12077_v48 }
0x2fa1   :  { %3942 = vmin.xlane.f32.xlu1 %v3941_v54  ;;  %v3946_v53 = vshll.u32 %v3945_v32, 16  ;;  %v12074_v54 = vld [vmem:[#allocation7_spill] sm:$0xff] }
0x2fb2   :  { %4491 = vrot.lane.b32.xlu1 %v4102_v34, %s9438_s7 }
0x2fe6   :  { %v4259_v25 = vpop.f32.mrb[48].mxu0 }
0x2fe7   :  { %v4261_v56 = vpop.f32.mrb[49].mxu0  ;;  %v4264_v7 = vmul.f32 %v4259_v25, %v10421_v11  ;;  %v12075_v25 = vld [vmem:[#allocation8_spill] sm:$0xff] }
0x2fe8   :  { %v4265_v51 = vmul.f32 %v4261_v56, %v10418_v28  ;;  %v12076_v56 = vld [vmem:[#allocation9_spill] sm:$0xff] }
0x2fea   :  { %4330 = vmatprep.mubr.f32.mxu0 %v4265_v51 }
0x2feb   :  { %4331 = vmatmul.mubr.f32.vlgmr.msra.gmra.mrb[50].mxu0 %v4264_v7 }
0x2fec   :  { %8940 = vmatpush3.bf16.msra.mxu0 %v10424_v43  ;;  %8316 = vmatprep.mubr.msk.f32.mxu0 %vm11874_vm0, %v11873_v8 }
0x2fed   :  { %8941 = vmatprep.subr.bf16.mxu0 %v11913_v12 }
0x2ff0   :  { %8943 = vmatpush3.bf16.msra.mxu0 %v10437_v2 }
0x2ff1   :  { %8951 = vmatprep.subr.bf16.mxu0 %v12028_v10 }
0x302e   :  { %v3943_v33 = vpop.xlane.xlu1 %3942 }
0x302f   :  { %v3944_v44 = vcvt.f32.s32 %v3943_v33  ;;  %v12080_v33 = vld [vmem:[#allocation2_spill] sm:$0xff] }
0x3031   :  { %v3947_v3 = vadd.s32 %v3946_v53, %v3944_v44  ;;  %v12081_v53 = vld [vmem:[#allocation13_spill] sm:$0xff] }
0x3033   :  { %vm3948_vm15 = vcmp.eq.s32.totalorder %v9855_v30, %v3947_v3 }
0x3034   :  { %v6940_v46 = vsel %vm3948_vm15, 1.0, %v11873_v8  ;;  %vm12083_vm15 = vnez %v11936_v18 }
0x3035   :  { %8317 = vmatmul.mubr.msk.f32.vlgmr.msra.gmra.mrb[52].mxu0 %vm12073_vm2, %v6940_v46 }
0x3036   :  { %8953 = vmatpush1.bf16.msra.mxu0 %v12074_v54  ;;  %4686 = vmatprep.mubr.f32.mxu0 %v11873_v8 }
0x3037   :  { %8955 = vmatprep.subr.bf16.mxu0 %v12075_v25  ;;  %v4492_v25 = vpop.permute.xlu1 %4491 }
0x303a   :  { %8957 = vmatpush1.bf16.msra.mxu0 %v12076_v56 }
0x303b   :  { %8965 = vmatprep.subr.msk.bf16.mxu0 %vm12078_vm14, %v11853_v26  ;;  %vm12084_vm14 = vnez %v11937_v16 }
0x30be   :  { %v7670_v51 = vpop.f32.mrb[50].mxu0 }
0x30bf   :  { %v7671_v7 = vpop.f32.mrb[51].mxu0 }
0x30c0   :  { %v7672_v32 = vadd.f32 %v7671_v7, %v7670_v51 }
0x30c2   :  { %8306 = vmatmul.mubr.msk.f32.vlgmr.msra.gmra.mrb[46].mxu1 %vm12079_vm5, %v7672_v32  ;;  %vm12082_vm5 = vmmov %vm12073_vm2 }
0x30c3   :  { %8946 = vmatpush3.bf16.msra.mxu1 %v12080_v33  ;;  %8327 = vmatprep.mubr.msk.f32.mxu1 %vm11874_vm0, %v11873_v8 }
0x30c4   :  { %8947 = vmatprep.subr.bf16.mxu1 %v11913_v12 }
0x30c7   :  { %8949 = vmatpush3.bf16.msra.mxu1 %v12081_v53 }
0x30c8   :  { %8958 = vmatprep.subr.bf16.mxu1 %v11913_v12 }
0x3108   :  { %v4478_v44 = vpop.f32.mrb[52].mxu0 }
0x3109   :  { %v8318_v3 = vpop.f32.mrb[53].mxu0 }
0x3195   :  { %v11029_v46 = vpop.f32.mrb[46].mxu1 }
0x3196   :  { %v4479_v39 = vadd.f32 %v4478_v44, %v11029_v46  ;;  %v8307_v51 = vpop.f32.mrb[47].mxu1 }
0x3198   :  { %v4482_v7 = vadd.f32 %v4479_v39, %v10466_v38 }
0x319a   :  { %v4483_v32 = vadd.f32 %v4482_v7, %v4102_v34 }
0x319c   :  { %v7012_v49 = vmul.f32 -1.442695, %v4483_v32 }
0x319e   :  { %9354 = vpow2.f32 %v7012_v49 }
0x31a8   :  { %v9355_v33 = vpop.eup %9354 }
0x31a9   :  { %v4487_v48 = vadd.f32 1.0, %v9355_v33 }
0x31ab   :  { %9356 = vrcp.f32 %v4487_v48 }
0x31b5   :  { %v9357_v56 = vpop.eup %9356 }
0x31b6   :  { %v4494_v53 = vmul.f32 %v9357_v56, %v4492_v25  ;;  %v4501_v44 = vsub.f32 1.0, %v9357_v56  ;;  %v4507_v39 = vmul.f32 %v9357_v56, %v10859_v15  ;;  %v12099_v15 = vld [vmem:[#allocation27_spill] sm:$0xff] }
0x31b8   :  { %4496 = vrot.lane.b32.xlu0 %v4494_v53, %s9438_s7 }
0x322a   :  { %v4497_v54 = vpop.permute.xlu0 %4496 }
0x322b   :  { %v4499_v3 = vadd.f32 %v4497_v54, %v4482_v7 }
0x322d   :  { %9358 = vtanh.f32 %v4499_v3 }
0x3237   :  { %v9359_v10 = vpop.eup %9358 }
0x3238   :  { %4503 = vrot.lane.b32.xlu0 %v9359_v10, %s9439_s8  ;;  %v12097_v10 = vld [vmem:[#allocation26_spill] sm:$0xff] }
0x32aa   :  { %v4504_v51 = vpop.permute.xlu0 %4503 }
0x32ab   :  { %v4506_v34 = vmul.f32 %v4504_v51, %v4501_v44 }
0x32ad   :  { %v11036_v49 = vadd.f32 %v4507_v39, %v4506_v34  ;;  %v12101_v39 = vld [vmem:[#allocation30_spill] sm:$0xff] }
0x32af   :  { %4510 = vrot.lane.b32.xlu0 %v11036_v49, %s9439_s8 }
0x3321   :  { %v4511_v48 = vpop.permute.xlu0 %4510 }
0x3322   :  { %8328 = vmatmul.mubr.msk.f32.vlgmr.msra.gmra.mrb[48].mxu1 %vm12082_vm5, %v4511_v48  ;;  %7015 = vmatmul.mubr.msk.f32.vlgmr.msra.gmra.mrb[54].mxu0 %vm12073_vm2, %v4511_v48  ;;  %vm12085_vm5 = vnez %v11938_v24  ;;  %vm12086_vm2 = vnez %v11876_v5 }
0x3323   :  { %8960 = vmatpush3.bf16.msra.mxu1 %v11966_v36  ;;  %8338 = vmatprep.mubr.msk.f32.mxu1 %vm11874_vm0, %v11873_v8 }
0x3324   :  { %8961 = vmatprep.subr.bf16.mxu1 %v11913_v12  ;;  %8967 = vmatpush3.bf16.msk.msra.mxu0 %vm12083_vm15, %v11853_v26  ;;  %vm12089_vm15 = vnez %v11878_v60 }
0x3325   :  { %8969 = vmatprep.subr.msk.bf16.mxu0 %vm12084_vm14, %v11853_v26 }
0x3327   :  { %8963 = vmatpush3.bf16.msra.mxu1 %v11967_v21 }
0x3328   :  { %8971 = vmatpush3.bf16.msk.msra.mxu0 %vm12085_vm5, %v11853_v26  ;;  %7049 = vmatprep.subr.msk.mxu1 %vm12086_vm2, %v11968_v57  ;;  %vm12090_vm5 = vnez %v11880_v61  ;;  %vm12091_vm2 = vnez %v11942_v27 }
0x3329   :  { %8973 = vmatprep.subr.msk.bf16.mxu0 %vm12087_vm8, %v11853_v26  ;;  %vm12094_vm8 = vnez %v11948_v19 }
0x332a   :  { %8339 = vmatmul.mubr.msk.f32.vlgmr.msra.gmra.mrb[50].mxu1 %vm12088_vm9, %v4511_v48  ;;  %vm12092_vm9 = vnez %v11944_v6 }
0x332b   :  { %7050 = vmatpush1.msk.msra.mxu1 %vm12089_vm15, %v11968_v57  ;;  %4918 = vmatprep.mubr.f32.mxu1 %v11873_v8  ;;  %vm12093_vm15 = vnez %v11946_v42 }
0x332c   :  { %8975 = vmatpush3.bf16.msk.msra.mxu0 %vm12043_vm10, %v11853_v26  ;;  %8997 = vmatprep.subr.msk.bf16.mxu1 %vm12090_vm5, %v11853_v26 }
0x332d   :  { %8977 = vmatprep.subr.msk.bf16.mxu0 %vm12091_vm2, %v11853_v26  ;;  %vm12095_vm2 = vnez %v11954_v40 }
0x3330   :  { %8979 = vmatpush3.bf16.msk.msra.mxu0 %vm12092_vm9, %v11853_v26  ;;  %vm12096_vm9 = vnez %v12051_v59 }
0x3331   :  { %8981 = vmatprep.subr.msk.bf16.mxu0 %vm12093_vm15, %v11853_v26  ;;  %vm12098_vm15 = vnez %v12097_v10 }
0x3334   :  { %8983 = vmatpush3.bf16.msk.msra.mxu0 %vm12094_vm8, %v11853_v26  ;;  %vm12100_vm8 = vnez %v12099_v15  ;;  %v12102_v15 = vld [vmem:[#allocation32_spill] sm:$0xff] }
0x3335   :  { %8985 = vmatprep.subr.msk.bf16.mxu0 %vm12002_vm12, %v11853_v26 }
0x3338   :  { %8987 = vmatpush3.bf16.msk.msra.mxu0 %vm12049_vm1, %v11853_v26 }
0x3339   :  { %8989 = vmatprep.subr.msk.bf16.mxu0 %vm12095_vm2, %v11853_v26 }
0x333c   :  { %8991 = vmatpush3.bf16.msk.msra.mxu0 %vm12096_vm9, %v11853_v26  ;;  %vm12107_vm9 = vcmask 261120  }
0x333d   :  { %8993 = vmatprep.subr.msk.bf16.mxu0 %vm12098_vm15, %v11853_v26  ;;  %vm12109_vm2 = vmmov %vm12107_vm9 }
0x3340   :  { %8995 = vmatpush3.bf16.msk.msra.mxu0 %vm12100_vm8, %v11853_v26  ;;  %vm12104_vm8 = vcmask 64512  }
0x3341   :  { %9028 = vmatprep.subr.bf16.mxu0 %v11913_v12  ;;  %vm12106_vm15 = vmmov %vm12104_vm8 }
0x33f5   :  { %v4584_v54 = vpop.f32.mrb[48].mxu1  ;;  %v4688_v25 = vpop.f32.mrb[54].mxu0 }
0x33f6   :  { %v4764_v56 = vadd.f32 %v4688_v25, %v12010_v17  ;;  %v8329_v33 = vpop.f32.mrb[49].mxu1  ;;  %v4690_v53 = vpop.f32.mrb[55].mxu0  ;;  %v12103_v25 = vld [vmem:[#allocation3_spill] sm:$0xff] }
0x33f7   :  { %v4765_v7 = vadd.f32 %v4690_v53, %v12011_v41 }
0x33f8   :  { %9360 = vtanh.f32 %v4764_v56 }
0x33f9   :  { %9362 = vtanh.f32 %v4765_v7 }
0x33fd   :  { %v11106_v32 = vpop.f32.mrb[50].mxu1 }
0x33fe   :  { %v8340_v3 = vpop.f32.mrb[51].mxu1 }
0x3402   :  { %v9361_v44 = vpop.eup %9360 }
0x3403   :  { %v9363_v51 = vpop.eup %9362  ;;  %v4768_v48 = vmul.f32 %v9361_v44, %v12101_v39 }
0x3404   :  { %v4769_v34 = vmul.f32 %v9363_v51, %v12101_v39 }
0x3406   :  { %4834 = vmatprep.mubr.f32.mxu0 %v4769_v34 }
0x3407   :  { %4835 = vmatmul.mubr.f32.vlgmr.msra.gmra.mrb[56].mxu0 %v4768_v48 }
0x3408   :  { %9030 = vmatpush3.bf16.msra.mxu0 %v12102_v15  ;;  %8349 = vmatprep.mubr.msk.f32.mxu0 %vm11874_vm0, %v11873_v8 }
0x3409   :  { %9031 = vmatprep.subr.bf16.mxu0 %v11913_v12 }
0x340c   :  { %9033 = vmatpush3.bf16.msra.mxu0 %v12103_v25 }
0x340d   :  { %9040 = vmatprep.subr.bf16.mxu0 %v11913_v12 }
0x34da   :  { %v7725_v56 = vpop.f32.mrb[56].mxu0 }
0x34db   :  { %v7726_v33 = vpop.f32.mrb[57].mxu0 }
0x34dc   :  { %v7727_v53 = vadd.f32 %v7726_v33, %v7725_v56 }
0x34de   :  { %v4840_v7 = vsel %vm12104_vm8, %v7727_v53, -inf }
0x34df   :  { %4841 = vmax.xlane.f32.xlu0 %v4840_v7 }
0x34f5   :  { %4513 = vrot.lane.b32.xlu0 %v11029_v46, %s9440_s28 }
0x356c   :  { %v4842_v3 = vpop.xlane.xlu0 %4841 }
0x356d   :  { %v4843_v44 = vsub.f32 %v7727_v53, %v4842_v3 }
0x356f   :  { %v4844_v51 = vmul.f32 1.442695, %v4843_v44 }
0x3570   :  { %v4514_v34 = vpop.permute.xlu0 %4513 }
0x3571   :  { %9364 = vpow2.f32 %v4844_v51  ;;  %v4585_v48 = vadd.f32 %v4584_v54, %v4514_v34 }
0x3573   :  { %v11120_v25 = vadd.f32 %v4585_v48, %v10635_v1 }
0x3575   :  { %12105 = vst [vmem:[#allocation20_spill] sm:$0xff] %v11120_v25  ;;  %v4589_v56 = vsel %vm12107_vm9, %v11120_v25, -inf  ;;  %vm12111_vm9 = vnez %v11897_v35 }
0x357b   :  { %v9365_v15 = vpop.eup %9364 }
0x357c   :  { %v4846_v39 = vsel %vm12106_vm15, %v9365_v15, 0.0 }
0x357d   :  { %4847 = vadd.xlane.f32.xlu1 %v4846_v39 }
0x3581   :  { %4590 = vmax.xlane.f32.xlu1 %v4589_v56  ;;  %v4763_v56 = vadd.f32 %v11106_v32, %v10183_v4  ;;  %v12119_v32 = vld [vmem:[#allocation6_spill] sm:$0xff] }
0x360a   :  { %v4848_v33 = vpop.xlane.xlu1 %4847 }
0x360b   :  { %9366 = vrcp.f32 %v4848_v33 }
0x360e   :  { %v11125_v46 = vpop.xlane.xlu1 %4590 }
0x360f   :  { %12108 = vst [vmem:[#allocation21_spill] sm:$0xff] %v11125_v46  ;;  %vm4592_vm8 = vcmp.ge.f32.partialorder %v11120_v25, %v11125_v46 }
0x3610   :  { %v4593_v54 = vsel %vm4592_vm8, %v9855_v30, 32  ;;  %vm12112_vm8 = vnez %v11899_v45 }
0x3611   :  { %v4594_v53 = vsel %vm12109_vm2, %v4593_v54, 2147483647  ;;  %vm12110_vm2 = vnez %v11895_v29 }
0x3612   :  { %v4596_v7 = vshra.s32 %v4594_v53, 16 }
0x3614   :  { %v4598_v3 = vcvt.s32.f32 %v4596_v7 }
0x3615   :  { %v9367_v44 = vpop.eup %9366 }
0x3616   :  { %v4850_v51 = vmul.f32 %v9367_v44, %v9365_v15  ;;  %4599 = vmin.xlane.f32.xlu1 %v4598_v3  ;;  %v4595_v15 = vand.u32 65535, %v4594_v53 }
0x3618   :  { %7051 = vmatmul.mubr.msk.f32.vlgmr.msra.gmra.mrb[52].mxu1 %vm12106_vm15, %v4850_v51  ;;  %vm12113_vm15 = vnez %v11901_v47  ;;  %v4597_v34 = vcvt.s32.f32 %v4595_v15  ;;  %v12207_v47 = vld [vmem:[#allocation4_spill] sm:$0xff] }
0x3619   :  { %8999 = vmatpush3.bf16.msk.msra.mxu1 %vm12021_vm6, %v11853_v26 }
0x361a   :  { %9001 = vmatprep.subr.msk.bf16.mxu1 %vm12022_vm4, %v11853_v26 }
0x361d   :  { %9003 = vmatpush3.bf16.msk.msra.mxu1 %vm11976_vm13, %v11853_v26 }
0x361e   :  { %9005 = vmatprep.subr.msk.bf16.mxu1 %vm11977_vm3, %v11853_v26 }
0x3621   :  { %9007 = vmatpush3.bf16.msk.msra.mxu1 %vm11978_vm7, %v11853_v26  ;;  %vm12114_vm7 = vnez %v11903_v58 }
0x3622   :  { %9009 = vmatprep.subr.msk.bf16.mxu1 %vm11979_vm11, %v11853_v26  ;;  %vm12115_vm11 = vnez %v11905_v37 }
0x3625   :  { %9011 = vmatpush3.bf16.msk.msra.mxu1 %vm12110_vm2, %v11853_v26  ;;  %vm12116_vm2 = vnez %v11907_v9 }
0x3626   :  { %9013 = vmatprep.subr.msk.bf16.mxu1 %vm12111_vm9, %v11853_v26  ;;  %vm12117_vm9 = vnez %v11909_v31 }
0x3629   :  { %9015 = vmatpush3.bf16.msk.msra.mxu1 %vm12112_vm8, %v11853_v26  ;;  %vm12118_vm8 = vnez %v12026_v13 }
0x362a   :  { %9017 = vmatprep.subr.msk.bf16.mxu1 %vm12113_vm15, %v11853_v26 }
0x362d   :  { %9019 = vmatpush3.bf16.msk.msra.mxu1 %vm12114_vm7, %v11853_v26 }
0x362e   :  { %9021 = vmatprep.subr.msk.bf16.mxu1 %vm12115_vm11, %v11853_v26  ;;  %vm12134_vm11 = vcmask 261120  }
0x3631   :  { %9023 = vmatpush3.bf16.msk.msra.mxu1 %vm12116_vm2, %v11853_v26 }
0x3632   :  { %9025 = vmatprep.subr.msk.bf16.mxu1 %vm12117_vm9, %v11853_v26 }
0x3635   :  { %9027 = vmatpush3.bf16.msk.msra.mxu1 %vm12118_vm8, %v11853_v26  ;;  %vm12120_vm8 = vcmask 261120  }
0x3636   :  { %9034 = vmatprep.subr.bf16.mxu1 %v11913_v12  ;;  %vm12126_vm2 = vmmov %vm12120_vm8 }
0x36a3   :  { %v4600_v39 = vpop.xlane.xlu1 %4599 }
0x36a4   :  { %vm4601_vm7 = vcmp.eq.f32.partialorder %v4598_v3, %v4600_v39  ;;  %v4606_v53 = vcvt.f32.s32 %v4600_v39  ;;  %v12124_v39 = vld [vmem:[#allocation12_spill] sm:$0xff] }
0x36a5   :  { %v4602_v48 = vsel %vm4601_vm7, %v4597_v34, inf  ;;  %vm12125_vm9 = vnez %v12124_v39 }
0x36a6   :  { %4603 = vmin.xlane.f32.xlu1 %v4602_v48  ;;  %v4607_v51 = vshll.u32 %v4606_v53, 16 }
0x36b7   :  { %5152 = vrot.lane.b32.xlu1 %v4763_v56, %s9438_s7 }
0x36eb   :  { %v4920_v33 = vpop.f32.mrb[52].mxu1 }
0x36ec   :  { %v4922_v54 = vpop.f32.mrb[53].mxu1  ;;  %v4925_v44 = vmul.f32 %v4920_v33, %v10421_v11  ;;  %v12121_v33 = vld [vmem:[#allocation7_spill] sm:$0xff] }
0x36ed   :  { %v4926_v7 = vmul.f32 %v4922_v54, %v10418_v28  ;;  %v12122_v54 = vld [vmem:[#allocation8_spill] sm:$0xff] }
0x36ef   :  { %4991 = vmatprep.mubr.f32.mxu1 %v4926_v7  ;;  %v12123_v7 = vld [vmem:[#allocation9_spill] sm:$0xff] }
0x36f0   :  { %4992 = vmatmul.mubr.f32.vlgmr.msra.gmra.mrb[54].mxu1 %v4925_v44 }
0x36f1   :  { %9036 = vmatpush3.bf16.msra.mxu1 %v10424_v43  ;;  %8360 = vmatprep.mubr.msk.f32.mxu1 %vm11874_vm0, %v11873_v8 }
0x36f2   :  { %9037 = vmatprep.subr.bf16.mxu1 %v11913_v12 }
0x36f5   :  { %9039 = vmatpush3.bf16.msra.mxu1 %v10437_v2 }
0x36f6   :  { %9047 = vmatprep.subr.bf16.mxu1 %v12119_v32 }
0x3733   :  { %v4604_v3 = vpop.xlane.xlu1 %4603 }
0x3734   :  { %v4605_v15 = vcvt.f32.s32 %v4604_v3 }
0x3736   :  { %v4608_v34 = vadd.s32 %v4607_v51, %v4605_v15  ;;  %v12127_v51 = vld [vmem:[#allocation2_spill] sm:$0xff]  ;;  %v12128_v15 = vld [vmem:[#allocation13_spill] sm:$0xff] }
0x3738   :  { %vm4609_vm7 = vcmp.eq.s32.totalorder %v9855_v30, %v4608_v34 }
0x3739   :  { %v7014_v48 = vsel %vm4609_vm7, 1.0, %v11873_v8  ;;  %vm12130_vm7 = vnez %v11936_v18 }
0x373a   :  { %8361 = vmatmul.mubr.msk.f32.vlgmr.msra.gmra.mrb[56].mxu1 %vm12120_vm8, %v7014_v48  ;;  %vm12129_vm8 = vmmov %vm12126_vm2 }
0x373b   :  { %9049 = vmatpush1.bf16.msra.mxu1 %v12121_v33  ;;  %5347 = vmatprep.mubr.f32.mxu1 %v11873_v8  ;;  %v5153_v33 = vpop.permute.xlu1 %5152 }
0x373c   :  { %9051 = vmatprep.subr.bf16.mxu1 %v12122_v54 }
0x373f   :  { %9053 = vmatpush1.bf16.msra.mxu1 %v12123_v7 }
0x3740   :  { %9061 = vmatprep.subr.msk.bf16.mxu1 %vm12125_vm9, %v11853_v26  ;;  %vm12133_vm9 = vnez %v11939_v20 }
0x37c3   :  { %v7760_v44 = vpop.f32.mrb[54].mxu1 }
0x37c4   :  { %v7761_v53 = vpop.f32.mrb[55].mxu1 }
0x37c5   :  { %v7762_v3 = vadd.f32 %v7761_v53, %v7760_v44 }
0x37c7   :  { %8350 = vmatmul.mubr.msk.f32.vlgmr.msra.gmra.mrb[58].mxu0 %vm12126_vm2, %v7762_v3 }
0x37c8   :  { %9042 = vmatpush3.bf16.msra.mxu0 %v12127_v51  ;;  %8371 = vmatprep.mubr.msk.f32.mxu0 %vm11874_vm0, %v11873_v8 }
0x37c9   :  { %9043 = vmatprep.subr.bf16.mxu0 %v11913_v12 }
0x37cc   :  { %9045 = vmatpush3.bf16.msra.mxu0 %v12128_v15 }
0x37cd   :  { %9054 = vmatprep.subr.bf16.mxu0 %v11913_v12 }
0x380d   :  { %v5139_v34 = vpop.f32.mrb[56].mxu1 }
0x380e   :  { %v8362_v48 = vpop.f32.mrb[57].mxu1 }
0x389a   :  { %v11206_v25 = vpop.f32.mrb[58].mxu0 }
0x389b   :  { %v5140_v46 = vadd.f32 %v5139_v34, %v11206_v25  ;;  %v8351_v44 = vpop.f32.mrb[59].mxu0 }
0x389d   :  { %v5143_v53 = vadd.f32 %v5140_v46, %v10466_v38 }
0x389f   :  { %v5144_v3 = vadd.f32 %v5143_v53, %v4763_v56 }
0x38a1   :  { %v7086_v51 = vmul.f32 -1.442695, %v5144_v3 }
0x38a3   :  { %9368 = vpow2.f32 %v7086_v51 }
0x38ad   :  { %v9369_v39 = vpop.eup %9368 }
0x38ae   :  { %v5148_v7 = vadd.f32 1.0, %v9369_v39 }
0x38b0   :  { %9370 = vrcp.f32 %v5148_v7 }
0x38ba   :  { %v9371_v54 = vpop.eup %9370 }
0x38bb   :  { %v5155_v15 = vmul.f32 %v9371_v54, %v5153_v33  ;;  %v5162_v34 = vsub.f32 1.0, %v9371_v54  ;;  %v5168_v46 = vmul.f32 %v9371_v54, %v11036_v49 }
0x38bd   :  { %5157 = vrot.lane.b32.xlu0 %v5155_v15, %s9438_s7 }
0x392f   :  { %v5158_v32 = vpop.permute.xlu0 %5157 }
0x3930   :  { %v5160_v48 = vadd.f32 %v5158_v32, %v5143_v53 }
0x3932   :  { %9372 = vtanh.f32 %v5160_v48 }
0x393c   :  { %v9373_v2 = vpop.eup %9372 }
0x393d   :  { %5164 = vrot.lane.b32.xlu0 %v9373_v2, %s9439_s8  ;;  %v12143_v2 = vld [vmem:[#allocation27_spill] sm:$0xff] }
0x39af   :  { %v5165_v44 = vpop.permute.xlu0 %5164 }
0x39b0   :  { %v5167_v56 = vmul.f32 %v5165_v44, %v5162_v34  ;;  %v12145_v44 = vld [vmem:[#allocation30_spill] sm:$0xff] }
0x39b2   :  { %v11213_v51 = vadd.f32 %v5168_v46, %v5167_v56 }
0x39b4   :  { %5171 = vrot.lane.b32.xlu0 %v11213_v51, %s9439_s8 }
0x3a26   :  { %v5172_v7 = vpop.permute.xlu0 %5171 }
0x3a27   :  { %8372 = vmatmul.mubr.msk.f32.vlgmr.msra.gmra.mrb[60].mxu0 %vm12126_vm2, %v5172_v7  ;;  %7089 = vmatmul.mubr.msk.f32.vlgmr.msra.gmra.mrb[58].mxu1 %vm12129_vm8, %v5172_v7  ;;  %vm12131_vm2 = vnez %v11938_v24  ;;  %vm12132_vm8 = vnez %v11876_v5 }
0x3a28   :  { %9056 = vmatpush3.bf16.msra.mxu0 %v11966_v36  ;;  %8382 = vmatprep.mubr.msk.f32.mxu0 %vm11874_vm0, %v11873_v8 }
0x3a29   :  { %9057 = vmatprep.subr.bf16.mxu0 %v11913_v12  ;;  %9063 = vmatpush3.bf16.msk.msra.mxu1 %vm12130_vm7, %v11853_v26  ;;  %vm12135_vm7 = vnez %v11878_v60 }
0x3a2a   :  { %9065 = vmatprep.subr.msk.bf16.mxu1 %vm12084_vm14, %v11853_v26 }
0x3a2c   :  { %9059 = vmatpush3.bf16.msra.mxu0 %v11967_v21 }
0x3a2d   :  { %9067 = vmatpush3.bf16.msk.msra.mxu1 %vm12131_vm2, %v11853_v26  ;;  %7123 = vmatprep.subr.msk.mxu0 %vm12132_vm8, %v11968_v57  ;;  %vm12136_vm8 = vnez %v11942_v27 }
0x3a2e   :  { %9069 = vmatprep.subr.msk.bf16.mxu1 %vm12133_vm9, %v11853_v26  ;;  %vm12139_vm9 = vnez %v11948_v19 }
0x3a2f   :  { %8383 = vmatmul.mubr.msk.f32.vlgmr.msra.gmra.mrb[62].mxu0 %vm12134_vm11, %v5172_v7  ;;  %vm12137_vm11 = vnez %v11944_v6  ;;  %v12146_v7 = vld [vmem:[#allocation32_spill] sm:$0xff] }
0x3a30   :  { %7124 = vmatpush1.msk.msra.mxu0 %vm12135_vm7, %v11968_v57  ;;  %5579 = vmatprep.mubr.f32.mxu0 %v11873_v8  ;;  %vm12138_vm7 = vnez %v11946_v42 }
0x3a31   :  { %9071 = vmatpush3.bf16.msk.msra.mxu1 %vm12043_vm10, %v11853_v26  ;;  %9093 = vmatprep.subr.msk.bf16.mxu0 %vm12090_vm5, %v11853_v26 }
0x3a32   :  { %9073 = vmatprep.subr.msk.bf16.mxu1 %vm12136_vm8, %v11853_v26  ;;  %vm12140_vm8 = vnez %v11954_v40 }
0x3a35   :  { %9075 = vmatpush3.bf16.msk.msra.mxu1 %vm12137_vm11, %v11853_v26  ;;  %vm12141_vm11 = vnez %v12051_v59 }
0x3a36   :  { %9077 = vmatprep.subr.msk.bf16.mxu1 %vm12138_vm7, %v11853_v26  ;;  %vm12142_vm7 = vnez %v12097_v10 }
0x3a39   :  { %9079 = vmatpush3.bf16.msk.msra.mxu1 %vm12139_vm9, %v11853_v26  ;;  %vm12144_vm9 = vnez %v12143_v2 }
0x3a3a   :  { %9081 = vmatprep.subr.msk.bf16.mxu1 %vm12002_vm12, %v11853_v26 }
0x3a3d   :  { %9083 = vmatpush3.bf16.msk.msra.mxu1 %vm12049_vm1, %v11853_v26 }
0x3a3e   :  { %9085 = vmatprep.subr.msk.bf16.mxu1 %vm12140_vm8, %v11853_v26 }
0x3a41   :  { %9087 = vmatpush3.bf16.msk.msra.mxu1 %vm12141_vm11, %v11853_v26  ;;  %vm12151_vm11 = vcmask 261120  }
0x3a42   :  { %9089 = vmatprep.subr.msk.bf16.mxu1 %vm12142_vm7, %v11853_v26  ;;  %vm12153_vm8 = vmmov %vm12151_vm11 }
0x3a45   :  { %9091 = vmatpush3.bf16.msk.msra.mxu1 %vm12144_vm9, %v11853_v26  ;;  %vm12148_vm9 = vcmask 64512  }
0x3a46   :  { %9124 = vmatprep.subr.bf16.mxu1 %v11913_v12  ;;  %vm12150_vm7 = vmmov %vm12148_vm9 }
0x3afa   :  { %v5245_v49 = vpop.f32.mrb[60].mxu0  ;;  %v5349_v32 = vpop.f32.mrb[58].mxu1 }
0x3afb   :  { %v5425_v33 = vadd.f32 %v5349_v32, %v12010_v17  ;;  %v8373_v54 = vpop.f32.mrb[61].mxu0  ;;  %v5351_v39 = vpop.f32.mrb[59].mxu1  ;;  %v12147_v32 = vld [vmem:[#allocation3_spill] sm:$0xff] }
0x3afc   :  { %v5426_v15 = vadd.f32 %v5351_v39, %v12011_v41 }
0x3afd   :  { %9374 = vtanh.f32 %v5425_v33 }
0x3afe   :  { %9376 = vtanh.f32 %v5426_v15 }
0x3b02   :  { %v11283_v53 = vpop.f32.mrb[62].mxu0 }
0x3b03   :  { %v8384_v3 = vpop.f32.mrb[63].mxu0 }
0x3b07   :  { %v9375_v48 = vpop.eup %9374 }
0x3b08   :  { %v9377_v34 = vpop.eup %9376  ;;  %v5429_v56 = vmul.f32 %v9375_v48, %v12145_v44 }
0x3b09   :  { %v5430_v46 = vmul.f32 %v9377_v34, %v12145_v44 }
0x3b0b   :  { %5495 = vmatprep.mubr.f32.mxu1 %v5430_v46 }
0x3b0c   :  { %5496 = vmatmul.mubr.f32.vlgmr.msra.gmra.mrb[60].mxu1 %v5429_v56 }
0x3b0d   :  { %9126 = vmatpush3.bf16.msra.mxu1 %v12146_v7  ;;  %8393 = vmatprep.mubr.msk.f32.mxu1 %vm11874_vm0, %v11873_v8 }
0x3b0e   :  { %9127 = vmatprep.subr.bf16.mxu1 %v11913_v12 }
0x3b11   :  { %9129 = vmatpush3.bf16.msra.mxu1 %v12147_v32 }
0x3b12   :  { %9136 = vmatprep.subr.bf16.mxu1 %v11913_v12 }
0x3bdf   :  { %v7815_v33 = vpop.f32.mrb[60].mxu1 }
0x3be0   :  { %v7816_v54 = vpop.f32.mrb[61].mxu1 }
0x3be1   :  { %v7817_v39 = vadd.f32 %v7816_v54, %v7815_v33 }
0x3be3   :  { %v5501_v15 = vsel %vm12148_vm9, %v7817_v39, -inf }
0x3be4   :  { %5502 = vmax.xlane.f32.xlu0 %v5501_v15 }
0x3bfa   :  { %5174 = vrot.lane.b32.xlu0 %v11206_v25, %s9440_s28 }
0x3c71   :  { %v5503_v3 = vpop.xlane.xlu0 %5502 }
0x3c72   :  { %v5504_v48 = vsub.f32 %v7817_v39, %v5503_v3 }
0x3c74   :  { %v5505_v34 = vmul.f32 1.442695, %v5504_v48 }
0x3c75   :  { %v5175_v46 = vpop.permute.xlu0 %5174 }
0x3c76   :  { %9378 = vpow2.f32 %v5505_v34  ;;  %v5246_v56 = vadd.f32 %v5245_v49, %v5175_v46 }
0x3c78   :  { %v11297_v32 = vadd.f32 %v5246_v56, %v10635_v1 }
0x3c7a   :  { %12149 = vst [vmem:[#allocation22_spill] sm:$0xff] %v11297_v32  ;;  %v5250_v33 = vsel %vm12151_vm11, %v11297_v32, -inf  ;;  %vm12155_vm11 = vnez %v11893_v23 }
0x3c80   :  { %v9379_v7 = vpop.eup %9378 }
0x3c81   :  { %v5507_v44 = vsel %vm12150_vm7, %v9379_v7, 0.0 }
0x3c82   :  { %5508 = vadd.xlane.f32.xlu1 %v5507_v44 }
0x3c86   :  { %5251 = vmax.xlane.f32.xlu1 %v5250_v33  ;;  %v5424_v33 = vadd.f32 %v11283_v53, %v10183_v4  ;;  %v12165_v53 = vld [vmem:[#allocation6_spill] sm:$0xff] }
0x3d0f   :  { %v5509_v54 = vpop.xlane.xlu1 %5508 }
0x3d10   :  { %9380 = vrcp.f32 %v5509_v54 }
0x3d13   :  { %v11302_v25 = vpop.xlane.xlu1 %5251 }
0x3d14   :  { %12152 = vst [vmem:[#allocation23_spill] sm:$0xff] %v11302_v25  ;;  %vm5253_vm9 = vcmp.ge.f32.partialorder %v11297_v32, %v11302_v25 }
0x3d15   :  { %v5254_v49 = vsel %vm5253_vm9, %v9855_v30, 32  ;;  %vm12156_vm9 = vnez %v11895_v29 }
0x3d16   :  { %v5255_v39 = vsel %vm12153_vm8, %v5254_v49, 2147483647  ;;  %vm12154_vm8 = vnez %v11891_v22 }
0x3d17   :  { %v5257_v15 = vshra.s32 %v5255_v39, 16  ;;  %v5256_v44 = vand.u32 65535, %v5255_v39  ;;  %v12164_v39 = vld [vmem:[#allocation4_spill] sm:$0xff] }
0x3d19   :  { %v5259_v3 = vcvt.s32.f32 %v5257_v15  ;;  %v5258_v46 = vcvt.s32.f32 %v5256_v44 }
0x3d1a   :  { %v9381_v48 = vpop.eup %9380 }
0x3d1b   :  { %v5511_v34 = vmul.f32 %v9381_v48, %v9379_v7  ;;  %5260 = vmin.xlane.f32.xlu1 %v5259_v3 }
0x3d1d   :  { %7125 = vmatmul.mubr.msk.f32.vlgmr.msra.gmra.mrb[64].mxu0 %vm12150_vm7, %v5511_v34  ;;  %vm12157_vm7 = vnez %v11897_v35 }
0x3d1e   :  { %9095 = vmatpush3.bf16.msk.msra.mxu0 %vm12021_vm6, %v11853_v26 }
0x3d1f   :  { %9097 = vmatprep.subr.msk.bf16.mxu0 %vm12022_vm4, %v11853_v26 }
0x3d22   :  { %9099 = vmatpush3.bf16.msk.msra.mxu0 %vm11976_vm13, %v11853_v26  ;;  %vm12158_vm13 = vnez %v11899_v45 }
0x3d23   :  { %9101 = vmatprep.subr.msk.bf16.mxu0 %vm11977_vm3, %v11853_v26 }
0x3d26   :  { %9103 = vmatpush3.bf16.msk.msra.mxu0 %vm12154_vm8, %v11853_v26  ;;  %vm12159_vm8 = vnez %v11903_v58 }
0x3d27   :  { %9105 = vmatprep.subr.msk.bf16.mxu0 %vm12155_vm11, %v11853_v26  ;;  %vm12160_vm11 = vnez %v11905_v37 }
0x3d2a   :  { %9107 = vmatpush3.bf16.msk.msra.mxu0 %vm12156_vm9, %v11853_v26  ;;  %vm12161_vm9 = vnez %v11907_v9 }
0x3d2b   :  { %9109 = vmatprep.subr.msk.bf16.mxu0 %vm12157_vm7, %v11853_v26  ;;  %vm12162_vm7 = vnez %v11909_v31 }
0x3d2e   :  { %9111 = vmatpush3.bf16.msk.msra.mxu0 %vm12158_vm13, %v11853_v26  ;;  %vm12163_vm13 = vnez %v12026_v13 }
0x3d2f   :  { %9113 = vmatprep.subr.msk.bf16.mxu0 %vm12113_vm15, %v11853_v26 }
0x3d32   :  { %9115 = vmatpush3.bf16.msk.msra.mxu0 %vm12159_vm8, %v11853_v26 }
0x3d33   :  { %9117 = vmatprep.subr.msk.bf16.mxu0 %vm12160_vm11, %v11853_v26 }
0x3d36   :  { %9119 = vmatpush3.bf16.msk.msra.mxu0 %vm12161_vm9, %v11853_v26 }
0x3d37   :  { %9121 = vmatprep.subr.msk.bf16.mxu0 %vm12162_vm7, %v11853_v26 }
0x3d3a   :  { %9123 = vmatpush3.bf16.msk.msra.mxu0 %vm12163_vm13, %v11853_v26  ;;  %vm12166_vm13 = vcmask 261120  }
0x3d3b   :  { %9130 = vmatprep.subr.bf16.mxu0 %v11913_v12  ;;  %vm12172_vm9 = vmmov %vm12166_vm13 }
0x3da8   :  { %v5261_v7 = vpop.xlane.xlu1 %5260 }
0x3da9   :  { %vm5262_vm8 = vcmp.eq.f32.partialorder %v5259_v3, %v5261_v7  ;;  %v5267_v3 = vcvt.f32.s32 %v5261_v7  ;;  %v12170_v7 = vld [vmem:[#allocation12_spill] sm:$0xff] }
0x3daa   :  { %v5263_v56 = vsel %vm5262_vm8, %v5258_v46, inf  ;;  %vm12171_vm7 = vnez %v12170_v7 }
0x3dab   :  { %5264 = vmin.xlane.f32.xlu1 %v5263_v56  ;;  %v5268_v44 = vshll.u32 %v5267_v3, 16 }
0x3dbc   :  { %5813 = vrot.lane.b32.xlu1 %v5424_v33, %s9438_s7 }
0x3df0   :  { %v5581_v54 = vpop.f32.mrb[64].mxu0 }
0x3df1   :  { %v5583_v49 = vpop.f32.mrb[65].mxu0  ;;  %v5586_v48 = vmul.f32 %v5581_v54, %v10421_v11 }
0x3df2   :  { %v5587_v15 = vmul.f32 %v5583_v49, %v10418_v28  ;;  %v12167_v49 = vld [vmem:[#allocation7_spill] sm:$0xff] }
0x3df4   :  { %5652 = vmatprep.mubr.f32.mxu0 %v5587_v15  ;;  %v12168_v15 = vld [vmem:[#allocation8_spill] sm:$0xff] }
0x3df5   :  { %5653 = vmatmul.mubr.f32.vlgmr.msra.gmra.mrb[66].mxu0 %v5586_v48  ;;  %v12169_v48 = vld [vmem:[#allocation9_spill] sm:$0xff] }
0x3df6   :  { %9132 = vmatpush3.bf16.msra.mxu0 %v10424_v43  ;;  %8404 = vmatprep.mubr.msk.f32.mxu0 %vm11874_vm0, %v11873_v8 }
0x3df7   :  { %9133 = vmatprep.subr.bf16.mxu0 %v11913_v12 }
0x3dfa   :  { %9135 = vmatpush3.bf16.msra.mxu0 %v12164_v39 }
0x3dfb   :  { %9143 = vmatprep.subr.bf16.mxu0 %v12165_v53 }
0x3e38   :  { %v5265_v34 = vpop.xlane.xlu1 %5264 }
0x3e39   :  { %v5266_v46 = vcvt.f32.s32 %v5265_v34 }
0x3e3b   :  { %v5269_v56 = vadd.s32 %v5268_v44, %v5266_v46  ;;  %v12173_v44 = vld [vmem:[#allocation2_spill] sm:$0xff]  ;;  %v12174_v46 = vld [vmem:[#allocation13_spill] sm:$0xff] }
0x3e3d   :  { %vm5270_vm8 = vcmp.eq.s32.totalorder %v9855_v30, %v5269_v56 }
0x3e3e   :  { %v7088_v54 = vsel %vm5270_vm8, 1.0, %v11873_v8  ;;  %vm12177_vm8 = vnez %v11876_v5 }
0x3e3f   :  { %8405 = vmatmul.mubr.msk.f32.vlgmr.msra.gmra.mrb[68].mxu0 %vm12166_vm13, %v7088_v54  ;;  %vm12175_vm13 = vmmov %vm12172_vm9 }
0x3e40   :  { %9145 = vmatpush1.bf16.msra.mxu0 %v12167_v49  ;;  %6008 = vmatprep.mubr.f32.mxu0 %v11873_v8 }
0x3e41   :  { %9147 = vmatprep.subr.bf16.mxu0 %v12168_v15 }
0x3e44   :  { %9149 = vmatpush1.bf16.msra.mxu0 %v12169_v48 }
0x3e45   :  { %9157 = vmatprep.subr.msk.bf16.mxu0 %vm12171_vm7, %v11853_v26  ;;  %vm12176_vm7 = vnez %v11936_v18 }
0x3ec8   :  { %v7850_v53 = vpop.f32.mrb[66].mxu0 }
0x3ec9   :  { %v7851_v3 = vpop.f32.mrb[67].mxu0 }
0x3eca   :  { %v7852_v34 = vadd.f32 %v7851_v3, %v7850_v53 }
0x3ecc   :  { %8394 = vmatmul.mubr.msk.f32.vlgmr.msra.gmra.mrb[62].mxu1 %vm12172_vm9, %v7852_v34 }
0x3ecd   :  { %9138 = vmatpush3.bf16.msra.mxu1 %v12173_v44  ;;  %8415 = vmatprep.mubr.msk.f32.mxu1 %vm11874_vm0, %v11873_v8  ;;  %v5814_v44 = vpop.permute.xlu1 %5813 }
0x3ece   :  { %9139 = vmatprep.subr.bf16.mxu1 %v11913_v12 }
0x3ed1   :  { %9141 = vmatpush3.bf16.msra.mxu1 %v12174_v46 }
0x3ed2   :  { %9150 = vmatprep.subr.bf16.mxu1 %v11913_v12 }
0x3f12   :  { %v5800_v56 = vpop.f32.mrb[68].mxu0 }
0x3f13   :  { %v8406_v54 = vpop.f32.mrb[69].mxu0 }
0x3f9f   :  { %v11383_v49 = vpop.f32.mrb[62].mxu1 }
0x3fa0   :  { %v5801_v15 = vadd.f32 %v5800_v56, %v11383_v49  ;;  %v8395_v48 = vpop.f32.mrb[63].mxu1 }
0x3fa2   :  { %v5804_v7 = vadd.f32 %v5801_v15, %v10466_v38 }
0x3fa4   :  { %v5805_v53 = vadd.f32 %v5804_v7, %v5424_v33 }
0x3fa6   :  { %v7160_v3 = vmul.f32 -1.442695, %v5805_v53 }
0x3fa8   :  { %9382 = vpow2.f32 %v7160_v3 }
0x3fb2   :  { %v9383_v34 = vpop.eup %9382 }
0x3fb3   :  { %v5809_v32 = vadd.f32 1.0, %v9383_v34 }
0x3fb5   :  { %9384 = vrcp.f32 %v5809_v32 }
0x3fbf   :  { %v9385_v25 = vpop.eup %9384 }
0x3fc0   :  { %v5816_v46 = vmul.f32 %v9385_v25, %v5814_v44  ;;  %v5823_v56 = vsub.f32 1.0, %v9385_v25  ;;  %v5829_v33 = vmul.f32 %v9385_v25, %v11213_v51 }
0x3fc2   :  { %5818 = vrot.lane.b32.xlu0 %v5816_v46, %s9438_s7 }
0x4034   :  { %v5819_v39 = vpop.permute.xlu0 %5818 }
0x4035   :  { %v5821_v54 = vadd.f32 %v5819_v39, %v5804_v7 }
0x4037   :  { %9386 = vtanh.f32 %v5821_v54 }
0x4041   :  { %v9387_v43 = vpop.eup %9386 }
0x4042   :  { %5825 = vrot.lane.b32.xlu0 %v9387_v43, %s9439_s8 }
0x40b4   :  { %v5826_v48 = vpop.permute.xlu0 %5825 }
0x40b5   :  { %v5828_v15 = vmul.f32 %v5826_v48, %v5823_v56 }
0x40b7   :  { %v11390_v53 = vadd.f32 %v5829_v33, %v5828_v15  ;;  %v12210_v15 = vld [vmem:[#allocation2_spill] sm:$0xff] }
0x40b9   :  { %5832 = vrot.lane.b32.xlu0 %v11390_v53, %s9439_s8 }
0x412b   :  { %v5833_v32 = vpop.permute.xlu0 %5832 }
0x412c   :  { %8416 = vmatmul.mubr.msk.f32.vlgmr.msra.gmra.mrb[64].mxu1 %vm12175_vm13, %v5833_v32  ;;  %7163 = vmatmul.mubr.msk.f32.vlgmr.msra.gmra.mrb[70].mxu0 %vm12172_vm9, %v5833_v32  ;;  %vm12178_vm13 = vnez %v11939_v20 }
0x412d   :  { %9152 = vmatpush3.bf16.msra.mxu1 %v11966_v36  ;;  %8426 = vmatprep.mubr.msk.f32.mxu1 %vm11874_vm0, %v11873_v8 }
0x412e   :  { %9153 = vmatprep.subr.bf16.mxu1 %v11913_v12  ;;  %9159 = vmatpush3.bf16.msk.msra.mxu0 %vm12176_vm7, %v11853_v26  ;;  %vm12179_vm7 = vnez %v11878_v60 }
0x412f   :  { %9161 = vmatprep.subr.msk.bf16.mxu0 %vm12084_vm14, %v11853_v26  ;;  %vm12180_vm14 = vnez %v11942_v27 }
0x4131   :  { %9155 = vmatpush3.bf16.msra.mxu1 %v11967_v21 }
0x4132   :  { %9163 = vmatpush3.bf16.msk.msra.mxu0 %vm12131_vm2, %v11853_v26  ;;  %7197 = vmatprep.subr.msk.mxu1 %vm12177_vm8, %v11968_v57  ;;  %vm12181_vm2 = vnez %v11944_v6  ;;  %vm12182_vm8 = vnez %v11946_v42  ;;  %v12188_v6 = vld [vmem:[#allocation30_spill] sm:$0xff] }
0x4133   :  { %9165 = vmatprep.subr.msk.bf16.mxu0 %vm12178_vm13, %v11853_v26  ;;  %vm12183_vm13 = vnez %v11948_v19 }
0x4134   :  { %8427 = vmatmul.mubr.msk.f32.vlgmr.msra.gmra.mrb[66].mxu1 %vm12172_vm9, %v5833_v32  ;;  %vm12186_vm9 = vnez %v12097_v10  ;;  %v12211_v32 = vld [vmem:[#allocation13_spill] sm:$0xff] }
0x4135   :  { %7198 = vmatpush1.msk.msra.mxu1 %vm12179_vm7, %v11968_v57  ;;  %6240 = vmatprep.mubr.f32.mxu1 %v11873_v8  ;;  %vm12187_vm7 = vnez %v12143_v2 }
0x4136   :  { %9167 = vmatpush3.bf16.msk.msra.mxu0 %vm12043_vm10, %v11853_v26  ;;  %9189 = vmatprep.subr.msk.bf16.mxu1 %vm12090_vm5, %v11853_v26  ;;  %vm12184_vm10 = vnez %v11954_v40  ;;  %vm12185_vm5 = vnez %v12051_v59 }
0x4137   :  { %9169 = vmatprep.subr.msk.bf16.mxu0 %vm12180_vm14, %v11853_v26  ;;  %vm12193_vm14 = vcmask 261120  }
0x413a   :  { %9171 = vmatpush3.bf16.msk.msra.mxu0 %vm12181_vm2, %v11853_v26 }
0x413b   :  { %9173 = vmatprep.subr.msk.bf16.mxu0 %vm12182_vm8, %v11853_v26  ;;  %vm12194_vm8 = vmmov %vm12193_vm14 }
0x413e   :  { %9175 = vmatpush3.bf16.msk.msra.mxu0 %vm12183_vm13, %v11853_v26 }
0x413f   :  { %9177 = vmatprep.subr.msk.bf16.mxu0 %vm12002_vm12, %v11853_v26  ;;  %vm12191_vm12 = vcmask 64512  }
0x4142   :  { %9179 = vmatpush3.bf16.msk.msra.mxu0 %vm12049_vm1, %v11853_v26  ;;  %vm12192_vm1 = vmmov %vm12191_vm12 }
0x4143   :  { %9181 = vmatprep.subr.msk.bf16.mxu0 %vm12184_vm10, %v11853_v26  ;;  %vm12195_vm13 = vmmov %vm12192_vm1  ;;  %vm12196_vm10 = vnez %v11887_v50 }
0x4146   :  { %9183 = vmatpush3.bf16.msk.msra.mxu0 %vm12185_vm5, %v11853_v26  ;;  %vm12197_vm5 = vnez %v11891_v22 }
0x4147   :  { %9185 = vmatprep.subr.msk.bf16.mxu0 %vm12186_vm9, %v11853_v26  ;;  %vm12198_vm9 = vnez %v11893_v23 }
0x414a   :  { %9187 = vmatpush3.bf16.msk.msra.mxu0 %vm12187_vm7, %v11853_v26  ;;  %vm12201_vm7 = vnez %v11899_v45 }
0x414b   :  { %9220 = vmatprep.subr.bf16.mxu0 %v11913_v12 }
0x41ff   :  { %v5906_v5 = vpop.f32.mrb[64].mxu1  ;;  %v6010_v60 = vpop.f32.mrb[70].mxu0 }
0x4200   :  { %v6086_v61 = vadd.f32 %v6010_v60, %v12010_v17  ;;  %v8417_v43 = vpop.f32.mrb[65].mxu1  ;;  %v6012_v18 = vpop.f32.mrb[71].mxu0 }
0x4201   :  { %v6087_v16 = vadd.f32 %v6012_v18, %v12011_v41 }
0x4202   :  { %9388 = vtanh.f32 %v6086_v61 }
0x4203   :  { %9390 = vtanh.f32 %v6087_v16 }
0x4207   :  { %v11460_v24 = vpop.f32.mrb[66].mxu1 }
0x4208   :  { %v8428_v20 = vpop.f32.mrb[67].mxu1  ;;  %v6085_v22 = vadd.f32 %v11460_v24, %v10183_v4 }
0x420c   :  { %v9389_v55 = vpop.eup %9388 }
0x420d   :  { %v9391_v27 = vpop.eup %9390  ;;  %v6090_v19 = vmul.f32 %v9389_v55, %v12188_v6 }
0x420e   :  { %v6091_v42 = vmul.f32 %v9391_v27, %v12188_v6 }
0x4210   :  { %6156 = vmatprep.mubr.f32.mxu0 %v6091_v42 }
0x4211   :  { %6157 = vmatmul.mubr.f32.vlgmr.msra.gmra.mrb[72].mxu0 %v6090_v19 }
0x4212   :  { %9222 = vmatpush3.bf16.msra.mxu0 %v12189_v63  ;;  %8437 = vmatprep.mubr.msk.f32.mxu0 %vm11874_vm0, %v11873_v8 }
0x4213   :  { %9223 = vmatprep.subr.bf16.mxu0 %v11913_v12 }
0x4216   :  { %9225 = vmatpush3.bf16.msra.mxu0 %v12190_v14 }
0x4217   :  { %9232 = vmatprep.subr.bf16.mxu0 %v11913_v12 }
0x42e4   :  { %v7905_v40 = vpop.f32.mrb[72].mxu0 }
0x42e5   :  { %v7906_v36 = vpop.f32.mrb[73].mxu0 }
0x42e6   :  { %v7907_v21 = vadd.f32 %v7906_v36, %v7905_v40 }
0x42e8   :  { %v6162_v57 = vsel %vm12191_vm12, %v7907_v21, -inf  ;;  %vm12203_vm12 = vnez %v11907_v9 }
0x42e9   :  { %6163 = vmax.xlane.f32.xlu0 %v6162_v57  ;;  %v12213_v57 = vld [vmem:[#allocation14_spill] sm:$0xff] }
0x42ff   :  { %5835 = vrot.lane.b32.xlu0 %v11383_v49, %s9440_s28 }
0x4376   :  { %v6164_v17 = vpop.xlane.xlu0 %6163 }
0x4377   :  { %v6165_v41 = vsub.f32 %v7907_v21, %v6164_v17  ;;  %v12212_v21 = vld [vmem:[#allocation15_spill] sm:$0xff] }
0x4378   :  { %v2629_v17 = vsub.f32 %v12213_v57, %v12212_v21 }
0x4379   :  { %v6166_v59 = vmul.f32 1.442695, %v6165_v41 }
0x437a   :  { %v5836_v10 = vpop.permute.xlu0 %5835  ;;  %v2630_v41 = vmul.f32 1.442695, %v2629_v17 }
0x437b   :  { %9392 = vpow2.f32 %v6166_v59  ;;  %v5907_v51 = vadd.f32 %v5906_v5, %v5836_v10  ;;  %v12214_v59 = vld [vmem:[#allocation23_spill] sm:$0xff]  ;;  %v12215_v10 = vld [vmem:[#allocation22_spill] sm:$0xff] }
0x437d   :  { %v11474_v25 = vadd.f32 %v5907_v51, %v10635_v1  ;;  %v5273_v51 = vsub.f32 %v12215_v10, %v12214_v59 }
0x437f   :  { %v5911_v44 = vsel %vm12193_vm14, %v11474_v25, -inf  ;;  %vm12205_vm14 = vnez %v12026_v13 }
0x4385   :  { %v9393_v2 = vpop.eup %9392 }
0x4386   :  { %v6168_v39 = vsel %vm12192_vm1, %v9393_v2, 0.0  ;;  %vm12204_vm1 = vnez %v11909_v31 }
0x4387   :  { %6169 = vadd.xlane.f32.xlu1 %v6168_v39 }
0x438b   :  { %5912 = vmax.xlane.f32.xlu1 %v5911_v44 }
0x4414   :  { %v6170_v46 = vpop.xlane.xlu1 %6169 }
0x4415   :  { %9394 = vrcp.f32 %v6170_v46 }
0x4418   :  { %v11479_v49 = vpop.xlane.xlu1 %5912 }
0x4419   :  { %vm5914_vm2 = vcmp.ge.f32.partialorder %v11474_v25, %v11479_v49  ;;  %v5934_v39 = vsub.f32 %v11474_v25, %v11479_v49 }
0x441a   :  { %v5915_v7 = vsel %vm5914_vm2, %v9855_v30, 32  ;;  %vm12208_vm2 = vmmov %vm12194_vm8 }
0x441b   :  { %v5916_v3 = vsel %vm12194_vm8, %v5915_v7, 2147483647  ;;  %vm12209_vm8 = vmmov %vm12208_vm2 }
0x441c   :  { %v5918_v34 = vshra.s32 %v5916_v3, 16  ;;  %v5917_v62 = vand.u32 65535, %v5916_v3 }
0x441e   :  { %v5920_v54 = vcvt.s32.f32 %v5918_v34  ;;  %v5919_v50 = vcvt.s32.f32 %v5917_v62  ;;  %v12221_v62 = vld [vmem:[#allocation16_spill] sm:$0xff] }
0x441f   :  { %v9395_v56 = vpop.eup %9394 }
0x4420   :  { %v6172_v48 = vmul.f32 %v9395_v56, %v9393_v2  ;;  %5921 = vmin.xlane.f32.xlu1 %v5920_v54  ;;  %v5274_v2 = vmul.f32 1.442695, %v5273_v51 }
0x4422   :  { %7199 = vmatmul.mubr.msk.f32.vlgmr.msra.gmra.mrb[68].mxu1 %vm12195_vm13, %v6172_v48  ;;  %v12220_v48 = vld [vmem:[#allocation17_spill] sm:$0xff] }
0x4423   :  { %9191 = vmatpush3.bf16.msk.msra.mxu1 %vm12021_vm6, %v11853_v26  ;;  %vm12199_vm6 = vnez %v11895_v29 }
0x4424   :  { %9193 = vmatprep.subr.msk.bf16.mxu1 %vm12022_vm4, %v11853_v26  ;;  %vm12200_vm4 = vnez %v11897_v35 }
0x4427   :  { %9195 = vmatpush3.bf16.msk.msra.mxu1 %vm12196_vm10, %v11853_v26 }
0x4428   :  { %9197 = vmatprep.subr.msk.bf16.mxu1 %vm11977_vm3, %v11853_v26  ;;  %vm12202_vm3 = vnez %v11903_v58 }
0x442b   :  { %9199 = vmatpush3.bf16.msk.msra.mxu1 %vm12197_vm5, %v11853_v26 }
0x442c   :  { %9201 = vmatprep.subr.msk.bf16.mxu1 %vm12198_vm9, %v11853_v26 }
0x442f   :  { %9203 = vmatpush3.bf16.msk.msra.mxu1 %vm12199_vm6, %v11853_v26 }
0x4430   :  { %9205 = vmatprep.subr.msk.bf16.mxu1 %vm12200_vm4, %v11853_v26 }
0x4433   :  { %9207 = vmatpush3.bf16.msk.msra.mxu1 %vm12201_vm7, %v11853_v26 }
0x4434   :  { %9209 = vmatprep.subr.msk.bf16.mxu1 %vm12113_vm15, %v11853_v26 }
0x4437   :  { %9211 = vmatpush3.bf16.msk.msra.mxu1 %vm12202_vm3, %v11853_v26 }
0x4438   :  { %9213 = vmatprep.subr.msk.bf16.mxu1 %vm12160_vm11, %v11853_v26 }
0x443b   :  { %9215 = vmatpush3.bf16.msk.msra.mxu1 %vm12203_vm12, %v11853_v26 }
0x443c   :  { %9217 = vmatprep.subr.msk.bf16.mxu1 %vm12204_vm1, %v11853_v26  ;;  %vm12232_vm1 = vcmask 523264  }
0x443f   :  { %9219 = vmatpush3.bf16.msk.msra.mxu1 %vm12205_vm14, %v11853_v26  ;;  %v12206_v26 = vld [vmem:[#allocation5_spill] sm:$0xff]  ;;  %vm12233_vm14 = vcmask 785408  }
0x4440   :  { %9226 = vmatprep.subr.bf16.mxu1 %v11913_v12 }
0x44ad   :  { %v5922_v0 = vpop.xlane.xlu1 %5921 }
0x44ae   :  { %vm5923_vm15 = vcmp.eq.f32.partialorder %v5920_v54, %v5922_v0  ;;  %v5928_v4 = vcvt.f32.s32 %v5922_v0  ;;  %v3290_v0 = vsub.f32 %v12221_v62, %v12220_v48 }
0x44af   :  { %v5924_v52 = vsel %vm5923_vm15, %v5919_v50, inf }
0x44b0   :  { %5925 = vmin.xlane.f32.xlu1 %v5924_v52  ;;  %v5929_v37 = vshll.u32 %v5928_v4, 16  ;;  %v3291_v50 = vmul.f32 1.442695, %v3290_v0  ;;  %v12222_v52 = vld [vmem:[#allocation19_spill] sm:$0xff] }
0x44c1   :  { %6474 = vrot.lane.b32.xlu1 %v6085_v22, %s9438_s7 }
0x44f5   :  { %v6242_v23 = vpop.f32.mrb[68].mxu1 }
0x44f6   :  { %v6244_v29 = vpop.f32.mrb[69].mxu1  ;;  %v6247_v45 = vmul.f32 %v6242_v23, %v10421_v11 }
0x44f7   :  { %v6248_v35 = vmul.f32 %v6244_v29, %v10418_v28 }
0x44f9   :  { %6313 = vmatprep.mubr.f32.mxu1 %v6248_v35  ;;  %v12224_v35 = vld [vmem:[#allocation21_spill] sm:$0xff] }
0x44fa   :  { %6314 = vmatmul.mubr.f32.vlgmr.msra.gmra.mrb[70].mxu1 %v6247_v45  ;;  %v12225_v45 = vld [vmem:[#allocation20_spill] sm:$0xff] }
0x44fb   :  { %9228 = vmatpush3.bf16.msra.mxu1 %v12206_v26  ;;  %8448 = vmatprep.mubr.msk.f32.mxu1 %vm11874_vm0, %v11873_v8  ;;  %v4612_v26 = vsub.f32 %v12225_v45, %v12224_v35 }
0x44fc   :  { %9229 = vmatprep.subr.bf16.mxu1 %v11913_v12 }
0x44fd   :  { %v4613_v4 = vmul.f32 1.442695, %v4612_v26 }
0x44ff   :  { %9231 = vmatpush3.bf16.msra.mxu1 %v12207_v47 }
0x453d   :  { %v5926_v58 = vpop.xlane.xlu1 %5925 }
0x453e   :  { %v5927_v9 = vcvt.f32.s32 %v5926_v58 }
0x4540   :  { %v5930_v31 = vadd.s32 %v5929_v37, %v5927_v9 }
0x4541   :  { %v6475_v6 = vpop.permute.xlu1 %6474 }
0x4542   :  { %vm5931_vm11 = vcmp.eq.s32.totalorder %v9855_v30, %v5930_v31 }
0x4543   :  { %v7162_v28 = vsel %vm5931_vm11, 1.0, %v11873_v8  ;;  %vm12235_vm11 = vmmov %vm12232_vm1 }
0x4544   :  { %8449 = vmatmul.mubr.msk.f32.vlgmr.msra.gmra.mrb[72].mxu1 %vm12208_vm2, %v7162_v28 }
0x45cd   :  { %v7940_v11 = vpop.f32.mrb[70].mxu1 }
0x45ce   :  { %v7941_v13 = vpop.f32.mrb[71].mxu1 }
0x45cf   :  { %v7942_v33 = vadd.f32 %v7941_v13, %v7940_v11 }
0x45d1   :  { %8438 = vmatmul.mubr.msk.f32.vlgmr.msra.gmra.mrb[74].mxu0 %vm12209_vm8, %v7942_v33 }
0x45d2   :  { %9234 = vmatpush3.bf16.msra.mxu0 %v12210_v15  ;;  %8459 = vmatprep.mubr.msk.f32.mxu0 %vm11874_vm0, %v11873_v8  ;;  %vm12216_vm0 = vmmov %vm12208_vm2 }
0x45d3   :  { %9235 = vmatprep.subr.bf16.mxu0 %v11913_v12  ;;  %vm12217_vm13 = vmmov %vm12216_vm0 }
0x45d4   :  { %vm12218_vm10 = vmmov %vm12216_vm0 }
0x45d5   :  { %vm12219_vm5 = vmmov %vm12216_vm0 }
0x45d6   :  { %9237 = vmatpush3.bf16.msra.mxu0 %v12211_v32  ;;  %vm12226_vm9 = vmmov %vm12216_vm0 }
0x45d7   :  { %vm12227_vm6 = vmmov %vm12216_vm0 }
0x45d8   :  { %vm12228_vm4 = vmmov %vm12216_vm0 }
0x45d9   :  { %vm12229_vm7 = vmmov %vm12216_vm0 }
0x45da   :  { %vm12230_vm3 = vmmov %vm12216_vm0 }
0x45db   :  { %vm12231_vm12 = vmmov %vm12216_vm0 }
0x45dc   :  { %vm12234_vm15 = vmmov %vm12216_vm0 }
0x45dd   :  { %vm12236_vm2 = vmmov %vm12233_vm14 }
0x4617   :  { %v6461_v5 = vpop.f32.mrb[72].mxu1 }
0x4618   :  { %v8450_v30 = vpop.f32.mrb[73].mxu1 }
0x46a4   :  { %v6388_v60 = vpop.f32.mrb[74].mxu0 }
0x46a5   :  { %v6462_v61 = vadd.f32 %v6461_v5, %v6388_v60  ;;  %v8439_v43 = vpop.f32.mrb[75].mxu0 }
0x46a7   :  { %v6465_v18 = vadd.f32 %v6462_v61, %v10466_v38 }
0x46a9   :  { %v6466_v16 = vadd.f32 %v6465_v18, %v6085_v22  ;;  %v12223_v22 = vld [vmem:[#allocation18_spill] sm:$0xff] }
0x46aa   :  { %v3951_v23 = vsub.f32 %v12223_v22, %v12222_v52 }
0x46ab   :  { %v7234_v24 = vmul.f32 -1.442695, %v6466_v16 }
0x46ac   :  { %v3952_v29 = vmul.f32 1.442695, %v3951_v23 }
0x46ad   :  { %9396 = vpow2.f32 %v7234_v24 }
0x46b7   :  { %v9397_v20 = vpop.eup %9396 }
0x46b8   :  { %v6470_v55 = vadd.f32 1.0, %v9397_v20 }
0x46ba   :  { %9398 = vrcp.f32 %v6470_v55 }
0x46c4   :  { %v9399_v27 = vpop.eup %9398 }
0x46c5   :  { %v6477_v8 = vmul.f32 %v9399_v27, %v6475_v6  ;;  %v6484_v63 = vsub.f32 1.0, %v9399_v27  ;;  %v6490_v38 = vmul.f32 %v9399_v27, %v11390_v53  ;;  %v5935_v53 = vmul.f32 1.442695, %v5934_v39 }
0x46c7   :  { %6479 = vrot.lane.b32.xlu0 %v6477_v8, %s9438_s7 }
0x4739   :  { %v6480_v12 = vpop.permute.xlu0 %6479 }
0x473a   :  { %v6482_v42 = vadd.f32 %v6480_v12, %v6465_v18 }
0x473c   :  { %9400 = vtanh.f32 %v6482_v42 }
0x473d   :  { %9402 = vpow2.f32 %v2630_v41 }
0x473e   :  { %9404 = vpow2.f32 %v5274_v2 }
0x473f   :  { %9406 = vpow2.f32 %v5935_v53 }
0x4740   :  { %9408 = vpow2.f32 %v3291_v50 }
0x4741   :  { %9410 = vpow2.f32 %v3952_v29 }
0x4742   :  { %9412 = vpow2.f32 %v4613_v4 }
0x4746   :  { %v9401_v19 = vpop.eup %9400 }
0x4747   :  { %6486 = vrot.lane.b32.xlu0 %v9401_v19, %s9439_s8  ;;  %v9403_v44 = vpop.eup %9402 }
0x4748   :  { %v2632_v46 = vsel %vm12216_vm0, %v9403_v44, 0.0  ;;  %v9405_v7 = vpop.eup %9404 }
0x4749   :  { %v5276_v3 = vsel %vm12217_vm13, %v9405_v7, 0.0  ;;  %v9407_v34 = vpop.eup %9406 }
0x474a   :  { %v5937_v54 = vsel %vm12218_vm10, %v9407_v34, 0.0  ;;  %v9409_v13 = vpop.eup %9408 }
0x474b   :  { %v3293_v15 = vsel %vm12227_vm6, %v9409_v13, 0.0  ;;  %v9411_v32 = vpop.eup %9410 }
0x474c   :  { %v3954_v5 = vsel %vm12228_vm4, %v9411_v32, 0.0  ;;  %v9413_v30 = vpop.eup %9412 }
0x47b9   :  { %v6487_v14 = vpop.permute.xlu0 %6486 }
0x47ba   :  { %v6489_v40 = vmul.f32 %v6487_v14, %v6484_v63 }
0x47bc   :  { %v6491_v36 = vadd.f32 %v6490_v38, %v6489_v40 }
0x47be   :  { %6493 = vrot.lane.b32.xlu0 %v6491_v36, %s9439_s8 }
0x47c2   :  { %6496 = vrot.lane.b32.xlu0 %v6388_v60, %s9440_s28  ;;  %v4615_v60 = vsel %vm12229_vm7, %v9413_v30, 0.0 }
0x47e1   :  { %2633 = vadd.xlane.f32.xlu0 %v2632_v46 }
0x47e5   :  { %5277 = vadd.xlane.f32.xlu0 %v5276_v3 }
0x47e9   :  { %5938 = vadd.xlane.f32.xlu0 %v5937_v54 }
0x4830   :  { %v6494_v56 = vpop.permute.xlu0 %6493 }
0x4831   :  { %8460 = vmatmul.mubr.msk.f32.vlgmr.msra.gmra.mrb[76].mxu0 %vm12219_vm5, %v6494_v56 }
0x4834   :  { %v6497_v47 = vpop.permute.xlu0 %6496 }
0x486e   :  { %v2634_v31 = vpop.xlane.xlu0 %2633 }
0x4872   :  { %v5278_v33 = vpop.xlane.xlu0 %5277 }
0x4873   :  { %9414 = vlog2.f32 %v5278_v33 }
0x4876   :  { %v5939_v42 = vpop.xlane.xlu0 %5938 }
0x4904   :  { %v6567_v58 = vpop.f32.mrb[76].mxu0 }
0x4905   :  { %v6568_v37 = vadd.f32 %v6567_v58, %v6497_v47  ;;  %v8461_v9 = vpop.f32.mrb[77].mxu0 }
0x4907   :  { %v11574_v28 = vadd.f32 %v6568_v37, %v10635_v1  ;;  %v9415_v1 = vpop.eup %9414 }
0x4908   :  { %v5280_v61 = vmul.f32 0.6931472, %v9415_v1 }
0x4909   :  { %v6572_v11 = vsel %vm12226_vm9, %v11574_v28, -inf }
0x490a   :  { %6573 = vmax.xlane.f32.xlu1 %v6572_v11  ;;  %v5281_v43 = vadd.f32 %v5280_v61, %v12214_v59 }
0x490c   :  { %v5282_v18 = vsub.f32 %v12215_v10, %v5281_v43 }
0x490e   :  { %3294 = vadd.xlane.f32.xlu1 %v3293_v15 }
0x4912   :  { %3955 = vadd.xlane.f32.xlu1 %v3954_v5 }
0x4916   :  { %4616 = vadd.xlane.f32.xlu1 %v4615_v60 }
0x4927   :  { %6598 = vrot.lane.b32.xlu1 %v5282_v18, %s9440_s28 }
0x4997   :  { %v6574_v16 = vpop.xlane.xlu1 %6573 }
0x4998   :  { %v6575_v24 = vsub.f32 %v11574_v28, %v6574_v16 }
0x499a   :  { %v6576_v20 = vmul.f32 1.442695, %v6575_v24 }
0x499b   :  { %v3295_v55 = vpop.xlane.xlu1 %3294 }
0x499c   :  { %9416 = vpow2.f32 %v6576_v20 }
0x499d   :  { %9418 = vlog2.f32 %v3295_v55 }
0x499f   :  { %v3956_v27 = vpop.xlane.xlu1 %3955 }
0x49a0   :  { %9420 = vlog2.f32 %v3956_v27 }
0x49a1   :  { %9422 = vlog2.f32 %v2634_v31 }
0x49a2   :  { %9424 = vlog2.f32 %v5939_v42 }
0x49a3   :  { %v4617_v46 = vpop.xlane.xlu1 %4616 }
0x49a6   :  { %v9417_v6 = vpop.eup %9416 }
0x49a7   :  { %v9419_v8 = vpop.eup %9418  ;;  %v6578_v12 = vsel %vm12230_vm3, %v9417_v6, 0.0  ;;  %v6599_v7 = vpop.permute.xlu1 %6598 }
0x49a8   :  { %v3297_v19 = vmul.f32 0.6931472, %v9419_v8  ;;  %6579 = vadd.xlane.f32.xlu0 %v6578_v12 }
0x49aa   :  { %v9421_v63 = vpop.eup %9420  ;;  %v3298_v14 = vadd.f32 %v3297_v19, %v12220_v48 }
0x49ab   :  { %v3958_v38 = vmul.f32 0.6931472, %v9421_v63  ;;  %v9423_v41 = vpop.eup %9422 }
0x49ac   :  { %v3299_v40 = vsub.f32 %v12221_v62, %v3298_v14  ;;  %v2636_v59 = vmul.f32 0.6931472, %v9423_v41  ;;  %v9425_v10 = vpop.eup %9424 }
0x49ad   :  { %v3959_v36 = vadd.f32 %v3958_v38, %v12222_v52  ;;  %v5941_v2 = vmul.f32 0.6931472, %v9425_v10 }
0x49ae   :  { %6590 = vrot.lane.b32.xlu1 %v3299_v40, %s9438_s7  ;;  %v2637_v51 = vadd.f32 %v2636_v59, %v12212_v21 }
0x49af   :  { %v3960_v17 = vsub.f32 %v12223_v22, %v3959_v36  ;;  %v5942_v53 = vadd.f32 %v5941_v2, %v11479_v49 }
0x49b0   :  { %v2638_v39 = vsub.f32 %v12213_v57, %v2637_v51 }
0x49b1   :  { %v5943_v44 = vsub.f32 %v11474_v25, %v5942_v53 }
0x49b2   :  { %6594 = vrot.lane.b32.xlu1 %v3960_v17, %s9439_s8 }
0x49be   :  { %6586 = vrot.lane.b32.xlu0 %v2638_v39, %s9440_s28 }
0x49c2   :  { %6602 = vrot.lane.b32.xlu0 %v5943_v44, %s9438_s7 }
0x4a20   :  { %v6591_v3 = vpop.permute.xlu1 %6590 }
0x4a24   :  { %v6595_v21 = vpop.permute.xlu1 %6594 }
0x4a35   :  { %v6580_v34 = vpop.xlane.xlu0 %6579 }
0x4a36   :  { %9426 = vlog2.f32 %v6580_v34 }
0x4a37   :  { %9428 = vlog2.f32 %v4617_v46 }
0x4a39   :  { %v6587_v54 = vpop.permute.xlu0 %6586 }
0x4a3a   :  { %v6609_v56 = vsel %vm12231_vm12, 0.0, %v6587_v54 }
0x4a3b   :  { %v6610_v48 = vsel %vm12232_vm1, %v6609_v56, %v6591_v3 }
0x4a3c   :  { %v6611_v57 = vsel %vm12233_vm14, %v6610_v48, %v6595_v21 }
0x4a3d   :  { %6615 = vst [vmem:[%s11617_s3] sm:$0xff] %v6611_v57  ;;  %v6603_v29 = vpop.permute.xlu0 %6602 }
0x4a40   :  { %v9427_v25 = vpop.eup %9426 }
0x4a41   :  { %v6582_v49 = vmul.f32 0.6931472, %v9427_v25  ;;  %v9429_v50 = vpop.eup %9428 }
0x4a42   :  { %v4619_v52 = vmul.f32 0.6931472, %v9429_v50 }
0x4a43   :  { %v6583_v62 = vadd.f32 %v6582_v49, %v6574_v16 }
0x4a44   :  { %v4620_v22 = vadd.f32 %v4619_v52, %v12224_v35 }
0x4a45   :  { %v6584_v0 = vsub.f32 %v11574_v28, %v6583_v62 }
0x4a46   :  { %v4621_v23 = vsub.f32 %v12225_v45, %v4620_v22 }
0x4a47   :  { %6606 = vrot.lane.b32.xlu0 %v6584_v0, %s9439_s8 }
0x4a48   :  { %v6612_v26 = vsel %vm12234_vm15, %v4621_v23, %v6599_v7 }
0x4a49   :  { %v6613_v47 = vsel %vm12235_vm11, %v6612_v26, %v6603_v29 }
0x4ab9   :  { %v6607_v4 = vpop.permute.xlu0 %6606 }
0x4aba   :  { %v6614_v58 = vsel %vm12236_vm2, %v6613_v47, %v6607_v4 }
0x4abb   :  { %6616 = vst [vmem:[%s11617_s3 + $0x8] sm:$0xff] %v6614_v58 }

</bundles_post_ra>
